<compile_context>
chip_gen: v7x
topology: tpu7x:2x2x1
jax: 0.10.0
libtpu: 0.0.40
codegen_flags: <defaults>
</compile_context>

<pallas_src>
import functools

import jax
import jax.numpy as jnp
from jax import lax
from jax.experimental import pallas as pl
from jax.experimental.pallas import tpu as pltpu


# ----------------------------- tiling helper -------------------------------

def _pick_tile(m, candidates=(256, 128, 64, 32, 16, 8)):
    """Largest row tile that divides m exactly (no pad/slice round trips)."""
    for t in candidates:
        if t <= m and m % t == 0:
            return t
    return m


# ----------------------------- Pallas kernels ------------------------------

def _norm_conv_kernel(x_ref, w_ref, b_ref, o_ref, *, eps, denom):
    """Instance-norm over rows (H*W) fused with a 1x1 conv (matmul + bias)."""
    x = x_ref[0]                                             # (HW, C) f32
    mean = jnp.mean(x, axis=0, keepdims=True)                # (1, C)
    xc = x - mean
    var = jnp.sum(xc * xc, axis=0, keepdims=True) * (1.0 / denom) + eps
    xn = xc * lax.rsqrt(var)                                 # normalized, f32
    acc = jnp.dot(xn.astype(jnp.bfloat16), w_ref[...],
                  preferred_element_type=jnp.float32) + b_ref[...]
    o_ref[0] = acc.astype(o_ref.dtype)


def _attention_kernel(f_ref, g_ref, h_ref, o_ref):
    """energy = F @ G^T ; attn = softmax(energy) ; out_s = attn @ H  (per batch)."""
    fq = f_ref[0]                                            # (tq,  C) bf16
    gk = g_ref[0]                                            # (HWs, C) bf16
    hv = h_ref[0]                                            # (HWs, C) bf16
    energy = lax.dot_general(fq, gk, (((1,), (1,)), ((), ())),
                             preferred_element_type=jnp.float32)   # (tq, HWs)
    m = jnp.max(energy, axis=-1, keepdims=True)
    p = jnp.exp(energy - m)
    denom = jnp.sum(p, axis=-1, keepdims=True)
    attn = (p * pl.reciprocal(denom, approx=True)).astype(jnp.bfloat16)
    o_ref[0] = jnp.dot(attn, hv,
                       preferred_element_type=jnp.float32).astype(o_ref.dtype)


def _pointwise_conv_kernel(x_ref, w_ref, b_ref, *rest, residual):
    """1x1 conv as matmul + bias, optionally fused with a residual add."""
    if residual:
        r_ref, o_ref = rest
    else:
        (o_ref,) = rest
    x = x_ref[...].astype(jnp.bfloat16)
    acc = jnp.dot(x, w_ref[...], preferred_element_type=jnp.float32) + b_ref[...]
    if residual:
        acc = acc + r_ref[...].astype(jnp.float32)
    o_ref[...] = acc.astype(o_ref.dtype)


# ------------------------------- wrappers -----------------------------------

def norm_conv(x_cl, w_bf16, bias_f32, out_dtype=jnp.bfloat16):
    """x_cl: (B, HW, C) f32. Returns (B, HW, C) of out_dtype."""
    B, HW, C = x_cl.shape
    return pl.pallas_call(
        functools.partial(_norm_conv_kernel, eps=1e-5, denom=float(HW - 1)),
        out_shape=jax.ShapeDtypeStruct((B, HW, C), out_dtype),
        grid_spec=pltpu.PrefetchScalarGridSpec(
            num_scalar_prefetch=0,
            grid=(B,),
            in_specs=[
                pl.BlockSpec((1, HW, C), lambda b: (b, 0, 0)),
                pl.BlockSpec((C, C), lambda b: (0, 0)),
                pl.BlockSpec((1, C), lambda b: (0, 0)),
            ],
            out_specs=pl.BlockSpec((1, HW, C), lambda b: (b, 0, 0)),
        ),
        compiler_params=pltpu.CompilerParams(
            dimension_semantics=("parallel",)),
    )(x_cl.astype(jnp.float32), w_bf16, bias_f32)


def pointwise_conv(x2d, w_bf16, bias_f32, residual=None, out_dtype=jnp.float32):
    """x2d: (M, C). Returns x2d @ W + b (+ residual) as (M, C) of out_dtype."""
    M, C = x2d.shape
    tm = _pick_tile(M)
    kernel = functools.partial(_pointwise_conv_kernel,
                               residual=residual is not None)
    in_specs = [
        pl.BlockSpec((tm, C), lambda i: (i, 0)),
        pl.BlockSpec((C, C), lambda i: (0, 0)),
        pl.BlockSpec((1, C), lambda i: (0, 0)),
    ]
    args = [x2d, w_bf16, bias_f32]
    if residual is not None:
        in_specs.append(pl.BlockSpec((tm, C), lambda i: (i, 0)))
        args.append(residual)
    return pl.pallas_call(
        kernel,
        out_shape=jax.ShapeDtypeStruct((M, C), out_dtype),
        grid_spec=pltpu.PrefetchScalarGridSpec(
            num_scalar_prefetch=0,
            grid=(M // tm,),
            in_specs=in_specs,
            out_specs=pl.BlockSpec((tm, C), lambda i: (i, 0)),
        ),
        compiler_params=pltpu.CompilerParams(
            dimension_semantics=("parallel",)),
    )(*args)


def attention_apply(f_cl, g_cl, h_cl):
    """f_cl: (B, HWc, C) bf16; g_cl, h_cl: (B, HWs, C) bf16 -> (B, HWc, C) f32."""
    B, HWc, C = f_cl.shape
    _, HWs, _ = g_cl.shape
    tq = _pick_tile(HWc)
    return pl.pallas_call(
        _attention_kernel,
        out_shape=jax.ShapeDtypeStruct((B, HWc, C), jnp.float32),
        grid_spec=pltpu.PrefetchScalarGridSpec(
            num_scalar_prefetch=0,
            grid=(B, HWc // tq),
            in_specs=[
                pl.BlockSpec((1, tq, C), lambda b, q: (b, q, 0)),
                pl.BlockSpec((1, HWs, C), lambda b, q: (b, 0, 0)),
                pl.BlockSpec((1, HWs, C), lambda b, q: (b, 0, 0)),
            ],
            out_specs=pl.BlockSpec((1, tq, C), lambda b, q: (b, q, 0)),
        ),
        compiler_params=pltpu.CompilerParams(
            dimension_semantics=("parallel", "parallel")),
    )(f_cl, g_cl, h_cl)


# ----------------------------- SANet forward --------------------------------

def init_sanet_params(key, in_dim):
    """nn.Conv2d(in_dim, in_dim, 1) default init: U(-1/sqrt(fan_in), 1/sqrt(fan_in))."""
    ks = jax.random.split(key, 8)
    bound = 1.0 / (in_dim ** 0.5)

    def conv_param(kw, kb):
        # weight stored as (C_in, C_out) for x @ W; equals torch weight[:, :, 0, 0].T
        w = jax.random.uniform(kw, (in_dim, in_dim), jnp.float32, -bound, bound)
        b = jax.random.uniform(kb, (in_dim,), jnp.float32, -bound, bound)
        return w.astype(jnp.bfloat16), b.reshape(1, in_dim).astype(jnp.float32)

    return {
        'f': conv_param(ks[0], ks[1]),
        'g': conv_param(ks[2], ks[3]),
        'h': conv_param(ks[4], ks[5]),
        'out': conv_param(ks[6], ks[7]),
    }


def sanet_forward(content_nchw, style_nchw, params):
    """Returns (out, out_s) in NCHW, matching SANet.forward semantics."""
    B, C, H, W = content_nchw.shape
    Bs, Cs, Hs_, Ws_ = style_nchw.shape
    HWc, HWs = H * W, Hs_ * Ws_

    content_cl = jnp.transpose(content_nchw, (0, 2, 3, 1)) \
                    .reshape(B, HWc, C).astype(jnp.float32)
    style_cl = jnp.transpose(style_nchw, (0, 2, 3, 1)) \
                  .reshape(Bs, HWs, Cs).astype(jnp.float32)

    wf, bias_f = params['f']
    wg, bias_g = params['g']
    wh, bias_h = params['h']
    wo, bias_o = params['out']

    # F = f(normal(content)), G = g(normal(style))   (fused norm + 1x1 conv)
    Fc = norm_conv(content_cl, wf, bias_f)                      # (B, HWc, C) bf16
    Gs = norm_conv(style_cl, wg, bias_g)                        # (B, HWs, C) bf16
    # H = h(style)   (no normalization, per the reference module)
    Hs = pointwise_conv(style_cl.reshape(B * HWs, C), wh, bias_h,
                        out_dtype=jnp.bfloat16).reshape(B, HWs, C)

    # attention = softmax(F @ G^T);  out_s = attention @ H   (channels-last)
    out_s_cl = attention_apply(Fc, Gs, Hs)                      # (B, HWc, C) f32

    # out = out_conv(out_s) + content   (fused matmul + bias + residual)
    out_cl = pointwise_conv(out_s_cl.reshape(B * HWc, C), wo, bias_o,
                            residual=content_cl.reshape(B * HWc, C),
                            out_dtype=jnp.float32)

    out = jnp.transpose(out_cl.reshape(B, H, W, C), (0, 3, 1, 2))
    out_s = jnp.transpose(out_s_cl.reshape(B, H, W, C), (0, 3, 1, 2))
    return out, out_s


# ---------------------------------- main -------------------------------------

if __name__ == "__main__":
    key = jax.random.PRNGKey(0)
    kc, ks, kp = jax.random.split(key, 3)

    # Small shapes consistent with the module (SANet: in_dim channels, 1x1 convs).
    B, C, H, W = 2, 64, 16, 16
    content = jax.random.normal(kc, (B, C, H, W), jnp.float32)
    style = jax.random.normal(ks, (B, C, H, W), jnp.float32)
    params = init_sanet_params(kp, C)

    out, out_s = jax.jit(sanet_forward)(content, style, params)
    jax.block_until_ready((out, out_s))

    assert out.shape == (B, C, H, W) and out_s.shape == (B, C, H, W)
    assert bool(jnp.isfinite(out).all()) and bool(jnp.isfinite(out_s).all())
    print("KERNEL_OK")
</pallas_src>

<mosaic_0001>
module attributes {stable_mosaic.version = 11 : i64} {
  func.func @_norm_conv_kernel(%arg0: i32, %arg1: memref<1x256x64xf32, #tpu.memory_space<vmem>>, %arg2: memref<64x64xbf16, #tpu.memory_space<vmem>>, %arg3: memref<1x64xf32, #tpu.memory_space<vmem>>, %arg4: memref<1x256x64xbf16, #tpu.memory_space<vmem>>) attributes {dimension_semantics = [#tpu.dimension_semantics<parallel>], iteration_bounds = array<i64: 2>, scalar_prefetch = 0 : i64, scratch_operands = 0 : i64, tpu.core_type = #tpu.core_type<tc>, window_params = [{transform_indices = @transform_0, window_bounds = array<i64: 1, 256, 64>}, {pipeline_mode = #tpu.pipeline_mode<synchronous>, transform_indices = @transform_1, window_bounds = array<i64: 64, 64>}, {pipeline_mode = #tpu.pipeline_mode<synchronous>, transform_indices = @transform_2, window_bounds = array<i64: 1, 64>}, {transform_indices = @transform_3, window_bounds = array<i64: 1, 256, 64>}]} {
    %c0 = arith.constant 0 : index
    %c0_0 = arith.constant 0 : index
    %c0_1 = arith.constant 0 : index
    %0 = vector.load %arg1[%c0, %c0_0, %c0_1] : memref<1x256x64xf32, #tpu.memory_space<vmem>>, vector<1x256x64xf32>
    %1 = vector.shape_cast %0 : vector<1x256x64xf32> to vector<256x64xf32>
    %cst = arith.constant dense<0.000000e+00> : vector<64xf32>
    %2 = vector.multi_reduction <add>, %1, %cst [0] : vector<256x64xf32> to vector<64xf32>
    %3 = vector.shape_cast %2 : vector<64xf32> to vector<1x64xf32>
    %cst_2 = arith.constant 2.560000e+02 : f32
    %4 = vector.broadcast %cst_2 : f32 to vector<1x64xf32>
    %5 = arith.divf %3, %4 : vector<1x64xf32>
    %6 = vector.broadcast %5 : vector<1x64xf32> to vector<256x64xf32>
    %7 = arith.subf %1, %6 : vector<256x64xf32>
    %8 = arith.mulf %7, %7 : vector<256x64xf32>
    %cst_3 = arith.constant dense<0.000000e+00> : vector<64xf32>
    %9 = vector.multi_reduction <add>, %8, %cst_3 [0] : vector<256x64xf32> to vector<64xf32>
    %10 = vector.shape_cast %9 : vector<64xf32> to vector<1x64xf32>
    %cst_4 = arith.constant 0.00392156886 : f32
    %11 = vector.broadcast %cst_4 : f32 to vector<1x64xf32>
    %12 = arith.mulf %10, %11 : vector<1x64xf32>
    %cst_5 = arith.constant 9.99999974E-6 : f32
    %13 = vector.broadcast %cst_5 : f32 to vector<1x64xf32>
    %14 = arith.addf %12, %13 : vector<1x64xf32>
    %15 = math.rsqrt %14 : vector<1x64xf32>
    %16 = vector.broadcast %15 : vector<1x64xf32> to vector<256x64xf32>
    %17 = arith.mulf %7, %16 : vector<256x64xf32>
    %18 = arith.truncf %17 : vector<256x64xf32> to vector<256x64xbf16>
    %c0_6 = arith.constant 0 : index
    %c0_7 = arith.constant 0 : index
    %19 = vector.load %arg2[%c0_6, %c0_7] : memref<64x64xbf16, #tpu.memory_space<vmem>>, vector<64x64xbf16>
    %cst_8 = arith.constant dense<0.000000e+00> : vector<256x64xf32>
    %20 = tpu.matmul %18, %19, %cst_8 {dimension_numbers = #tpu.dot_dimension_numbers<[1], [0], [0], [1], [0, 0, 1, 1], [], []>} : vector<256x64xbf16>, vector<64x64xbf16>, vector<256x64xf32> -> vector<256x64xf32>
    %c0_9 = arith.constant 0 : index
    %c0_10 = arith.constant 0 : index
    %21 = vector.load %arg3[%c0_9, %c0_10] : memref<1x64xf32, #tpu.memory_space<vmem>>, vector<1x64xf32>
    %22 = vector.broadcast %21 : vector<1x64xf32> to vector<256x64xf32>
    %23 = arith.addf %20, %22 : vector<256x64xf32>
    %24 = arith.truncf %23 : vector<256x64xf32> to vector<256x64xbf16>
    %c0_11 = arith.constant 0 : index
    %c0_12 = arith.constant 0 : index
    %c0_13 = arith.constant 0 : index
    %25 = vector.load %arg4[%c0_11, %c0_12, %c0_13] : memref<1x256x64xbf16, #tpu.memory_space<vmem>>, vector<1x256x64xbf16>
    %26 = vector.shape_cast %25 : vector<1x256x64xbf16> to vector<256x64xbf16>
    %27 = vector.shape_cast %24 : vector<256x64xbf16> to vector<1x256x64xbf16>
    tpu.vector_store %arg4[%c0_11, %c0_12, %c0_13], %27 {strides = array<i32>} : memref<1x256x64xbf16, #tpu.memory_space<vmem>>, vector<1x256x64xbf16>,
    return
  }
  func.func @transform_0(%arg0: i32) -> (i32, i32, i32) {
    %c0_i32 = arith.constant 0 : i32
    %c0_i32_0 = arith.constant 0 : i32
    %c0_i32_1 = arith.constant 0 : i32
    return %arg0, %c0_i32, %c0_i32_0 : i32, i32, i32
  }
  func.func @transform_1(%arg0: i32) -> (i32, i32) {
    %c0_i32 = arith.constant 0 : i32
    %c0_i32_0 = arith.constant 0 : i32
    %c0_i32_1 = arith.constant 0 : i32
    return %c0_i32, %c0_i32_0 : i32, i32
  }
  func.func @transform_2(%arg0: i32) -> (i32, i32) {
    %c0_i32 = arith.constant 0 : i32
    %c0_i32_0 = arith.constant 0 : i32
    %c0_i32_1 = arith.constant 0 : i32
    return %c0_i32, %c0_i32_0 : i32, i32
  }
  func.func @transform_3(%arg0: i32) -> (i32, i32, i32) {
    %c0_i32 = arith.constant 0 : i32
    %c0_i32_0 = arith.constant 0 : i32
    %c0_i32_1 = arith.constant 0 : i32
    return %arg0, %c0_i32, %c0_i32_0 : i32, i32, i32
  }
}

module attributes {stable_mosaic.version = 11 : i64} {
  func.func @_norm_conv_kernel(%arg0: i32, %arg1: memref<1x256x64xf32, #tpu.memory_space<vmem>>, %arg2: memref<64x64xbf16, #tpu.memory_space<vmem>>, %arg3: memref<1x64xf32, #tpu.memory_space<vmem>>, %arg4: memref<1x256x64xbf16, #tpu.memory_space<vmem>>) attributes {dimension_semantics = [#tpu.dimension_semantics<parallel>], iteration_bounds = array<i64: 2>, scalar_prefetch = 0 : i64, scratch_operands = 0 : i64, tpu.core_type = #tpu.core_type<tc>, window_params = [{transform_indices = @transform_0, window_bounds = array<i64: 1, 256, 64>}, {pipeline_mode = #tpu.pipeline_mode<synchronous>, transform_indices = @transform_1, window_bounds = array<i64: 64, 64>}, {pipeline_mode = #tpu.pipeline_mode<synchronous>, transform_indices = @transform_2, window_bounds = array<i64: 1, 64>}, {transform_indices = @transform_3, window_bounds = array<i64: 1, 256, 64>}]} {
    %c0 = arith.constant 0 : index
    %c0_0 = arith.constant 0 : index
    %c0_1 = arith.constant 0 : index
    %0 = vector.load %arg1[%c0, %c0_0, %c0_1] : memref<1x256x64xf32, #tpu.memory_space<vmem>>, vector<1x256x64xf32>
    %1 = vector.shape_cast %0 : vector<1x256x64xf32> to vector<256x64xf32>
    %cst = arith.constant dense<0.000000e+00> : vector<64xf32>
    %2 = vector.multi_reduction <add>, %1, %cst [0] : vector<256x64xf32> to vector<64xf32>
    %3 = vector.shape_cast %2 : vector<64xf32> to vector<1x64xf32>
    %cst_2 = arith.constant 2.560000e+02 : f32
    %4 = vector.broadcast %cst_2 : f32 to vector<1x64xf32>
    %5 = arith.divf %3, %4 : vector<1x64xf32>
    %6 = vector.broadcast %5 : vector<1x64xf32> to vector<256x64xf32>
    %7 = arith.subf %1, %6 : vector<256x64xf32>
    %8 = arith.mulf %7, %7 : vector<256x64xf32>
    %cst_3 = arith.constant dense<0.000000e+00> : vector<64xf32>
    %9 = vector.multi_reduction <add>, %8, %cst_3 [0] : vector<256x64xf32> to vector<64xf32>
    %10 = vector.shape_cast %9 : vector<64xf32> to vector<1x64xf32>
    %cst_4 = arith.constant 0.00392156886 : f32
    %11 = vector.broadcast %cst_4 : f32 to vector<1x64xf32>
    %12 = arith.mulf %10, %11 : vector<1x64xf32>
    %cst_5 = arith.constant 9.99999974E-6 : f32
    %13 = vector.broadcast %cst_5 : f32 to vector<1x64xf32>
    %14 = arith.addf %12, %13 : vector<1x64xf32>
    %15 = math.rsqrt %14 : vector<1x64xf32>
    %16 = vector.broadcast %15 : vector<1x64xf32> to vector<256x64xf32>
    %17 = arith.mulf %7, %16 : vector<256x64xf32>
    %18 = arith.truncf %17 : vector<256x64xf32> to vector<256x64xbf16>
    %c0_6 = arith.constant 0 : index
    %c0_7 = arith.constant 0 : index
    %19 = vector.load %arg2[%c0_6, %c0_7] : memref<64x64xbf16, #tpu.memory_space<vmem>>, vector<64x64xbf16>
    %cst_8 = arith.constant dense<0.000000e+00> : vector<256x64xf32>
    %20 = tpu.matmul %18, %19, %cst_8 {dimension_numbers = #tpu.dot_dimension_numbers<[1], [0], [0], [1], [0, 0, 1, 1], [], []>} : vector<256x64xbf16>, vector<64x64xbf16>, vector<256x64xf32> -> vector<256x64xf32>
    %c0_9 = arith.constant 0 : index
    %c0_10 = arith.constant 0 : index
    %21 = vector.load %arg3[%c0_9, %c0_10] : memref<1x64xf32, #tpu.memory_space<vmem>>, vector<1x64xf32>
    %22 = vector.broadcast %21 : vector<1x64xf32> to vector<256x64xf32>
    %23 = arith.addf %20, %22 : vector<256x64xf32>
    %24 = arith.truncf %23 : vector<256x64xf32> to vector<256x64xbf16>
    %c0_11 = arith.constant 0 : index
    %c0_12 = arith.constant 0 : index
    %c0_13 = arith.constant 0 : index
    %25 = vector.load %arg4[%c0_11, %c0_12, %c0_13] : memref<1x256x64xbf16, #tpu.memory_space<vmem>>, vector<1x256x64xbf16>
    %26 = vector.shape_cast %25 : vector<1x256x64xbf16> to vector<256x64xbf16>
    %27 = vector.shape_cast %24 : vector<256x64xbf16> to vector<1x256x64xbf16>
    tpu.vector_store %arg4[%c0_11, %c0_12, %c0_13], %27 {strides = array<i32>} : memref<1x256x64xbf16, #tpu.memory_space<vmem>>, vector<1x256x64xbf16>,
    return
  }
  func.func @transform_0(%arg0: i32) -> (i32, i32, i32) {
    %c0_i32 = arith.constant 0 : i32
    %c0_i32_0 = arith.constant 0 : i32
    %c0_i32_1 = arith.constant 0 : i32
    return %arg0, %c0_i32, %c0_i32_0 : i32, i32, i32
  }
  func.func @transform_1(%arg0: i32) -> (i32, i32) {
    %c0_i32 = arith.constant 0 : i32
    %c0_i32_0 = arith.constant 0 : i32
    %c0_i32_1 = arith.constant 0 : i32
    return %c0_i32, %c0_i32_0 : i32, i32
  }
  func.func @transform_2(%arg0: i32) -> (i32, i32) {
    %c0_i32 = arith.constant 0 : i32
    %c0_i32_0 = arith.constant 0 : i32
    %c0_i32_1 = arith.constant 0 : i32
    return %c0_i32, %c0_i32_0 : i32, i32
  }
  func.func @transform_3(%arg0: i32) -> (i32, i32, i32) {
    %c0_i32 = arith.constant 0 : i32
    %c0_i32_0 = arith.constant 0 : i32
    %c0_i32_1 = arith.constant 0 : i32
    return %arg0, %c0_i32, %c0_i32_0 : i32, i32, i32
  }
}

module attributes {stable_mosaic.version = 11 : i64} {
  func.func @_pointwise_conv_kernel(%arg0: i32, %arg1: memref<256x64xf32, #tpu.memory_space<vmem>>, %arg2: memref<64x64xbf16, #tpu.memory_space<vmem>>, %arg3: memref<1x64xf32, #tpu.memory_space<vmem>>, %arg4: memref<256x64xbf16, #tpu.memory_space<vmem>>) attributes {dimension_semantics = [#tpu.dimension_semantics<parallel>], iteration_bounds = array<i64: 2>, scalar_prefetch = 0 : i64, scratch_operands = 0 : i64, tpu.core_type = #tpu.core_type<tc>, window_params = [{transform_indices = @transform_0, window_bounds = array<i64: 256, 64>}, {pipeline_mode = #tpu.pipeline_mode<synchronous>, transform_indices = @transform_1, window_bounds = array<i64: 64, 64>}, {pipeline_mode = #tpu.pipeline_mode<synchronous>, transform_indices = @transform_2, window_bounds = array<i64: 1, 64>}, {transform_indices = @transform_3, window_bounds = array<i64: 256, 64>}]} {
    %c0 = arith.constant 0 : index
    %c0_0 = arith.constant 0 : index
    %0 = vector.load %arg1[%c0, %c0_0] : memref<256x64xf32, #tpu.memory_space<vmem>>, vector<256x64xf32>
    %1 = arith.truncf %0 : vector<256x64xf32> to vector<256x64xbf16>
    %c0_1 = arith.constant 0 : index
    %c0_2 = arith.constant 0 : index
    %2 = vector.load %arg2[%c0_1, %c0_2] : memref<64x64xbf16, #tpu.memory_space<vmem>>, vector<64x64xbf16>
    %cst = arith.constant dense<0.000000e+00> : vector<256x64xf32>
    %3 = tpu.matmul %1, %2, %cst {dimension_numbers = #tpu.dot_dimension_numbers<[1], [0], [0], [1], [0, 0, 1, 1], [], []>} : vector<256x64xbf16>, vector<64x64xbf16>, vector<256x64xf32> -> vector<256x64xf32>
    %c0_3 = arith.constant 0 : index
    %c0_4 = arith.constant 0 : index
    %4 = vector.load %arg3[%c0_3, %c0_4] : memref<1x64xf32, #tpu.memory_space<vmem>>, vector<1x64xf32>
    %5 = vector.broadcast %4 : vector<1x64xf32> to vector<256x64xf32>
    %6 = arith.addf %3, %5 : vector<256x64xf32>
    %7 = arith.truncf %6 : vector<256x64xf32> to vector<256x64xbf16>
    %c0_5 = arith.constant 0 : index
    %c0_6 = arith.constant 0 : index
    %8 = vector.load %arg4[%c0_5, %c0_6] : memref<256x64xbf16, #tpu.memory_space<vmem>>, vector<256x64xbf16>
    tpu.vector_store %arg4[%c0_5, %c0_6], %7 {strides = array<i32>} : memref<256x64xbf16, #tpu.memory_space<vmem>>, vector<256x64xbf16>,
    return
  }
  func.func @transform_0(%arg0: i32) -> (i32, i32) {
    %c0_i32 = arith.constant 0 : i32
    %c0_i32_0 = arith.constant 0 : i32
    return %arg0, %c0_i32 : i32, i32
  }
  func.func @transform_1(%arg0: i32) -> (i32, i32) {
    %c0_i32 = arith.constant 0 : i32
    %c0_i32_0 = arith.constant 0 : i32
    %c0_i32_1 = arith.constant 0 : i32
    return %c0_i32, %c0_i32_0 : i32, i32
  }
  func.func @transform_2(%arg0: i32) -> (i32, i32) {
    %c0_i32 = arith.constant 0 : i32
    %c0_i32_0 = arith.constant 0 : i32
    %c0_i32_1 = arith.constant 0 : i32
    return %c0_i32, %c0_i32_0 : i32, i32
  }
  func.func @transform_3(%arg0: i32) -> (i32, i32) {
    %c0_i32 = arith.constant 0 : i32
    %c0_i32_0 = arith.constant 0 : i32
    return %arg0, %c0_i32 : i32, i32
  }
}

module attributes {stable_mosaic.version = 11 : i64} {
  func.func @_attention_kernel(%arg0: i32, %arg1: i32, %arg2: memref<1x256x64xbf16, #tpu.memory_space<vmem>>, %arg3: memref<1x256x64xbf16, #tpu.memory_space<vmem>>, %arg4: memref<1x256x64xbf16, #tpu.memory_space<vmem>>, %arg5: memref<1x256x64xf32, #tpu.memory_space<vmem>>) attributes {dimension_semantics = [#tpu.dimension_semantics<parallel>, #tpu.dimension_semantics<parallel>], iteration_bounds = array<i64: 2, 1>, scalar_prefetch = 0 : i64, scratch_operands = 0 : i64, tpu.core_type = #tpu.core_type<tc>, window_params = [{transform_indices = @transform_0, window_bounds = array<i64: 1, 256, 64>}, {transform_indices = @transform_1, window_bounds = array<i64: 1, 256, 64>}, {transform_indices = @transform_2, window_bounds = array<i64: 1, 256, 64>}, {transform_indices = @transform_3, window_bounds = array<i64: 1, 256, 64>}]} {
    %c0 = arith.constant 0 : index
    %c0_0 = arith.constant 0 : index
    %c0_1 = arith.constant 0 : index
    %0 = vector.load %arg2[%c0, %c0_0, %c0_1] : memref<1x256x64xbf16, #tpu.memory_space<vmem>>, vector<1x256x64xbf16>
    %1 = vector.shape_cast %0 : vector<1x256x64xbf16> to vector<256x64xbf16>
    %c0_2 = arith.constant 0 : index
    %c0_3 = arith.constant 0 : index
    %c0_4 = arith.constant 0 : index
    %2 = vector.load %arg3[%c0_2, %c0_3, %c0_4] : memref<1x256x64xbf16, #tpu.memory_space<vmem>>, vector<1x256x64xbf16>
    %3 = vector.shape_cast %2 : vector<1x256x64xbf16> to vector<256x64xbf16>
    %c0_5 = arith.constant 0 : index
    %c0_6 = arith.constant 0 : index
    %c0_7 = arith.constant 0 : index
    %4 = vector.load %arg4[%c0_5, %c0_6, %c0_7] : memref<1x256x64xbf16, #tpu.memory_space<vmem>>, vector<1x256x64xbf16>
    %5 = vector.shape_cast %4 : vector<1x256x64xbf16> to vector<256x64xbf16>
    %cst = arith.constant dense<0.000000e+00> : vector<256x256xf32>
    %6 = tpu.matmul %1, %3, %cst {dimension_numbers = #tpu.dot_dimension_numbers<[1], [1], [0], [0], [0, 0, 1, 0], [], []>} : vector<256x64xbf16>, vector<256x64xbf16>, vector<256x256xf32> -> vector<256x256xf32>
    %cst_8 = arith.constant dense<0xFF800000> : vector<256xf32>
    %7 = vector.multi_reduction <maximumf>, %6, %cst_8 [1] : vector<256x256xf32> to vector<256xf32>
    %8 = vector.shape_cast %7 : vector<256xf32> to vector<256x1xf32>
    %9 = vector.broadcast %8 : vector<256x1xf32> to vector<256x256xf32>
    %10 = arith.subf %6, %9 : vector<256x256xf32>
    %11 = math.exp %10 : vector<256x256xf32>
    %cst_9 = arith.constant dense<0.000000e+00> : vector<256xf32>
    %12 = vector.multi_reduction <add>, %11, %cst_9 [1] : vector<256x256xf32> to vector<256xf32>
    %13 = vector.shape_cast %12 : vector<256xf32> to vector<256x1xf32>
    %14 = tpu.reciprocal %13 {approx = true} : vector<256x1xf32> -> vector<256x1xf32>
    %15 = vector.broadcast %14 : vector<256x1xf32> to vector<256x256xf32>
    %16 = arith.mulf %11, %15 : vector<256x256xf32>
    %17 = arith.truncf %16 : vector<256x256xf32> to vector<256x256xbf16>
    %cst_10 = arith.constant dense<0.000000e+00> : vector<256x64xf32>
    %18 = tpu.matmul %17, %5, %cst_10 {dimension_numbers = #tpu.dot_dimension_numbers<[1], [0], [0], [1], [0, 0, 1, 1], [], []>} : vector<256x256xbf16>, vector<256x64xbf16>, vector<256x64xf32> -> vector<256x64xf32>
    %c0_11 = arith.constant 0 : index
    %c0_12 = arith.constant 0 : index
    %c0_13 = arith.constant 0 : index
    %19 = vector.load %arg5[%c0_11, %c0_12, %c0_13] : memref<1x256x64xf32, #tpu.memory_space<vmem>>, vector<1x256x64xf32>
    %20 = vector.shape_cast %19 : vector<1x256x64xf32> to vector<256x64xf32>
    %21 = vector.shape_cast %18 : vector<256x64xf32> to vector<1x256x64xf32>
    tpu.vector_store %arg5[%c0_11, %c0_12, %c0_13], %21 {strides = array<i32>} : memref<1x256x64xf32, #tpu.memory_space<vmem>>, vector<1x256x64xf32>,
    return
  }
  func.func @transform_0(%arg0: i32, %arg1: i32) -> (i32, i32, i32) {
    %c0_i32 = arith.constant 0 : i32
    %c0_i32_0 = arith.constant 0 : i32
    return %arg0, %arg1, %c0_i32 : i32, i32, i32
  }
  func.func @transform_1(%arg0: i32, %arg1: i32) -> (i32, i32, i32) {
    %c0_i32 = arith.constant 0 : i32
    %c0_i32_0 = arith.constant 0 : i32
    %c0_i32_1 = arith.constant 0 : i32
    return %arg0, %c0_i32, %c0_i32_0 : i32, i32, i32
  }
  func.func @transform_2(%arg0: i32, %arg1: i32) -> (i32, i32, i32) {
    %c0_i32 = arith.constant 0 : i32
    %c0_i32_0 = arith.constant 0 : i32
    %c0_i32_1 = arith.constant 0 : i32
    return %arg0, %c0_i32, %c0_i32_0 : i32, i32, i32
  }
  func.func @transform_3(%arg0: i32, %arg1: i32) -> (i32, i32, i32) {
    %c0_i32 = arith.constant 0 : i32
    %c0_i32_0 = arith.constant 0 : i32
    return %arg0, %arg1, %c0_i32 : i32, i32, i32
  }
}

module attributes {stable_mosaic.version = 11 : i64} {
  func.func @_pointwise_conv_kernel(%arg0: i32, %arg1: memref<256x64xf32, #tpu.memory_space<vmem>>, %arg2: memref<64x64xbf16, #tpu.memory_space<vmem>>, %arg3: memref<1x64xf32, #tpu.memory_space<vmem>>, %arg4: memref<256x64xf32, #tpu.memory_space<vmem>>, %arg5: memref<256x64xf32, #tpu.memory_space<vmem>>) attributes {dimension_semantics = [#tpu.dimension_semantics<parallel>], iteration_bounds = array<i64: 2>, scalar_prefetch = 0 : i64, scratch_operands = 0 : i64, tpu.core_type = #tpu.core_type<tc>, window_params = [{transform_indices = @transform_0, window_bounds = array<i64: 256, 64>}, {pipeline_mode = #tpu.pipeline_mode<synchronous>, transform_indices = @transform_1, window_bounds = array<i64: 64, 64>}, {pipeline_mode = #tpu.pipeline_mode<synchronous>, transform_indices = @transform_2, window_bounds = array<i64: 1, 64>}, {transform_indices = @transform_3, window_bounds = array<i64: 256, 64>}, {transform_indices = @transform_4, window_bounds = array<i64: 256, 64>}]} {
    %c0 = arith.constant 0 : index
    %c0_0 = arith.constant 0 : index
    %0 = vector.load %arg1[%c0, %c0_0] : memref<256x64xf32, #tpu.memory_space<vmem>>, vector<256x64xf32>
    %1 = arith.truncf %0 : vector<256x64xf32> to vector<256x64xbf16>
    %c0_1 = arith.constant 0 : index
    %c0_2 = arith.constant 0 : index
    %2 = vector.load %arg2[%c0_1, %c0_2] : memref<64x64xbf16, #tpu.memory_space<vmem>>, vector<64x64xbf16>
    %cst = arith.constant dense<0.000000e+00> : vector<256x64xf32>
    %3 = tpu.matmul %1, %2, %cst {dimension_numbers = #tpu.dot_dimension_numbers<[1], [0], [0], [1], [0, 0, 1, 1], [], []>} : vector<256x64xbf16>, vector<64x64xbf16>, vector<256x64xf32> -> vector<256x64xf32>
    %c0_3 = arith.constant 0 : index
    %c0_4 = arith.constant 0 : index
    %4 = vector.load %arg3[%c0_3, %c0_4] : memref<1x64xf32, #tpu.memory_space<vmem>>, vector<1x64xf32>
    %5 = vector.broadcast %4 : vector<1x64xf32> to vector<256x64xf32>
    %6 = arith.addf %3, %5 : vector<256x64xf32>
    %c0_5 = arith.constant 0 : index
    %c0_6 = arith.constant 0 : index
    %7 = vector.load %arg4[%c0_5, %c0_6] : memref<256x64xf32, #tpu.memory_space<vmem>>, vector<256x64xf32>
    %8 = arith.addf %6, %7 : vector<256x64xf32>
    %c0_7 = arith.constant 0 : index
    %c0_8 = arith.constant 0 : index
    %9 = vector.load %arg5[%c0_7, %c0_8] : memref<256x64xf32, #tpu.memory_space<vmem>>, vector<256x64xf32>
    tpu.vector_store %arg5[%c0_7, %c0_8], %8 {strides = array<i32>} : memref<256x64xf32, #tpu.memory_space<vmem>>, vector<256x64xf32>,
    return
  }
  func.func @transform_0(%arg0: i32) -> (i32, i32) {
    %c0_i32 = arith.constant 0 : i32
    %c0_i32_0 = arith.constant 0 : i32
    return %arg0, %c0_i32 : i32, i32
  }
  func.func @transform_1(%arg0: i32) -> (i32, i32) {
    %c0_i32 = arith.constant 0 : i32
    %c0_i32_0 = arith.constant 0 : i32
    %c0_i32_1 = arith.constant 0 : i32
    return %c0_i32, %c0_i32_0 : i32, i32
  }
  func.func @transform_2(%arg0: i32) -> (i32, i32) {
    %c0_i32 = arith.constant 0 : i32
    %c0_i32_0 = arith.constant 0 : i32
    %c0_i32_1 = arith.constant 0 : i32
    return %c0_i32, %c0_i32_0 : i32, i32
  }
  func.func @transform_3(%arg0: i32) -> (i32, i32) {
    %c0_i32 = arith.constant 0 : i32
    %c0_i32_0 = arith.constant 0 : i32
    return %arg0, %c0_i32 : i32, i32
  }
  func.func @transform_4(%arg0: i32) -> (i32, i32) {
    %c0_i32 = arith.constant 0 : i32
    %c0_i32_0 = arith.constant 0 : i32
    return %arg0, %c0_i32 : i32, i32
  }
}

</mosaic_0001>

<bundles_post_ra>
// kernel: sanet_forward.7
= control target key start
LH: loop header
LB: loop body
LE: loop exit
PB: predicated region body
PF: predicated region fallthrough
CT: control target
= control target key end

     0   :  { %s893_s12 = smov 0   ;;  %s1079_s0 = inlined_call_operand.vmem [shape: f32[512,64], index: 0, kind: input, shape index: {}]   ;;  %s1080_s1 = inlined_call_operand.vmem [shape: bf16[64,64], index: 1, kind: input, shape index: {}]   ;;  %s1081_s2 = inlined_call_operand.vmem [shape: f32[1,64], index: 2, kind: input, shape index: {}]   ;;  %s1082_s3 = inlined_call_operand.vmem [shape: bf16[512,64], index: 3, kind: output, shape index: {}]  }
   0x1 LB: > { %s689_s13 = sadd.s32 4294967295, %s871_s12   ;;  %p693_p0 = scmp.ge.s32.totalorder %s871_s12, 1  ;;  %s871_s12 = sphi %s893_s12, %s13_s12  }
   0x2   : > { %p138_p1 = scmp.lt.s32.totalorder %s871_s12, 3 }
   0x4   : > { %p139_p2 = pnand %p693_p0, %p138_p1 }
   0x5   : > { %v861_v0 = vld [vmem:[%s1080_s1] sm:$0xff] (!%p139_p2)   ;;  %s694_s16 = sshll.u32 (!%p139_p2), %s689_s13, 5  ;;  %v862_v1 = vld [vmem:[%s1080_s1 + $0x8] sm:$0xff] (!%p139_p2)   ;;  %v863_v2 = vld [vmem:[%s1080_s1 + $0x10] sm:$0xff] (!%p139_p2)   ;;  %vm262_vm0 = vcmask (!%p139_p2), 523264   ;;  %vm600_vm1 = vcmask (!%p139_p2), 519168  }
   0x6   : > { %142 = sbr.rel (%p139_p2) target bundleno = 267 (0x10b), region = 32  ;;  %p163_p3 = scmp.lt.s32.totalorder (!%p139_p2), %s694_s16, 63  ;;  %805 = vmatprep.subr.bf16.mxu0 (!%p139_p2), %v861_v0  ;;  %845 = vmatprep.subr.bf16.mxu1 (!%p139_p2), %v861_v0  ;;  %v864_v6 = vld [vmem:[%s1080_s1 + $0x18] sm:$0xff] (!%p139_p2)   ;;  %v972_v52 = vld [vmem:[%s1081_s2] ss:$0 sm:$0xff] (!%p139_p2) }
   0x7   : > { %806 = vmatpush3.bf16.msra.mxu0 (!%p139_p2), %v861_v0  ;;  %849 = vmatpush3.bf16.msra.mxu1 (!%p139_p2), %v861_v0 }
   0x8   : > { %807 = vmatprep.subr.bf16.mxu0 (!%p139_p2), %v862_v1  ;;  %846 = vmatprep.subr.bf16.mxu1 (!%p139_p2), %v862_v1 }
   0xb   : > { %808 = vmatpush3.bf16.msra.mxu0 (!%p139_p2), %v862_v1  ;;  %850 = vmatpush3.bf16.msra.mxu1 (!%p139_p2), %v862_v1 }
   0xc   : > { %809 = vmatprep.subr.bf16.mxu0 (!%p139_p2), %v863_v2  ;;  %847 = vmatprep.subr.bf16.mxu1 (!%p139_p2), %v863_v2 }
   0xd   : > { %s1084_s16 = smov (!%p163_p3, %s694_s16), 63 }
   0xe   : > { %s695_s21 = sshll.u32 %s1084_s16, 3  ;;  %s697_s29 = sshll.u32 %s1084_s16, 2 }
   0xf   : > { %s916_s24 = scalar_lea.vmem %s1079_s0, %s695_s21  ;;  %810 = vmatpush3.bf16.msra.mxu0 %v863_v2  ;;  %851 = vmatpush3.bf16.msra.mxu1 %v863_v2  ;;  %s980_s5 = scalar_lea.vmem %s1082_s3, %s697_s29 }
  0x10   : > { %v175_v3 = vld [vmem:[%s916_s24] sm:$0xff]  ;;  %v176_v4 = vld [vmem:[%s916_s24 + $0x8] sm:$0xff]  ;;  %v177_v10 = vld [vmem:[%s916_s24 + $0x10] sm:$0xff]  ;;  %811 = vmatprep.subr.bf16.mxu0 %v864_v6  ;;  %848 = vmatprep.subr.bf16.mxu1 %v864_v6 }
  0x11   : > { %v191_v5 = vld [vmem:[%s916_s24 + $0x80] sm:$0xff]  ;;  %v207_v7 = vpack.c.bf16 %v176_v4, %v175_v3  ;;  %v192_v8 = vld [vmem:[%s916_s24 + $0x88] sm:$0xff]  ;;  %v178_v11 = vld [vmem:[%s916_s24 + $0x18] sm:$0xff] }
  0x12   : > { %v215_v9 = vpack.c.bf16 %v192_v8, %v191_v5  ;;  %v193_v12 = vld [vmem:[%s916_s24 + $0x90] sm:$0xff]  ;;  %v194_v13 = vld [vmem:[%s916_s24 + $0x98] sm:$0xff]  ;;  %v179_v14 = vld [vmem:[%s916_s24 + $0x20] sm:$0xff]  ;;  %v208_v18 = vpack.c.bf16 %v178_v11, %v177_v10 }
  0x13   : > { %813 = vmatprep.mubr.msk.bf16.mxu0 %vm262_vm0, %v207_v7  ;;  %v180_v15 = vld [vmem:[%s916_s24 + $0x28] sm:$0xff]  ;;  %v195_v16 = vld [vmem:[%s916_s24 + $0xa0] sm:$0xff]  ;;  %v216_v19 = vpack.c.bf16 %v194_v13, %v193_v12  ;;  %812 = vmatpush3.bf16.msra.mxu0 %v864_v6  ;;  %v181_v22 = vld [vmem:[%s916_s24 + $0x30] sm:$0xff] }
  0x14   : > { %v196_v17 = vld [vmem:[%s916_s24 + $0xa8] sm:$0xff]  ;;  %829 = vmatprep.mubr.msk.bf16.mxu1 %vm262_vm0, %v215_v9  ;;  %852 = vmatpush3.bf16.msra.mxu1 %v864_v6  ;;  %v209_v20 = vpack.c.bf16 %v180_v15, %v179_v14  ;;  %v182_v23 = vld [vmem:[%s916_s24 + $0x38] sm:$0xff]  ;;  %v197_v24 = vld [vmem:[%s916_s24 + $0xb0] sm:$0xff] }
  0x15   : > { %v217_v21 = vpack.c.bf16 %v196_v17, %v195_v16  ;;  %v198_v25 = vld [vmem:[%s916_s24 + $0xb8] sm:$0xff]  ;;  %v183_v26 = vld [vmem:[%s916_s24 + $0x40] sm:$0xff]  ;;  %v184_v27 = vld [vmem:[%s916_s24 + $0x48] sm:$0xff]  ;;  %v210_v30 = vpack.c.bf16 %v182_v23, %v181_v22 }
  0x16   : > { %814 = vmatmul.mubr.msk.bf16.vlgmr.msra.gmra.mrb[0].mxu0 %vm262_vm0, %v208_v18  ;;  %v199_v28 = vld [vmem:[%s916_s24 + $0xc0] sm:$0xff]  ;;  %v200_v29 = vld [vmem:[%s916_s24 + $0xc8] sm:$0xff]  ;;  %v218_v31 = vpack.c.bf16 %v198_v25, %v197_v24  ;;  %v211_v32 = vpack.c.bf16 %v184_v27, %v183_v26  ;;  %v185_v34 = vld [vmem:[%s916_s24 + $0x50] sm:$0xff] }
  0x17   : > { %830 = vmatmul.mubr.msk.bf16.vlgmr.msra.gmra.mrb[0].mxu1 %vm262_vm0, %v216_v19  ;;  %817 = vmatprep.mubr.msk.bf16.mxu0 %vm262_vm0, %v209_v20  ;;  %v219_v33 = vpack.c.bf16 %v200_v29, %v199_v28  ;;  %v186_v35 = vld [vmem:[%s916_s24 + $0x58] sm:$0xff]  ;;  %v201_v36 = vld [vmem:[%s916_s24 + $0xd0] sm:$0xff]  ;;  %v187_v38 = vld [vmem:[%s916_s24 + $0x60] sm:$0xff] }
  0x18   : > { %833 = vmatprep.mubr.msk.bf16.mxu1 %vm262_vm0, %v217_v21  ;;  %v202_v37 = vld [vmem:[%s916_s24 + $0xd8] sm:$0xff]  ;;  %v188_v39 = vld [vmem:[%s916_s24 + $0x68] sm:$0xff]  ;;  %v203_v40 = vld [vmem:[%s916_s24 + $0xe0] sm:$0xff]  ;;  %v212_v42 = vpack.c.bf16 %v186_v35, %v185_v34 }
  0x19   : > { %v204_v41 = vld [vmem:[%s916_s24 + $0xe8] sm:$0xff]  ;;  %v220_v43 = vpack.c.bf16 %v202_v37, %v201_v36  ;;  %v213_v44 = vpack.c.bf16 %v188_v39, %v187_v38  ;;  %v189_v46 = vld [vmem:[%s916_s24 + $0x70] sm:$0xff]  ;;  %v190_v47 = vld [vmem:[%s916_s24 + $0x78] sm:$0xff] }
  0x1a   : > { %v221_v45 = vpack.c.bf16 %v204_v41, %v203_v40  ;;  %v205_v48 = vld [vmem:[%s916_s24 + $0xf0] sm:$0xff]  ;;  %v206_v49 = vld [vmem:[%s916_s24 + $0xf8] sm:$0xff]  ;;  %v214_v50 = vpack.c.bf16 %v190_v47, %v189_v46 }
  0x1b   : > { %v222_v51 = vpack.c.bf16 %v206_v49, %v205_v48 }
  0x1e   : > { %818 = vmatmul.mubr.msk.bf16.gmra.mrb[4].mxu0 %vm262_vm0, %v210_v30 }
  0x1f   : > { %834 = vmatmul.mubr.msk.bf16.gmra.mrb[4].mxu1 %vm262_vm0, %v218_v31  ;;  %821 = vmatprep.mubr.msk.bf16.mxu0 %vm262_vm0, %v211_v32 }
  0x20   : > { %837 = vmatprep.mubr.msk.bf16.mxu1 %vm262_vm0, %v219_v33 }
  0x26   : > { %822 = vmatmul.mubr.msk.bf16.gmra.mrb[8].mxu0 %vm262_vm0, %v212_v42 }
  0x27   : > { %838 = vmatmul.mubr.msk.bf16.gmra.mrb[8].mxu1 %vm262_vm0, %v220_v43  ;;  %825 = vmatprep.mubr.msk.bf16.mxu0 %vm262_vm0, %v213_v44 }
  0x28   : > { %841 = vmatprep.mubr.msk.bf16.mxu1 %vm262_vm0, %v221_v45 }
  0x2e   : > { %826 = vmatmul.mubr.msk.bf16.gmra.mrb[12].mxu0 %vm262_vm0, %v214_v50 }
  0x2f   : > { %842 = vmatmul.mubr.msk.bf16.gmra.mrb[12].mxu1 %vm262_vm0, %v222_v51 }
  0xe9   : > { %v815_v53 = vpop.f32.mrb[0].mxu0 }
  0xea   : > { %v831_v54 = vpop.f32.mrb[0].mxu1  ;;  %v354_v55 = vadd.f32 %v815_v53, %v972_v52  ;;  %v345_v57 = vpop.f32.mrb[1].mxu0 }
  0xeb   : > { %v418_v56 = vadd.f32 %v831_v54, %v972_v52  ;;  %v409_v58 = vpop.f32.mrb[1].mxu1  ;;  %v346_v59 = vadd.f32 %v972_v52, %v345_v57  ;;  %v816_v61 = vpop.f32.mrb[2].mxu0 }
  0xec   : > { %v410_v60 = vadd.f32 %v972_v52, %v409_v58  ;;  %v832_v62 = vpop.f32.mrb[2].mxu1  ;;  %v755_v63 = vpack.c.bf16 %v354_v55, %v354_v55  ;;  %v357_v1 = vadd.f32 %v816_v61, %v972_v52  ;;  %v348_v3 = vpop.f32.mrb[3].mxu0 }
  0xed   : > { %v771_v0 = vpack.c.bf16 %v418_v56, %v418_v56  ;;  %v421_v2 = vadd.f32 %v832_v62, %v972_v52  ;;  %v412_v4 = vpop.f32.mrb[3].mxu1  ;;  %v753_v5 = vpack.c.bf16 %v346_v59, %v346_v59  ;;  %v349_v7 = vadd.f32 %v972_v52, %v348_v3 }
  0xee   : > { %v769_v6 = vpack.c.bf16 %v410_v60, %v410_v60  ;;  %v413_v8 = vadd.f32 %v972_v52, %v412_v4  ;;  %603 = vst.msk [vmem:[%s980_s5 + $0x8] sm:$0xf] %vm600_vm1, %v755_v63  ;;  %v756_v9 = vpack.c.bf16 %v357_v1, %v357_v1 }
  0xef   : > { %619 = vst.msk [vmem:[%s980_s5 + $0x48] sm:$0xf] %vm600_vm1, %v771_v0  ;;  %v772_v10 = vpack.c.bf16 %v421_v2, %v421_v2  ;;  %601 = vst.msk [vmem:[%s980_s5] sm:$0xf] %vm600_vm1, %v753_v5  ;;  %v754_v11 = vpack.c.bf16 %v349_v7, %v349_v7 }
  0xf0   : > { %617 = vst.msk [vmem:[%s980_s5 + $0x40] sm:$0xf] %vm600_vm1, %v769_v6  ;;  %v770_v12 = vpack.c.bf16 %v413_v8, %v413_v8  ;;  %604 = vst.msk [vmem:[%s980_s5 + $0xc] sm:$0xf] %vm600_vm1, %v756_v9 }
  0xf1   : > { %620 = vst.msk [vmem:[%s980_s5 + $0x4c] sm:$0xf] %vm600_vm1, %v772_v10  ;;  %602 = vst.msk [vmem:[%s980_s5 + $0x4] sm:$0xf] %vm600_vm1, %v754_v11  ;;  %v819_v13 = vpop.f32.mrb[4].mxu0 }
  0xf2   : > { %618 = vst.msk [vmem:[%s980_s5 + $0x44] sm:$0xf] %vm600_vm1, %v770_v12  ;;  %v835_v14 = vpop.f32.mrb[4].mxu1  ;;  %v370_v15 = vadd.f32 %v819_v13, %v972_v52  ;;  %v361_v17 = vpop.f32.mrb[5].mxu0 }
  0xf3   : > { %v434_v16 = vadd.f32 %v835_v14, %v972_v52  ;;  %v425_v18 = vpop.f32.mrb[5].mxu1  ;;  %v362_v19 = vadd.f32 %v972_v52, %v361_v17  ;;  %v820_v21 = vpop.f32.mrb[6].mxu0 }
  0xf4   : > { %v426_v20 = vadd.f32 %v972_v52, %v425_v18  ;;  %v836_v22 = vpop.f32.mrb[6].mxu1  ;;  %v759_v23 = vpack.c.bf16 %v370_v15, %v370_v15  ;;  %v373_v25 = vadd.f32 %v820_v21, %v972_v52  ;;  %v364_v27 = vpop.f32.mrb[7].mxu0 }
  0xf5   : > { %v775_v24 = vpack.c.bf16 %v434_v16, %v434_v16  ;;  %v437_v26 = vadd.f32 %v836_v22, %v972_v52  ;;  %v428_v28 = vpop.f32.mrb[7].mxu1  ;;  %v757_v29 = vpack.c.bf16 %v362_v19, %v362_v19  ;;  %v365_v31 = vadd.f32 %v972_v52, %v364_v27 }
  0xf6   : > { %v773_v30 = vpack.c.bf16 %v426_v20, %v426_v20  ;;  %v429_v32 = vadd.f32 %v972_v52, %v428_v28  ;;  %607 = vst.msk [vmem:[%s980_s5 + $0x18] sm:$0xf] %vm600_vm1, %v759_v23  ;;  %v760_v33 = vpack.c.bf16 %v373_v25, %v373_v25 }
  0xf7   : > { %623 = vst.msk [vmem:[%s980_s5 + $0x58] sm:$0xf] %vm600_vm1, %v775_v24  ;;  %v776_v34 = vpack.c.bf16 %v437_v26, %v437_v26  ;;  %605 = vst.msk [vmem:[%s980_s5 + $0x10] sm:$0xf] %vm600_vm1, %v757_v29  ;;  %v758_v35 = vpack.c.bf16 %v365_v31, %v365_v31 }
  0xf8   : > { %621 = vst.msk [vmem:[%s980_s5 + $0x50] sm:$0xf] %vm600_vm1, %v773_v30  ;;  %v774_v36 = vpack.c.bf16 %v429_v32, %v429_v32  ;;  %608 = vst.msk [vmem:[%s980_s5 + $0x1c] sm:$0xf] %vm600_vm1, %v760_v33 }
  0xf9   : > { %624 = vst.msk [vmem:[%s980_s5 + $0x5c] sm:$0xf] %vm600_vm1, %v776_v34  ;;  %606 = vst.msk [vmem:[%s980_s5 + $0x14] sm:$0xf] %vm600_vm1, %v758_v35  ;;  %v823_v37 = vpop.f32.mrb[8].mxu0 }
  0xfa   : > { %622 = vst.msk [vmem:[%s980_s5 + $0x54] sm:$0xf] %vm600_vm1, %v774_v36  ;;  %v839_v38 = vpop.f32.mrb[8].mxu1  ;;  %v386_v39 = vadd.f32 %v823_v37, %v972_v52  ;;  %v377_v41 = vpop.f32.mrb[9].mxu0 }
  0xfb   : > { %v450_v40 = vadd.f32 %v839_v38, %v972_v52  ;;  %v441_v42 = vpop.f32.mrb[9].mxu1  ;;  %v378_v43 = vadd.f32 %v972_v52, %v377_v41  ;;  %v824_v45 = vpop.f32.mrb[10].mxu0 }
  0xfc   : > { %v442_v44 = vadd.f32 %v972_v52, %v441_v42  ;;  %v840_v46 = vpop.f32.mrb[10].mxu1  ;;  %v763_v47 = vpack.c.bf16 %v386_v39, %v386_v39  ;;  %v389_v49 = vadd.f32 %v824_v45, %v972_v52  ;;  %v380_v51 = vpop.f32.mrb[11].mxu0 }
  0xfd   : > { %v779_v48 = vpack.c.bf16 %v450_v40, %v450_v40  ;;  %v453_v50 = vadd.f32 %v840_v46, %v972_v52  ;;  %v444_v53 = vpop.f32.mrb[11].mxu1  ;;  %v761_v54 = vpack.c.bf16 %v378_v43, %v378_v43  ;;  %v381_v56 = vadd.f32 %v972_v52, %v380_v51 }
  0xfe   : > { %v777_v55 = vpack.c.bf16 %v442_v44, %v442_v44  ;;  %v445_v57 = vadd.f32 %v972_v52, %v444_v53  ;;  %611 = vst.msk [vmem:[%s980_s5 + $0x28] sm:$0xf] %vm600_vm1, %v763_v47  ;;  %v764_v58 = vpack.c.bf16 %v389_v49, %v389_v49 }
  0xff   : > { %627 = vst.msk [vmem:[%s980_s5 + $0x68] sm:$0xf] %vm600_vm1, %v779_v48  ;;  %v780_v59 = vpack.c.bf16 %v453_v50, %v453_v50  ;;  %609 = vst.msk [vmem:[%s980_s5 + $0x20] sm:$0xf] %vm600_vm1, %v761_v54  ;;  %v762_v60 = vpack.c.bf16 %v381_v56, %v381_v56 }
 0x100   : > { %625 = vst.msk [vmem:[%s980_s5 + $0x60] sm:$0xf] %vm600_vm1, %v777_v55  ;;  %v778_v61 = vpack.c.bf16 %v445_v57, %v445_v57  ;;  %612 = vst.msk [vmem:[%s980_s5 + $0x2c] sm:$0xf] %vm600_vm1, %v764_v58 }
 0x101   : > { %628 = vst.msk [vmem:[%s980_s5 + $0x6c] sm:$0xf] %vm600_vm1, %v780_v59  ;;  %610 = vst.msk [vmem:[%s980_s5 + $0x24] sm:$0xf] %vm600_vm1, %v762_v60  ;;  %v827_v62 = vpop.f32.mrb[12].mxu0 }
 0x102   : > { %626 = vst.msk [vmem:[%s980_s5 + $0x64] sm:$0xf] %vm600_vm1, %v778_v61  ;;  %v843_v63 = vpop.f32.mrb[12].mxu1  ;;  %v402_v0 = vadd.f32 %v827_v62, %v972_v52  ;;  %v393_v2 = vpop.f32.mrb[13].mxu0 }
 0x103   : > { %v466_v1 = vadd.f32 %v843_v63, %v972_v52  ;;  %v457_v3 = vpop.f32.mrb[13].mxu1  ;;  %v394_v4 = vadd.f32 %v972_v52, %v393_v2  ;;  %v828_v6 = vpop.f32.mrb[14].mxu0 }
 0x104   : > { %v458_v5 = vadd.f32 %v972_v52, %v457_v3  ;;  %v844_v7 = vpop.f32.mrb[14].mxu1  ;;  %v767_v8 = vpack.c.bf16 %v402_v0, %v402_v0  ;;  %v405_v10 = vadd.f32 %v828_v6, %v972_v52  ;;  %v396_v12 = vpop.f32.mrb[15].mxu0 }
 0x105   : > { %v783_v9 = vpack.c.bf16 %v466_v1, %v466_v1  ;;  %v469_v11 = vadd.f32 %v844_v7, %v972_v52  ;;  %v460_v13 = vpop.f32.mrb[15].mxu1  ;;  %v765_v14 = vpack.c.bf16 %v394_v4, %v394_v4  ;;  %v397_v16 = vadd.f32 %v972_v52, %v396_v12 }
 0x106   : > { %v781_v15 = vpack.c.bf16 %v458_v5, %v458_v5  ;;  %v461_v17 = vadd.f32 %v972_v52, %v460_v13  ;;  %615 = vst.msk [vmem:[%s980_s5 + $0x38] sm:$0xf] %vm600_vm1, %v767_v8  ;;  %v768_v18 = vpack.c.bf16 %v405_v10, %v405_v10 }
 0x107   : > { %631 = vst.msk [vmem:[%s980_s5 + $0x78] sm:$0xf] %vm600_vm1, %v783_v9  ;;  %v784_v19 = vpack.c.bf16 %v469_v11, %v469_v11  ;;  %613 = vst.msk [vmem:[%s980_s5 + $0x30] sm:$0xf] %vm600_vm1, %v765_v14  ;;  %v766_v20 = vpack.c.bf16 %v397_v16, %v397_v16 }
 0x108   : > { %629 = vst.msk [vmem:[%s980_s5 + $0x70] sm:$0xf] %vm600_vm1, %v781_v15  ;;  %v782_v21 = vpack.c.bf16 %v461_v17, %v461_v17  ;;  %616 = vst.msk [vmem:[%s980_s5 + $0x3c] sm:$0xf] %vm600_vm1, %v768_v18 }
 0x109   : > { %632 = vst.msk [vmem:[%s980_s5 + $0x7c] sm:$0xf] %vm600_vm1, %v784_v19  ;;  %614 = vst.msk [vmem:[%s980_s5 + $0x34] sm:$0xf] %vm600_vm1, %v766_v20 }
 0x10a   : > { %630 = vst.msk [vmem:[%s980_s5 + $0x74] sm:$0xf] %vm600_vm1, %v782_v21 }
 0x10b PF: > { %s13_s12 = sadd.s32 1, %s871_s12  }
 0x10c   : > { %p10_p4 = scmp.ge.s32.totalorder %s13_s12, 4  }
 0x10e   :  { %12 = sbr.rel (!%p10_p4) target bundleno = 1 (0x1), region = 62 }

// kernel: sanet_forward.6
= control target key start
LH: loop header
LB: loop body
LE: loop exit
PB: predicated region body
PF: predicated region fallthrough
CT: control target
= control target key end

     0   :  { %s1132_s12 = smov 0   ;;  %s1704_s0 = inlined_call_operand.vmem [shape: f32[2,256,64], index: 0, kind: input, shape index: {}]   ;;  %s1705_s1 = inlined_call_operand.vmem [shape: bf16[64,64], index: 1, kind: input, shape index: {}]   ;;  %s1706_s2 = inlined_call_operand.vmem [shape: f32[1,64], index: 2, kind: input, shape index: {}]   ;;  %s1707_s3 = inlined_call_operand.vmem [shape: bf16[2,256,64], index: 3, kind: output, shape index: {}]  }
   0x1 LB: > { %s924_s13 = sadd.s32 4294967295, %s1110_s12   ;;  %p928_p0 = scmp.ge.s32.totalorder %s1110_s12, 1  ;;  %s1110_s12 = sphi %s1132_s12, %s13_s12  }
   0x2   : > { %p137_p1 = scmp.lt.s32.totalorder %s1110_s12, 3 }
   0x4   : > { %p138_p2 = pnand %p928_p0, %p137_p1 }
   0x5   : > { %v1098_v0 = vld [vmem:[%s1705_s1] sm:$0xff] (!%p138_p2)   ;;  %p161_p3 = scmp.lt.s32.totalorder (!%p138_p2), %s924_s13, 1  ;;  %v1099_v1 = vld [vmem:[%s1705_s1 + $0x8] sm:$0xff] (!%p138_p2)   ;;  %v1100_v2 = vld [vmem:[%s1705_s1 + $0x10] sm:$0xff] (!%p138_p2)   ;;  %vm204_vm0 = vcmask (!%p138_p2), 523264   ;;  %vm836_vm1 = vcmask (!%p138_p2), 519168  }
   0x6   : > { %141 = sbr.rel (%p138_p2) target bundleno = 437 (0x1b5), region = 32  ;;  %1042 = vmatprep.subr.bf16.mxu0 (!%p138_p2), %v1098_v0  ;;  %1082 = vmatprep.subr.bf16.mxu1 (!%p138_p2), %v1098_v0  ;;  %v1101_v10 = vld [vmem:[%s1705_s1 + $0x18] sm:$0xff] (!%p138_p2)  }
   0x7   : > { %1043 = vmatpush3.bf16.msra.mxu0 (!%p138_p2), %v1098_v0  ;;  %1086 = vmatpush3.bf16.msra.mxu1 (!%p138_p2), %v1098_v0 }
   0x8   : > { %1044 = vmatprep.subr.bf16.mxu0 (!%p138_p2), %v1099_v1  ;;  %1083 = vmatprep.subr.bf16.mxu1 (!%p138_p2), %v1099_v1 }
   0xb   : > { %1045 = vmatpush3.bf16.msra.mxu0 (!%p138_p2), %v1099_v1  ;;  %1087 = vmatpush3.bf16.msra.mxu1 (!%p138_p2), %v1099_v1 }
   0xc   : > { %1046 = vmatprep.subr.bf16.mxu0 (!%p138_p2), %v1100_v2  ;;  %1084 = vmatprep.subr.bf16.mxu1 (!%p138_p2), %v1100_v2 }
   0xd   : > { %s1709_s13 = smov (!%p161_p3, %s924_s13), 1 }
   0xe   : > { %s988_s20 = sshll.u32 %s1709_s13, 8  ;;  %s989_s28 = sshll.u32 %s1709_s13, 7 }
   0xf   : > { %s1155_s23 = scalar_lea.vmem %s1704_s0, %s988_s20  ;;  %1047 = vmatpush3.bf16.msra.mxu0 %v1100_v2  ;;  %1088 = vmatpush3.bf16.msra.mxu1 %v1100_v2  ;;  %s1605_s4 = scalar_lea.vmem %s1707_s3, %s989_s28 }
  0x10   : > { %v1158_v3 = vld [vmem:[%s1155_s23] sm:$0xff]  ;;  %v1161_v4 = vld [vmem:[%s1155_s23 + $0x8] sm:$0xff]  ;;  %v1164_v5 = vld [vmem:[%s1155_s23 + $0x10] sm:$0xff]  ;;  %1048 = vmatprep.subr.bf16.mxu0 %v1101_v10  ;;  %1085 = vmatprep.subr.bf16.mxu1 %v1101_v10 }
  0x11   : > { %v1167_v6 = vld [vmem:[%s1155_s23 + $0x18] sm:$0xff]  ;;  %v205_v7 = vsel %vm204_vm0, %v1158_v3, 0.0  ;;  %v206_v8 = vsel %vm204_vm0, %v1161_v4, 0.0  ;;  %v208_v9 = vsel %vm204_vm0, %v1164_v5, 0.0  ;;  %v1179_v11 = vld [vmem:[%s1155_s23 + $0x20] sm:$0xff]  ;;  %v1184_v14 = vld [vmem:[%s1155_s23 + $0x28] sm:$0xff] }
  0x12   : > { %v207_v12 = vadd.f32 %v206_v8, %v205_v7  ;;  %v210_v13 = vsel %vm204_vm0, %v1167_v6, 0.0  ;;  %v212_v16 = vsel %vm204_vm0, %v1179_v11, 0.0  ;;  %v1189_v17 = vld [vmem:[%s1155_s23 + $0x30] sm:$0xff]  ;;  %v214_v19 = vsel %vm204_vm0, %v1184_v14, 0.0  ;;  %v1194_v20 = vld [vmem:[%s1155_s23 + $0x38] sm:$0xff]  ;;  %v1199_v23 = vld [vmem:[%s1155_s23 + $0x40] sm:$0xff] }
  0x13   : > { %1049 = vmatpush3.bf16.msra.mxu0 %v1101_v10  ;;  %1089 = vmatpush3.bf16.msra.mxu1 %v1101_v10  ;;  %v216_v22 = vsel %vm204_vm0, %v1189_v17, 0.0  ;;  %v218_v25 = vsel %vm204_vm0, %v1194_v20, 0.0  ;;  %v1204_v26 = vld [vmem:[%s1155_s23 + $0x48] sm:$0xff]  ;;  %v220_v28 = vsel %vm204_vm0, %v1199_v23, 0.0  ;;  %v1209_v29 = vld [vmem:[%s1155_s23 + $0x50] sm:$0xff]  ;;  %v1214_v32 = vld [vmem:[%s1155_s23 + $0x58] sm:$0xff] }
  0x14   : > { %v209_v15 = vadd.f32 %v208_v9, %v207_v12  ;;  %v222_v31 = vsel %vm204_vm0, %v1204_v26, 0.0  ;;  %v224_v34 = vsel %vm204_vm0, %v1209_v29, 0.0  ;;  %v1219_v35 = vld [vmem:[%s1155_s23 + $0x60] sm:$0xff]  ;;  %v226_v37 = vsel %vm204_vm0, %v1214_v32, 0.0  ;;  %v1224_v38 = vld [vmem:[%s1155_s23 + $0x68] sm:$0xff]  ;;  %v1229_v41 = vld [vmem:[%s1155_s23 + $0x70] sm:$0xff] }
  0x15   : > { %v228_v40 = vsel %vm204_vm0, %v1219_v35, 0.0  ;;  %v230_v43 = vsel %vm204_vm0, %v1224_v38, 0.0  ;;  %v1234_v44 = vld [vmem:[%s1155_s23 + $0x78] sm:$0xff]  ;;  %v232_v46 = vsel %vm204_vm0, %v1229_v41, 0.0  ;;  %v1239_v47 = vld [vmem:[%s1155_s23 + $0x80] sm:$0xff]  ;;  %v1244_v50 = vld [vmem:[%s1155_s23 + $0x88] sm:$0xff] }
  0x16   : > { %v211_v18 = vadd.f32 %v210_v13, %v209_v15  ;;  %v234_v49 = vsel %vm204_vm0, %v1234_v44, 0.0  ;;  %v236_v52 = vsel %vm204_vm0, %v1239_v47, 0.0  ;;  %v1249_v53 = vld [vmem:[%s1155_s23 + $0x90] sm:$0xff]  ;;  %v238_v55 = vsel %vm204_vm0, %v1244_v50, 0.0  ;;  %v1254_v56 = vld [vmem:[%s1155_s23 + $0x98] sm:$0xff]  ;;  %v1259_v59 = vld [vmem:[%s1155_s23 + $0xa0] sm:$0xff] }
  0x17   : > { %v240_v58 = vsel %vm204_vm0, %v1249_v53, 0.0  ;;  %v242_v61 = vsel %vm204_vm0, %v1254_v56, 0.0  ;;  %v1264_v62 = vld [vmem:[%s1155_s23 + $0xa8] sm:$0xff]  ;;  %v244_v0 = vsel %vm204_vm0, %v1259_v59, 0.0  ;;  %v1269_v1 = vld [vmem:[%s1155_s23 + $0xb0] sm:$0xff]  ;;  %v1274_v8 = vld [vmem:[%s1155_s23 + $0xb8] sm:$0xff] }
  0x18   : > { %v213_v21 = vadd.f32 %v212_v16, %v211_v18  ;;  %v246_v7 = vsel %vm204_vm0, %v1264_v62, 0.0  ;;  %v248_v10 = vsel %vm204_vm0, %v1269_v1, 0.0  ;;  %v1279_v12 = vld [vmem:[%s1155_s23 + $0xc0] sm:$0xff]  ;;  %v250_v15 = vsel %vm204_vm0, %v1274_v8, 0.0  ;;  %v1284_v16 = vld [vmem:[%s1155_s23 + $0xc8] sm:$0xff] }
  0x1a   : > { %v215_v24 = vadd.f32 %v214_v19, %v213_v21  ;;  %v252_v19 = vsel %vm204_vm0, %v1279_v12, 0.0  ;;  %v1289_v21 = vld [vmem:[%s1155_s23 + $0xd0] sm:$0xff] }
  0x1c   : > { %v217_v27 = vadd.f32 %v216_v22, %v215_v24  ;;  %v254_v24 = vsel %vm204_vm0, %v1284_v16, 0.0 }
  0x1e   : > { %v219_v30 = vadd.f32 %v218_v25, %v217_v27  ;;  %v1294_v25 = vld [vmem:[%s1155_s23 + $0xd8] sm:$0xff] }
  0x20   : > { %v221_v33 = vadd.f32 %v220_v28, %v219_v30  ;;  %v256_v28 = vsel %vm204_vm0, %v1289_v21, 0.0  ;;  %v1299_v30 = vld [vmem:[%s1155_s23 + $0xe0] sm:$0xff] }
  0x22   : > { %v223_v36 = vadd.f32 %v222_v31, %v221_v33  ;;  %v258_v33 = vsel %vm204_vm0, %v1294_v25, 0.0 }
  0x24   : > { %v225_v39 = vadd.f32 %v224_v34, %v223_v36  ;;  %v1304_v34 = vld [vmem:[%s1155_s23 + $0xe8] sm:$0xff] }
  0x26   : > { %v227_v42 = vadd.f32 %v226_v37, %v225_v39  ;;  %v260_v37 = vsel %vm204_vm0, %v1299_v30, 0.0  ;;  %v1309_v39 = vld [vmem:[%s1155_s23 + $0xf0] sm:$0xff] }
  0x28   : > { %v229_v45 = vadd.f32 %v228_v40, %v227_v42  ;;  %v262_v42 = vsel %vm204_vm0, %v1304_v34, 0.0 }
  0x2a   : > { %v231_v48 = vadd.f32 %v230_v43, %v229_v45  ;;  %v1314_v43 = vld [vmem:[%s1155_s23 + $0xf8] sm:$0xff] }
  0x2c   : > { %v233_v51 = vadd.f32 %v232_v46, %v231_v48  ;;  %v264_v46 = vsel %vm204_vm0, %v1309_v39, 0.0 }
  0x2e   : > { %v235_v54 = vadd.f32 %v234_v49, %v233_v51  ;;  %v266_v49 = vsel %vm204_vm0, %v1314_v43, 0.0 }
  0x30   : > { %v237_v57 = vadd.f32 %v236_v52, %v235_v54 }
  0x32   : > { %v239_v60 = vadd.f32 %v238_v55, %v237_v57 }
  0x34   : > { %v241_v63 = vadd.f32 %v240_v58, %v239_v60 }
  0x36   : > { %v243_v2 = vadd.f32 %v242_v61, %v241_v63 }
  0x38   : > { %v245_v9 = vadd.f32 %v244_v0, %v243_v2 }
  0x3a   : > { %v247_v13 = vadd.f32 %v246_v7, %v245_v9 }
  0x3c   : > { %v249_v18 = vadd.f32 %v248_v10, %v247_v13 }
  0x3e   : > { %v251_v22 = vadd.f32 %v250_v15, %v249_v18 }
  0x40   : > { %v253_v27 = vadd.f32 %v252_v19, %v251_v22 }
  0x42   : > { %v255_v31 = vadd.f32 %v254_v24, %v253_v27 }
  0x44   : > { %v257_v36 = vadd.f32 %v256_v28, %v255_v31 }
  0x46   : > { %v259_v40 = vadd.f32 %v258_v33, %v257_v36 }
  0x48   : > { %v261_v45 = vadd.f32 %v260_v37, %v259_v40 }
  0x4a   : > { %v263_v48 = vadd.f32 %v262_v42, %v261_v45 }
  0x4c   : > { %v265_v51 = vadd.f32 %v264_v46, %v263_v48 }
  0x4e   : > { %v267_v52 = vadd.f32 %v266_v49, %v265_v51 }
  0x50   : > { %v268_v54 = vrot.slane %v267_v52, 4 }
  0x52   : > { %v269_v55 = vadd.f32 %v268_v54, %v267_v52 }
  0x54   : > { %v270_v57 = vrot.slane %v269_v55, 2 }
  0x56   : > { %v271_v58 = vadd.f32 %v270_v57, %v269_v55 }
  0x58   : > { %v272_v60 = vrot.slane %v271_v58, 1 }
  0x5a   : > { %v273_v61 = vadd.f32 %v272_v60, %v271_v58 }
  0x5c   : > { %v1320_v63 = vmul.f32 0.00390625, %v273_v61 }
  0x5e   : > { %v1324_v0 = vsub.f32 %v1158_v3, %v1320_v63  ;;  %v1328_v2 = vsub.f32 %v1161_v4, %v1320_v63  ;;  %v1332_v7 = vsub.f32 %v1164_v5, %v1320_v63  ;;  %v1336_v9 = vsub.f32 %v1167_v6, %v1320_v63 }
  0x5f   : > { %v1340_v10 = vsub.f32 %v1179_v11, %v1320_v63  ;;  %v1350_v5 = vsub.f32 %v1184_v14, %v1320_v63  ;;  %v1356_v11 = vsub.f32 %v1189_v17, %v1320_v63  ;;  %v1365_v14 = vsub.f32 %v1194_v20, %v1320_v63 }
  0x60   : > { %v308_v3 = vmul.f32 %v1324_v0, %v1324_v0  ;;  %v309_v13 = vmul.f32 %v1328_v2, %v1328_v2  ;;  %v310_v4 = vmul.f32 %v1332_v7, %v1332_v7  ;;  %v311_v6 = vmul.f32 %v1336_v9, %v1336_v9 }
  0x61   : > { %v312_v15 = vmul.f32 %v1340_v10, %v1340_v10  ;;  %v313_v27 = vmul.f32 %v1350_v5, %v1350_v5  ;;  %v1372_v31 = vsub.f32 %v1199_v23, %v1320_v63  ;;  %v314_v33 = vmul.f32 %v1356_v11, %v1356_v11 }
  0x62   : > { %v340_v18 = vsel %vm204_vm0, %v308_v3, 0.0  ;;  %v341_v19 = vsel %vm204_vm0, %v309_v13, 0.0  ;;  %v343_v22 = vsel %vm204_vm0, %v310_v4, 0.0  ;;  %v345_v17 = vsel %vm204_vm0, %v311_v6, 0.0 }
  0x63   : > { %v342_v24 = vadd.f32 %v341_v19, %v340_v18  ;;  %v347_v36 = vsel %vm204_vm0, %v312_v15, 0.0  ;;  %v1379_v20 = vsub.f32 %v1204_v26, %v1320_v63  ;;  %v315_v40 = vmul.f32 %v1365_v14, %v1365_v14 }
  0x64   : > { %v349_v42 = vsel %vm204_vm0, %v313_v27, 0.0  ;;  %v1386_v23 = vsub.f32 %v1209_v29, %v1320_v63  ;;  %v316_v46 = vmul.f32 %v1372_v31, %v1372_v31  ;;  %v351_v48 = vsel %vm204_vm0, %v314_v33, 0.0 }
  0x65   : > { %v344_v28 = vadd.f32 %v343_v22, %v342_v24  ;;  %v1393_v26 = vsub.f32 %v1214_v32, %v1320_v63  ;;  %v317_v51 = vmul.f32 %v1379_v20, %v1379_v20  ;;  %v353_v52 = vsel %vm204_vm0, %v315_v40, 0.0 }
  0x66   : > { %v1400_v29 = vsub.f32 %v1219_v35, %v1320_v63  ;;  %v318_v55 = vmul.f32 %v1386_v23, %v1386_v23  ;;  %v355_v57 = vsel %vm204_vm0, %v316_v46, 0.0  ;;  %v1407_v32 = vsub.f32 %v1224_v38, %v1320_v63 }
  0x67   : > { %v346_v37 = vadd.f32 %v345_v17, %v344_v28  ;;  %v319_v60 = vmul.f32 %v1393_v26, %v1393_v26  ;;  %v357_v61 = vsel %vm204_vm0, %v317_v51, 0.0  ;;  %v1414_v35 = vsub.f32 %v1229_v41, %v1320_v63 }
  0x68   : > { %v320_v13 = vmul.f32 %v1400_v29, %v1400_v29  ;;  %v359_v4 = vsel %vm204_vm0, %v318_v55, 0.0  ;;  %v1421_v38 = vsub.f32 %v1234_v44, %v1320_v63  ;;  %v321_v15 = vmul.f32 %v1407_v32, %v1407_v32 }
  0x69   : > { %v348_v45 = vadd.f32 %v347_v36, %v346_v37  ;;  %v361_v18 = vsel %vm204_vm0, %v319_v60, 0.0  ;;  %v1428_v41 = vsub.f32 %v1239_v47, %v1320_v63  ;;  %v322_v22 = vmul.f32 %v1414_v35, %v1414_v35 }
  0x6a   : > { %v363_v24 = vsel %vm204_vm0, %v320_v13, 0.0  ;;  %v1435_v44 = vsub.f32 %v1244_v50, %v1320_v63  ;;  %v323_v17 = vmul.f32 %v1421_v38, %v1421_v38  ;;  %v365_v28 = vsel %vm204_vm0, %v321_v15, 0.0 }
  0x6b   : > { %v350_v49 = vadd.f32 %v349_v42, %v348_v45  ;;  %v1442_v47 = vsub.f32 %v1249_v53, %v1320_v63  ;;  %v324_v36 = vmul.f32 %v1428_v41, %v1428_v41  ;;  %v367_v37 = vsel %vm204_vm0, %v322_v22, 0.0 }
  0x6c   : > { %v1449_v50 = vsub.f32 %v1254_v56, %v1320_v63  ;;  %v325_v42 = vmul.f32 %v1435_v44, %v1435_v44  ;;  %v369_v45 = vsel %vm204_vm0, %v323_v17, 0.0  ;;  %v1456_v53 = vsub.f32 %v1259_v59, %v1320_v63 }
  0x6d   : > { %v352_v54 = vadd.f32 %v351_v48, %v350_v49  ;;  %v326_v48 = vmul.f32 %v1442_v47, %v1442_v47  ;;  %v371_v49 = vsel %vm204_vm0, %v324_v36, 0.0  ;;  %v1463_v56 = vsub.f32 %v1264_v62, %v1320_v63 }
  0x6e   : > { %v1470_v59 = vsub.f32 %v1269_v1, %v1320_v63  ;;  %v1477_v62 = vsub.f32 %v1274_v8, %v1320_v63  ;;  %v1484_v1 = vsub.f32 %v1279_v12, %v1320_v63  ;;  %v1491_v8 = vsub.f32 %v1284_v16, %v1320_v63 }
  0x6f   : > { %v354_v58 = vadd.f32 %v353_v52, %v352_v54  ;;  %v327_v52 = vmul.f32 %v1449_v50, %v1449_v50  ;;  %v373_v54 = vsel %vm204_vm0, %v325_v42, 0.0  ;;  %v1498_v12 = vsub.f32 %v1289_v21, %v1320_v63 }
  0x70   : > { %v1505_v16 = vsub.f32 %v1294_v25, %v1320_v63  ;;  %v1512_v21 = vsub.f32 %v1299_v30, %v1320_v63  ;;  %v1519_v25 = vsub.f32 %v1304_v34, %v1320_v63  ;;  %v1526_v30 = vsub.f32 %v1309_v39, %v1320_v63 }
  0x71   : > { %v356_v3 = vadd.f32 %v355_v57, %v354_v58  ;;  %v328_v57 = vmul.f32 %v1456_v53, %v1456_v53  ;;  %v375_v58 = vsel %vm204_vm0, %v326_v48, 0.0  ;;  %v1533_v34 = vsub.f32 %v1314_v43, %v1320_v63 }
  0x72   : > { %v338_v39 = vmul.f32 %v1526_v30, %v1526_v30 }
  0x73   : > { %v358_v6 = vadd.f32 %v357_v61, %v356_v3  ;;  %v329_v61 = vmul.f32 %v1463_v56, %v1463_v56  ;;  %v377_v3 = vsel %vm204_vm0, %v327_v52, 0.0 }
  0x74   : > { %v399_v43 = vsel %vm204_vm0, %v338_v39, 0.0 }
  0x75   : > { %v360_v19 = vadd.f32 %v359_v4, %v358_v6  ;;  %v330_v4 = vmul.f32 %v1470_v59, %v1470_v59  ;;  %v379_v6 = vsel %vm204_vm0, %v328_v57, 0.0 }
  0x77   : > { %v362_v27 = vadd.f32 %v361_v18, %v360_v19  ;;  %v331_v18 = vmul.f32 %v1477_v62, %v1477_v62  ;;  %v381_v19 = vsel %vm204_vm0, %v329_v61, 0.0  ;;  %v339_v61 = vmul.f32 %v1533_v34, %v1533_v34 }
  0x79   : > { %v364_v33 = vadd.f32 %v363_v24, %v362_v27  ;;  %v332_v24 = vmul.f32 %v1484_v1, %v1484_v1  ;;  %v383_v27 = vsel %vm204_vm0, %v330_v4, 0.0  ;;  %v401_v4 = vsel %vm204_vm0, %v339_v61, 0.0 }
  0x7b   : > { %v366_v40 = vadd.f32 %v365_v28, %v364_v33  ;;  %v333_v28 = vmul.f32 %v1491_v8, %v1491_v8  ;;  %v385_v33 = vsel %vm204_vm0, %v331_v18, 0.0 }
  0x7d   : > { %v368_v46 = vadd.f32 %v367_v37, %v366_v40  ;;  %v334_v37 = vmul.f32 %v1498_v12, %v1498_v12  ;;  %v387_v40 = vsel %vm204_vm0, %v332_v24, 0.0 }
  0x7f   : > { %v370_v51 = vadd.f32 %v369_v45, %v368_v46  ;;  %v335_v45 = vmul.f32 %v1505_v16, %v1505_v16  ;;  %v389_v46 = vsel %vm204_vm0, %v333_v28, 0.0 }
  0x81   : > { %v372_v55 = vadd.f32 %v371_v49, %v370_v51  ;;  %v336_v49 = vmul.f32 %v1512_v21, %v1512_v21  ;;  %v391_v51 = vsel %vm204_vm0, %v334_v37, 0.0 }
  0x83   : > { %v374_v60 = vadd.f32 %v373_v54, %v372_v55  ;;  %v337_v54 = vmul.f32 %v1519_v25, %v1519_v25  ;;  %v393_v55 = vsel %vm204_vm0, %v335_v45, 0.0 }
  0x85   : > { %v376_v13 = vadd.f32 %v375_v58, %v374_v60  ;;  %v395_v58 = vsel %vm204_vm0, %v336_v49, 0.0 }
  0x87   : > { %v378_v15 = vadd.f32 %v377_v3, %v376_v13  ;;  %v397_v3 = vsel %vm204_vm0, %v337_v54, 0.0 }
  0x89   : > { %v380_v22 = vadd.f32 %v379_v6, %v378_v15 }
  0x8b   : > { %v382_v17 = vadd.f32 %v381_v19, %v380_v22 }
  0x8d   : > { %v384_v36 = vadd.f32 %v383_v27, %v382_v17 }
  0x8f   : > { %v386_v42 = vadd.f32 %v385_v33, %v384_v36 }
  0x91   : > { %v388_v48 = vadd.f32 %v387_v40, %v386_v42 }
  0x93   : > { %v390_v52 = vadd.f32 %v389_v46, %v388_v48 }
  0x95   : > { %v392_v57 = vadd.f32 %v391_v51, %v390_v52 }
  0x97   : > { %v394_v60 = vadd.f32 %v393_v55, %v392_v57 }
  0x99   : > { %v396_v13 = vadd.f32 %v395_v58, %v394_v60 }
  0x9b   : > { %v398_v63 = vadd.f32 %v397_v3, %v396_v13 }
  0x9d   : > { %v400_v6 = vadd.f32 %v399_v43, %v398_v63 }
  0x9f   : > { %v402_v15 = vadd.f32 %v401_v4, %v400_v6 }
  0xa1   : > { %v403_v18 = vrot.slane %v402_v15, 4 }
  0xa3   : > { %v404_v19 = vadd.f32 %v403_v18, %v402_v15 }
  0xa5   : > { %v405_v22 = vrot.slane %v404_v19, 2 }
  0xa7   : > { %v406_v24 = vadd.f32 %v405_v22, %v404_v19 }
  0xa9   : > { %v407_v27 = vrot.slane %v406_v24, 1 }
  0xab   : > { %v408_v17 = vadd.f32 %v407_v27, %v406_v24 }
  0xad   : > { %v409_v28 = vmul.f32 0.003921569, %v408_v17 }
  0xaf   : > { %v410_v33 = vadd.f32 1e-05, %v409_v28 }
  0xb1   : > { %1102 = vrsqrt.f32 %v410_v33 }
  0xbb   : > { %v1103_v36 = vpop.eup %1102 }
  0xbc   : > { %v412_v37 = vmul.f32 %v1103_v36, %v1324_v0  ;;  %v413_v40 = vmul.f32 %v1103_v36, %v1328_v2  ;;  %v428_v42 = vmul.f32 %v1103_v36, %v1428_v41  ;;  %v429_v45 = vmul.f32 %v1103_v36, %v1435_v44 }
  0xbd   : > { %v414_v46 = vmul.f32 %v1103_v36, %v1332_v7  ;;  %v415_v48 = vmul.f32 %v1103_v36, %v1336_v9  ;;  %v430_v49 = vmul.f32 %v1103_v36, %v1442_v47  ;;  %v431_v51 = vmul.f32 %v1103_v36, %v1449_v50 }
  0xbe   : > { %v444_v52 = vpack.c.bf16 %v413_v40, %v412_v37  ;;  %v452_v54 = vpack.c.bf16 %v429_v45, %v428_v42  ;;  %v416_v55 = vmul.f32 %v1103_v36, %v1340_v10  ;;  %v417_v0 = vmul.f32 %v1103_v36, %v1350_v5 }
  0xbf   : > { %v445_v57 = vpack.c.bf16 %v415_v48, %v414_v46  ;;  %v453_v2 = vpack.c.bf16 %v431_v51, %v430_v49  ;;  %v432_v41 = vmul.f32 %v1103_v36, %v1456_v53  ;;  %v433_v44 = vmul.f32 %v1103_v36, %v1463_v56 }
  0xc0   : > { %1050 = vmatprep.mubr.msk.bf16.mxu0 %vm204_vm0, %v444_v52  ;;  %1066 = vmatprep.mubr.msk.bf16.mxu1 %vm204_vm0, %v452_v54  ;;  %v446_v7 = vpack.c.bf16 %v417_v0, %v416_v55  ;;  %v418_v9 = vmul.f32 %v1103_v36, %v1356_v11  ;;  %v419_v47 = vmul.f32 %v1103_v36, %v1365_v14 }
  0xc1   : > { %1051 = vmatmul.mubr.msk.bf16.vlgmr.msra.gmra.mrb[0].mxu0 %vm204_vm0, %v445_v57  ;;  %1067 = vmatmul.mubr.msk.bf16.vlgmr.msra.gmra.mrb[0].mxu1 %vm204_vm0, %v453_v2  ;;  %v454_v10 = vpack.c.bf16 %v433_v44, %v432_v41  ;;  %v434_v5 = vmul.f32 %v1103_v36, %v1470_v59  ;;  %v435_v50 = vmul.f32 %v1103_v36, %v1477_v62 }
  0xc2   : > { %1054 = vmatprep.mubr.msk.bf16.mxu0 %vm204_vm0, %v446_v7  ;;  %v420_v53 = vmul.f32 %v1103_v36, %v1372_v31  ;;  %v421_v56 = vmul.f32 %v1103_v36, %v1379_v20  ;;  %v436_v39 = vmul.f32 %v1103_v36, %v1484_v1  ;;  %v437_v11 = vmul.f32 %v1103_v36, %v1491_v8 }
  0xc3   : > { %1070 = vmatprep.mubr.msk.bf16.mxu1 %vm204_vm0, %v454_v10  ;;  %v447_v14 = vpack.c.bf16 %v419_v47, %v418_v9  ;;  %v455_v58 = vpack.c.bf16 %v435_v50, %v434_v5  ;;  %v422_v59 = vmul.f32 %v1103_v36, %v1386_v23  ;;  %v423_v62 = vmul.f32 %v1103_v36, %v1393_v26 }
  0xc4   : > { %v448_v60 = vpack.c.bf16 %v421_v56, %v420_v53  ;;  %v456_v61 = vpack.c.bf16 %v437_v11, %v436_v39  ;;  %v438_v31 = vmul.f32 %v1103_v36, %v1498_v12  ;;  %v439_v20 = vmul.f32 %v1103_v36, %v1505_v16 }
  0xc5   : > { %v424_v1 = vmul.f32 %v1103_v36, %v1400_v29  ;;  %v425_v8 = vmul.f32 %v1103_v36, %v1407_v32  ;;  %v440_v23 = vmul.f32 %v1103_v36, %v1512_v21  ;;  %v441_v26 = vmul.f32 %v1103_v36, %v1519_v25 }
  0xc6   : > { %v449_v3 = vpack.c.bf16 %v423_v62, %v422_v59  ;;  %v457_v13 = vpack.c.bf16 %v439_v20, %v438_v31  ;;  %v426_v12 = vmul.f32 %v1103_v36, %v1414_v35  ;;  %v427_v29 = vmul.f32 %v1103_v36, %v1421_v38  ;;  %v1597_v35 = vld [vmem:[%s1706_s2] ss:$0 sm:$0xff] }
  0xc7   : > { %v450_v43 = vpack.c.bf16 %v425_v8, %v424_v1  ;;  %v458_v63 = vpack.c.bf16 %v441_v26, %v440_v23  ;;  %v442_v16 = vmul.f32 %v1103_v36, %v1526_v30  ;;  %v443_v32 = vmul.f32 %v1103_v36, %v1533_v34 }
  0xc8   : > { %v451_v21 = vpack.c.bf16 %v427_v29, %v426_v12 }
  0xc9   : > { %1055 = vmatmul.mubr.msk.bf16.gmra.mrb[4].mxu0 %vm204_vm0, %v447_v14  ;;  %1071 = vmatmul.mubr.msk.bf16.gmra.mrb[4].mxu1 %vm204_vm0, %v455_v58  ;;  %v459_v25 = vpack.c.bf16 %v443_v32, %v442_v16 }
  0xca   : > { %1058 = vmatprep.mubr.msk.bf16.mxu0 %vm204_vm0, %v448_v60  ;;  %1074 = vmatprep.mubr.msk.bf16.mxu1 %vm204_vm0, %v456_v61 }
  0xd1   : > { %1059 = vmatmul.mubr.msk.bf16.gmra.mrb[8].mxu0 %vm204_vm0, %v449_v3  ;;  %1075 = vmatmul.mubr.msk.bf16.gmra.mrb[8].mxu1 %vm204_vm0, %v457_v13 }
  0xd2   : > { %1062 = vmatprep.mubr.msk.bf16.mxu0 %vm204_vm0, %v450_v43  ;;  %1078 = vmatprep.mubr.msk.bf16.mxu1 %vm204_vm0, %v458_v63 }
  0xd9   : > { %1063 = vmatmul.mubr.msk.bf16.gmra.mrb[12].mxu0 %vm204_vm0, %v451_v21  ;;  %1079 = vmatmul.mubr.msk.bf16.gmra.mrb[12].mxu1 %vm204_vm0, %v459_v25 }
 0x194   : > { %v1052_v38 = vpop.f32.mrb[0].mxu0  ;;  %v1068_v30 = vpop.f32.mrb[0].mxu1 }
 0x195   : > { %v590_v34 = vadd.f32 %v1052_v38, %v1597_v35  ;;  %v654_v4 = vadd.f32 %v1068_v30, %v1597_v35  ;;  %v581_v6 = vpop.f32.mrb[1].mxu0  ;;  %v645_v15 = vpop.f32.mrb[1].mxu1 }
 0x196   : > { %v582_v18 = vadd.f32 %v1597_v35, %v581_v6  ;;  %v646_v19 = vadd.f32 %v1597_v35, %v645_v15  ;;  %v1053_v22 = vpop.f32.mrb[2].mxu0  ;;  %v1069_v24 = vpop.f32.mrb[2].mxu1 }
 0x197   : > { %v992_v27 = vpack.c.bf16 %v590_v34, %v590_v34  ;;  %v1008_v17 = vpack.c.bf16 %v654_v4, %v654_v4  ;;  %v593_v28 = vadd.f32 %v1053_v22, %v1597_v35  ;;  %v657_v33 = vadd.f32 %v1069_v24, %v1597_v35  ;;  %v584_v36 = vpop.f32.mrb[3].mxu0  ;;  %v648_v37 = vpop.f32.mrb[3].mxu1 }
 0x198   : > { %v990_v40 = vpack.c.bf16 %v582_v18, %v582_v18  ;;  %v1006_v42 = vpack.c.bf16 %v646_v19, %v646_v19  ;;  %v585_v45 = vadd.f32 %v1597_v35, %v584_v36  ;;  %v649_v46 = vadd.f32 %v1597_v35, %v648_v37 }
 0x199   : > { %839 = vst.msk [vmem:[%s1605_s4 + $0x8] sm:$0xf] %vm836_vm1, %v992_v27  ;;  %855 = vst.msk [vmem:[%s1605_s4 + $0x48] sm:$0xf] %vm836_vm1, %v1008_v17  ;;  %v993_v48 = vpack.c.bf16 %v593_v28, %v593_v28  ;;  %v1009_v49 = vpack.c.bf16 %v657_v33, %v657_v33 }
 0x19a   : > { %837 = vst.msk [vmem:[%s1605_s4] sm:$0xf] %vm836_vm1, %v990_v40  ;;  %853 = vst.msk [vmem:[%s1605_s4 + $0x40] sm:$0xf] %vm836_vm1, %v1006_v42  ;;  %v991_v51 = vpack.c.bf16 %v585_v45, %v585_v45  ;;  %v1007_v52 = vpack.c.bf16 %v649_v46, %v649_v46 }
 0x19b   : > { %840 = vst.msk [vmem:[%s1605_s4 + $0xc] sm:$0xf] %vm836_vm1, %v993_v48  ;;  %856 = vst.msk [vmem:[%s1605_s4 + $0x4c] sm:$0xf] %vm836_vm1, %v1009_v49 }
 0x19c   : > { %838 = vst.msk [vmem:[%s1605_s4 + $0x4] sm:$0xf] %vm836_vm1, %v991_v51  ;;  %854 = vst.msk [vmem:[%s1605_s4 + $0x44] sm:$0xf] %vm836_vm1, %v1007_v52  ;;  %v1056_v54 = vpop.f32.mrb[4].mxu0  ;;  %v1072_v55 = vpop.f32.mrb[4].mxu1 }
 0x19d   : > { %v606_v0 = vadd.f32 %v1056_v54, %v1597_v35  ;;  %v670_v57 = vadd.f32 %v1072_v55, %v1597_v35  ;;  %v597_v2 = vpop.f32.mrb[5].mxu0  ;;  %v661_v41 = vpop.f32.mrb[5].mxu1 }
 0x19e   : > { %v598_v44 = vadd.f32 %v1597_v35, %v597_v2  ;;  %v662_v7 = vadd.f32 %v1597_v35, %v661_v41  ;;  %v1057_v9 = vpop.f32.mrb[6].mxu0  ;;  %v1073_v47 = vpop.f32.mrb[6].mxu1 }
 0x19f   : > { %v996_v10 = vpack.c.bf16 %v606_v0, %v606_v0  ;;  %v1012_v5 = vpack.c.bf16 %v670_v57, %v670_v57  ;;  %v609_v50 = vadd.f32 %v1057_v9, %v1597_v35  ;;  %v673_v53 = vadd.f32 %v1073_v47, %v1597_v35  ;;  %v600_v56 = vpop.f32.mrb[7].mxu0  ;;  %v664_v39 = vpop.f32.mrb[7].mxu1 }
 0x1a0   : > { %v994_v11 = vpack.c.bf16 %v598_v44, %v598_v44  ;;  %v1010_v14 = vpack.c.bf16 %v662_v7, %v662_v7  ;;  %v601_v58 = vadd.f32 %v1597_v35, %v600_v56  ;;  %v665_v60 = vadd.f32 %v1597_v35, %v664_v39 }
 0x1a1   : > { %843 = vst.msk [vmem:[%s1605_s4 + $0x18] sm:$0xf] %vm836_vm1, %v996_v10  ;;  %859 = vst.msk [vmem:[%s1605_s4 + $0x58] sm:$0xf] %vm836_vm1, %v1012_v5  ;;  %v997_v61 = vpack.c.bf16 %v609_v50, %v609_v50  ;;  %v1013_v59 = vpack.c.bf16 %v673_v53, %v673_v53 }
 0x1a2   : > { %841 = vst.msk [vmem:[%s1605_s4 + $0x10] sm:$0xf] %vm836_vm1, %v994_v11  ;;  %857 = vst.msk [vmem:[%s1605_s4 + $0x50] sm:$0xf] %vm836_vm1, %v1010_v14  ;;  %v995_v62 = vpack.c.bf16 %v601_v58, %v601_v58  ;;  %v1011_v31 = vpack.c.bf16 %v665_v60, %v665_v60 }
 0x1a3   : > { %844 = vst.msk [vmem:[%s1605_s4 + $0x1c] sm:$0xf] %vm836_vm1, %v997_v61  ;;  %860 = vst.msk [vmem:[%s1605_s4 + $0x5c] sm:$0xf] %vm836_vm1, %v1013_v59 }
 0x1a4   : > { %842 = vst.msk [vmem:[%s1605_s4 + $0x14] sm:$0xf] %vm836_vm1, %v995_v62  ;;  %858 = vst.msk [vmem:[%s1605_s4 + $0x54] sm:$0xf] %vm836_vm1, %v1011_v31  ;;  %v1060_v20 = vpop.f32.mrb[8].mxu0  ;;  %v1076_v1 = vpop.f32.mrb[8].mxu1 }
 0x1a5   : > { %v622_v8 = vadd.f32 %v1060_v20, %v1597_v35  ;;  %v686_v23 = vadd.f32 %v1076_v1, %v1597_v35  ;;  %v613_v26 = vpop.f32.mrb[9].mxu0  ;;  %v677_v3 = vpop.f32.mrb[9].mxu1 }
 0x1a6   : > { %v614_v13 = vadd.f32 %v1597_v35, %v613_v26  ;;  %v678_v43 = vadd.f32 %v1597_v35, %v677_v3  ;;  %v1061_v63 = vpop.f32.mrb[10].mxu0  ;;  %v1077_v12 = vpop.f32.mrb[10].mxu1 }
 0x1a7   : > { %v1000_v29 = vpack.c.bf16 %v622_v8, %v622_v8  ;;  %v1016_v16 = vpack.c.bf16 %v686_v23, %v686_v23  ;;  %v625_v32 = vadd.f32 %v1061_v63, %v1597_v35  ;;  %v689_v21 = vadd.f32 %v1077_v12, %v1597_v35  ;;  %v616_v25 = vpop.f32.mrb[11].mxu0  ;;  %v680_v38 = vpop.f32.mrb[11].mxu1 }
 0x1a8   : > { %v998_v30 = vpack.c.bf16 %v614_v13, %v614_v13  ;;  %v1014_v34 = vpack.c.bf16 %v678_v43, %v678_v43  ;;  %v617_v4 = vadd.f32 %v1597_v35, %v616_v25  ;;  %v681_v6 = vadd.f32 %v1597_v35, %v680_v38 }
 0x1a9   : > { %847 = vst.msk [vmem:[%s1605_s4 + $0x28] sm:$0xf] %vm836_vm1, %v1000_v29  ;;  %863 = vst.msk [vmem:[%s1605_s4 + $0x68] sm:$0xf] %vm836_vm1, %v1016_v16  ;;  %v1001_v15 = vpack.c.bf16 %v625_v32, %v625_v32  ;;  %v1017_v18 = vpack.c.bf16 %v689_v21, %v689_v21 }
 0x1aa   : > { %845 = vst.msk [vmem:[%s1605_s4 + $0x20] sm:$0xf] %vm836_vm1, %v998_v30  ;;  %861 = vst.msk [vmem:[%s1605_s4 + $0x60] sm:$0xf] %vm836_vm1, %v1014_v34  ;;  %v999_v19 = vpack.c.bf16 %v617_v4, %v617_v4  ;;  %v1015_v22 = vpack.c.bf16 %v681_v6, %v681_v6 }
 0x1ab   : > { %848 = vst.msk [vmem:[%s1605_s4 + $0x2c] sm:$0xf] %vm836_vm1, %v1001_v15  ;;  %864 = vst.msk [vmem:[%s1605_s4 + $0x6c] sm:$0xf] %vm836_vm1, %v1017_v18 }
 0x1ac   : > { %846 = vst.msk [vmem:[%s1605_s4 + $0x24] sm:$0xf] %vm836_vm1, %v999_v19  ;;  %862 = vst.msk [vmem:[%s1605_s4 + $0x64] sm:$0xf] %vm836_vm1, %v1015_v22  ;;  %v1064_v24 = vpop.f32.mrb[12].mxu0  ;;  %v1080_v27 = vpop.f32.mrb[12].mxu1 }
 0x1ad   : > { %v638_v17 = vadd.f32 %v1064_v24, %v1597_v35  ;;  %v702_v28 = vadd.f32 %v1080_v27, %v1597_v35  ;;  %v629_v33 = vpop.f32.mrb[13].mxu0  ;;  %v693_v36 = vpop.f32.mrb[13].mxu1 }
 0x1ae   : > { %v630_v37 = vadd.f32 %v1597_v35, %v629_v33  ;;  %v694_v40 = vadd.f32 %v1597_v35, %v693_v36  ;;  %v1065_v42 = vpop.f32.mrb[14].mxu0  ;;  %v1081_v45 = vpop.f32.mrb[14].mxu1 }
 0x1af   : > { %v1004_v46 = vpack.c.bf16 %v638_v17, %v638_v17  ;;  %v1020_v48 = vpack.c.bf16 %v702_v28, %v702_v28  ;;  %v641_v49 = vadd.f32 %v1065_v42, %v1597_v35  ;;  %v705_v51 = vadd.f32 %v1081_v45, %v1597_v35  ;;  %v632_v52 = vpop.f32.mrb[15].mxu0  ;;  %v696_v54 = vpop.f32.mrb[15].mxu1 }
 0x1b0   : > { %v1002_v55 = vpack.c.bf16 %v630_v37, %v630_v37  ;;  %v1018_v0 = vpack.c.bf16 %v694_v40, %v694_v40  ;;  %v633_v57 = vadd.f32 %v1597_v35, %v632_v52  ;;  %v697_v2 = vadd.f32 %v1597_v35, %v696_v54 }
 0x1b1   : > { %851 = vst.msk [vmem:[%s1605_s4 + $0x38] sm:$0xf] %vm836_vm1, %v1004_v46  ;;  %867 = vst.msk [vmem:[%s1605_s4 + $0x78] sm:$0xf] %vm836_vm1, %v1020_v48  ;;  %v1005_v41 = vpack.c.bf16 %v641_v49, %v641_v49  ;;  %v1021_v44 = vpack.c.bf16 %v705_v51, %v705_v51 }
 0x1b2   : > { %849 = vst.msk [vmem:[%s1605_s4 + $0x30] sm:$0xf] %vm836_vm1, %v1002_v55  ;;  %865 = vst.msk [vmem:[%s1605_s4 + $0x70] sm:$0xf] %vm836_vm1, %v1018_v0  ;;  %v1003_v7 = vpack.c.bf16 %v633_v57, %v633_v57  ;;  %v1019_v9 = vpack.c.bf16 %v697_v2, %v697_v2 }
 0x1b3   : > { %852 = vst.msk [vmem:[%s1605_s4 + $0x3c] sm:$0xf] %vm836_vm1, %v1005_v41  ;;  %868 = vst.msk [vmem:[%s1605_s4 + $0x7c] sm:$0xf] %vm836_vm1, %v1021_v44 }
 0x1b4   : > { %850 = vst.msk [vmem:[%s1605_s4 + $0x34] sm:$0xf] %vm836_vm1, %v1003_v7  ;;  %866 = vst.msk [vmem:[%s1605_s4 + $0x74] sm:$0xf] %vm836_vm1, %v1019_v9 }
 0x1b5 PF: > { %s13_s12 = sadd.s32 1, %s1110_s12  }
 0x1b6   : > { %p10_p4 = scmp.ge.s32.totalorder %s13_s12, 4  }
 0x1b8   :  { %12 = sbr.rel (!%p10_p4) target bundleno = 1 (0x1), region = 62 }

// kernel: sanet_forward.5
= control target key start
LH: loop header
LB: loop body
LE: loop exit
PB: predicated region body
PF: predicated region fallthrough
CT: control target
= control target key end

     0   :  { %8 = vsyncpa [#allocation3], 0  ;;  %s2108_s0 = inlined_call_operand.hbm [shape: f32[2,256,64], index: 0, kind: input, shape index: {}]   ;;  %s2109_s1 = inlined_call_operand.hbm [shape: bf16[64,64], index: 1, kind: input, shape index: {}]   ;;  %s2110_s2 = inlined_call_operand.hbm [shape: f32[1,64], index: 2, kind: input, shape index: {}]   ;;  %s2111_s3 = inlined_call_operand.vmem [shape: bf16[2,256,64], index: 3, kind: output, shape index: {}]  }
   0x1   :  { %10 = vsyncpa [#allocation3 + $0x1], 0 }
   0x2   :  { %11 = vsyncpa [#allocation5], 0  ;;  %s1396_s12 = smov 0   ;;  %s1398_s13 = smov 0  }
   0x3   :  { %s1400_s14 = smov 0   ;;  %s1402_s15 = smov 0  }
   0x4 LB: > { %s1415_s16 = sadd.s32 4294967295, %s1367_s15   ;;  %p37_p0 = scmp.ne.s32.totalorder %s1359_s13, %s1355_s12  ;;  %s1367_s15 = sphi %s1402_s15, %s2126_s15   ;;  %s1363_s14 = sphi %s1400_s14, %s2125_s14   ;;  %s1359_s13 = sphi %s1398_s13, %s2124_s13   ;;  %s1355_s12 = sphi %s1396_s12, %s2123_s12  }
   0x5   : > { %p2112_p1 = scmp.eq.s32.totalorder %s1415_s16, 0  ;;  %p1003_p2 = scmp.ge.s32.totalorder %s1367_s15, 1 }
   0x6   : > { %p116_p3 = scmp.lt.s32.totalorder %s1367_s15, 3  ;;  %s1369_s19 = smov [#allocation4]  }
   0x7   : > { %p1423_p4 = por %p2112_p1, %p37_p0  ;;  %s128_s20 = sshll.u32 %s1369_s19, 4  ;;  %s129_s20 = int_to_ptr.vmem [resolvable:$true] %s128_s20 }
   0x8   : > { %p1427_p5 = pnand %p1003_p2, %p116_p3  ;;  %s1370_s22 = smov [#allocation6]  }
   0x9   : > { %s2115_s17 = scalar_select %p1423_p4, 1, 0 }
   0xa   : > { %s2116_s18 = scalar_select %p1427_p5, 1, 0 }
   0xb   : > { %p1183_p6 = pneg %p1427_p5  ;;  %s142_s23 = sshll.u32 %s1370_s22, 4  ;;  %s1439_s23 = int_to_ptr.vmem [resolvable:$true] %s142_s23 }
   0xc   : > { %s1243_s26 = scalar_lea.hbm %s2109_s1, 512 }
   0xd   : > { %p1435_p7 = pnand %p1183_p6, %p2112_p1  ;;  %p1244_p8 = scmp.ne.s32.totalorder %s2109_s1, %s1243_s26 }
   0xe   : > { %p1250_p12 = scmp.lt.u32.totalorder %s1243_s26, %s2109_s1 }
   0xf   : > { %p1245_p9 = pneg %p1435_p7 }
  0x11   : > { %p1246_p10 = pnand %p1245_p9, %p1244_p8 }
  0x13   : > { %p1247_p11 = pneg %p1246_p10 }
  0x15   : > { %p1252_p13 = pnand %p1250_p12, %p1247_p11 }
  0x17   : > { %1255 = shalt.err (!%p1252_p13)
}
  0x18   : > { %s1256_s4 = scalar_lea.vmem %s129_s20, 512  ;;  %p1264_p6 = scmp.lt.s32.totalorder %s129_s20, %s129_s20 }
  0x19   : > { %p1257_p0 = scmp.ne.s32.totalorder %s129_s20, %s1256_s4  ;;  %p1265_p1 = scmp.lt.s32.totalorder %s1256_s4, %s1256_s4 }
  0x1b   : > { %p1259_p2 = pnand %p1257_p0, %p1245_p9  ;;  %p1266_p4 = por %p1265_p1, %p1264_p6 }
  0x1d   : > { %p1260_p3 = pneg %p1259_p2 }
  0x1f   : > { %p1267_p5 = pnand %p1266_p4, %p1260_p3 }
  0x21   : > { %1270 = shalt.err (!%p1267_p5)
}
  0x22   : > { %s1371_s5 = smov 64   ;;  %s1372_s6 = smov 4  }
  0x23   : > { %1186 = dma.hbm_to_vmem [thread:$0]  (!%p1435_p7), %s2109_s1, 512, %s129_s20, [#allocation5], %s1371_s5, %s1371_s5, %s1372_s6  }
  0x24   : > { %s1271_s11 = scalar_lea.hbm %s2110_s2, 16 }
  0x25   : > { %p1272_p8 = scmp.ne.s32.totalorder %s2110_s2, %s1271_s11  ;;  %p1278_p5 = scmp.lt.u32.totalorder %s1271_s11, %s2110_s2 }
  0x27   : > { %p1274_p1 = pnand %p1272_p8, %p1245_p9 }
  0x29   : > { %p1275_p4 = pneg %p1274_p1 }
  0x2b   : > { %p1280_p10 = pnand %p1278_p5, %p1275_p4 }
  0x2d   : > { %1283 = shalt.err (!%p1280_p10)
}
  0x2e   : > { %s1284_s20 = scalar_lea.vmem %s1439_s23, 16  ;;  %s1291_s25 = scalar_lea.vmem %s1439_s23, 32 }
  0x2f   : > { %p1285_p11 = scmp.ne.s32.totalorder %s1439_s23, %s1284_s20  ;;  %p1292_p0 = scmp.lt.s32.totalorder %s1439_s23, %s1439_s23 }
  0x30   : > { %p1293_p2 = scmp.lt.s32.totalorder %s1291_s25, %s1284_s20 }
  0x31   : > { %p1287_p12 = pnand %p1285_p11, %p1245_p9 }
  0x32   : > { %p1294_p3 = por %p1293_p2, %p1292_p0 }
  0x33   : > { %p1288_p13 = pneg %p1287_p12 }
  0x35   : > { %p1295_p6 = pnand %p1294_p3, %p1288_p13 }
  0x37   : > { %1298 = shalt.err (!%p1295_p6)
}
  0x38   : > { %1189 = dma.hbm_to_vmem [thread:$0]  (!%p1435_p7), %s2110_s2, 16, %s1439_s23, [#allocation5]  }
  0x39   : > { %s1490_s28 = sadd.s32 1, %s1367_s15   ;;  %s24_s29 = sadd.s32 1, %s1363_s14 }
  0x3a   : > { %s21_s21 = ssub.s32 %s1367_s15, %s1490_s28  ;;  %p31_p9 = scmp.ne.s32.totalorder %s1363_s14, %s1359_s13 }
  0x3b   : > { %p22_p8 = scmp.eq.s32.totalorder %s21_s21, 0  ;;  %p32_p1 = scmp.eq.s32.totalorder %s1367_s15, 0 }
  0x3c   : > { %p1196_p4 = scmp.lt.s32.totalorder %s1367_s15, 2  ;;  %s153_s30 = sand.u32 1, %s1363_s14  }
  0x3d   : > { %s1501_s4 = scalar_select %p22_p8, %s1363_s14, %s24_s29  }
  0x3e   : > { %p33_p5 = por %p32_p1, %p31_p9  ;;  %s1007_s5 = sshll.u32 %s153_s30, 8 }
  0x3f   : > { %s1071_s6 = sshll.u32 %s1367_s15, 12  ;;  %s157_s23 = scalar_lea.vmem [#allocation2], %s1007_s5 }
  0x40   : > { %s1507_s9 = scalar_lea.hbm %s2108_s0, %s1071_s6  ;;  %s164_s10 = sshll.u32 %s157_s23, 4  ;;  %s1513_s10 = int_to_ptr.vmem [resolvable:$true] %s164_s10 }
  0x41   : > { %p1509_p7 = pnand %p1196_p4, %p33_p5  ;;  %s1515_s15 = scalar_lea.sflag [#allocation3], %s153_s30 }
  0x42   : > { %s1299_s12 = scalar_lea.hbm %s1507_s9, 4096  ;;  %s1304_s24 = scalar_lea.hbm %s2108_s0, 8192 }
  0x43   : > { %p1300_p10 = scmp.ne.s32.totalorder %s1507_s9, %s1299_s12  ;;  %p1301_p11 = pneg %p1509_p7 }
  0x44   : > { %p1305_p0 = scmp.lt.u32.totalorder %s1507_s9, %s2108_s0  ;;  %p1306_p2 = scmp.lt.u32.totalorder %s1304_s24, %s1299_s12 }
  0x45   : > { %p1302_p12 = pnand %p1301_p11, %p1300_p10  ;;  %p1308_p6 = scmp.lt.u32.totalorder %s1299_s12, %s1507_s9 }
  0x46   : > { %p1307_p3 = por %p1306_p2, %p1305_p0 }
  0x47   : > { %p1303_p13 = pneg %p1302_p12 }
  0x48   : > { %p1309_p9 = por %p1308_p6, %p1307_p3 }
  0x4a   : > { %p1310_p8 = pnand %p1309_p9, %p1303_p13 }
  0x4c   : > { %1313 = shalt.err (!%p1310_p8)
}
  0x4d   : > { %s1314_s26 = scalar_lea.vmem %s1513_s10, 4096  ;;  %s1373_s27 = smov [#allocation2]  }
  0x4e   : > { %p1315_p1 = scmp.ne.s32.totalorder %s1513_s10, %s1314_s26  ;;  %s1319_s29 = sshll.u32 %s1373_s27, 4  ;;  %s1320_s29 = int_to_ptr.vmem [resolvable:$false] %s1319_s29 }
  0x4f   : > { %s1321_s21 = scalar_lea.vmem %s1320_s29, 8192  ;;  %p1322_p10 = scmp.lt.s32.totalorder %s1513_s10, %s1320_s29 }
  0x50   : > { %p1317_p4 = pnand %p1315_p1, %p1301_p11  ;;  %p1323_p12 = scmp.lt.s32.totalorder %s1321_s21, %s1314_s26 }
  0x52   : > { %p1318_p5 = pneg %p1317_p4  ;;  %p1324_p0 = por %p1323_p12, %p1322_p10 }
  0x54   : > { %p1325_p2 = pnand %p1324_p0, %p1318_p5 }
  0x56   : > { %1328 = shalt.err (!%p1325_p2)
}
  0x57   : > { %s1374_s30 = smov 128   ;;  %s1375_s5 = smov 8  }
  0x58   : > { %1193 = dma.hbm_to_vmem [thread:$0]  (!%p1509_p7), %s1507_s9, 4096, %s1513_s10, %s1515_s15, %s1374_s30, %s1374_s30, %s1375_s5  }
  0x59   : > { %p2119_p11 = scmp.ne.s32.totalorder %s2116_s18, 0 }
  0x5a   : > { %s178_s6 = sand.u32 (!%p2119_p11), 1, %s1359_s13   ;;  %p2120_p13 = scmp.ne.s32.totalorder (!%p2119_p11), %s2115_s17, 0 }
  0x5b   : > { %176 = sbr.rel (%p2119_p11) target bundleno = 524 (0x20c), region = 32  ;;  %s1011_s7 = sshll.u32 (!%p2119_p11), %s178_s6, 8 }
  0x5c   : > { %s179_s8 = scalar_lea.sflag (!%p2119_p11), [#allocation3], %s178_s6  ;;  %s1546_s23 = scalar_lea.vmem (!%p2119_p11), [#allocation2], %s1011_s7 }
  0x62   : > { %1346 = dma.done.wait (%p2120_p13), %s179_s8, 4096  }
  0x63   : > { %1348 = vsyncadd (%p2120_p13), %s179_s8, 4294963200  ;;  %p2121_p3 = scmp.eq.s32.totalorder %s1415_s16, 0 }
  0x65   : > { %1350 = dma.done.wait (%p2121_p3), [#allocation5], 528   ;;  %p2122_p7 = pmov %p2121_p3 }
  0x66   : > { %v1237_v0 = vld [vmem:[#allocation4] sm:$0xff]   ;;  %v1238_v1 = vld [vmem:[#allocation4 + $0x8] sm:$0xff]   ;;  %vm251_vm0 = vcmask 523264   ;;  %v1239_v2 = vld [vmem:[#allocation4 + $0x10] sm:$0xff]   ;;  %p213_p6 = scmp.lt.s32.totalorder %s1415_s16, 1  ;;  %vm883_vm1 = vcmask 519168  }
  0x67   : > { %1352 = vsyncadd (%p2122_p7), [#allocation5], 4294966768  ;;  %1125 = vmatprep.subr.bf16.mxu0 %v1237_v0  ;;  %1165 = vmatprep.subr.bf16.mxu1 %v1237_v0  ;;  %v1557_v3 = vld [vmem:[%s1546_s23] sm:$0xff]  ;;  %v1560_v4 = vld [vmem:[%s1546_s23 + $0x8] sm:$0xff] }
  0x68   : > { %1126 = vmatpush3.bf16.msra.mxu0 %v1237_v0  ;;  %1169 = vmatpush3.bf16.msra.mxu1 %v1237_v0  ;;  %v1563_v5 = vld [vmem:[%s1546_s23 + $0x10] sm:$0xff]  ;;  %v1566_v6 = vld [vmem:[%s1546_s23 + $0x18] sm:$0xff]  ;;  %v252_v7 = vsel %vm251_vm0, %v1557_v3, 0.0  ;;  %v253_v8 = vsel %vm251_vm0, %v1560_v4, 0.0  ;;  %v1575_v10 = vld [vmem:[%s1546_s23 + $0x20] sm:$0xff]  ;;  %s2128_s16 = smov (!%p213_p6, %s1415_s16), 1 }
  0x69   : > { %1127 = vmatprep.subr.bf16.mxu0 %v1238_v1  ;;  %1166 = vmatprep.subr.bf16.mxu1 %v1238_v1  ;;  %v255_v9 = vsel %vm251_vm0, %v1563_v5, 0.0  ;;  %v254_v11 = vadd.f32 %v253_v8, %v252_v7  ;;  %v257_v12 = vsel %vm251_vm0, %v1566_v6, 0.0  ;;  %v1240_v13 = vld [vmem:[#allocation4 + $0x18] sm:$0xff]   ;;  %v1580_v14 = vld [vmem:[%s1546_s23 + $0x28] sm:$0xff]  ;;  %v259_v16 = vsel %vm251_vm0, %v1575_v10, 0.0  ;;  %v1585_v17 = vld [vmem:[%s1546_s23 + $0x30] sm:$0xff] }
  0x6a   : > { %v261_v19 = vsel %vm251_vm0, %v1580_v14, 0.0  ;;  %v1590_v20 = vld [vmem:[%s1546_s23 + $0x38] sm:$0xff]  ;;  %v263_v22 = vsel %vm251_vm0, %v1585_v17, 0.0  ;;  %v1595_v23 = vld [vmem:[%s1546_s23 + $0x40] sm:$0xff]  ;;  %v1600_v26 = vld [vmem:[%s1546_s23 + $0x48] sm:$0xff]  ;;  %s1072_s17 = sshll.u32 %s2128_s16, 7 }
  0x6b   : > { %v256_v15 = vadd.f32 %v255_v9, %v254_v11  ;;  %v265_v25 = vsel %vm251_vm0, %v1590_v20, 0.0  ;;  %v267_v28 = vsel %vm251_vm0, %v1595_v23, 0.0  ;;  %v1605_v29 = vld [vmem:[%s1546_s23 + $0x50] sm:$0xff]  ;;  %v269_v31 = vsel %vm251_vm0, %v1600_v26, 0.0  ;;  %v1610_v32 = vld [vmem:[%s1546_s23 + $0x58] sm:$0xff]  ;;  %v1615_v35 = vld [vmem:[%s1546_s23 + $0x60] sm:$0xff]  ;;  %s1999_s10 = scalar_lea.vmem %s2111_s3, %s1072_s17 }
  0x6c   : > { %1128 = vmatpush3.bf16.msra.mxu0 %v1238_v1  ;;  %1170 = vmatpush3.bf16.msra.mxu1 %v1238_v1  ;;  %v271_v34 = vsel %vm251_vm0, %v1605_v29, 0.0  ;;  %v273_v37 = vsel %vm251_vm0, %v1610_v32, 0.0  ;;  %v1620_v38 = vld [vmem:[%s1546_s23 + $0x68] sm:$0xff]  ;;  %v275_v40 = vsel %vm251_vm0, %v1615_v35, 0.0  ;;  %v1625_v41 = vld [vmem:[%s1546_s23 + $0x70] sm:$0xff]  ;;  %v1630_v44 = vld [vmem:[%s1546_s23 + $0x78] sm:$0xff] }
  0x6d   : > { %1129 = vmatprep.subr.bf16.mxu0 %v1239_v2  ;;  %1167 = vmatprep.subr.bf16.mxu1 %v1239_v2  ;;  %v258_v18 = vadd.f32 %v257_v12, %v256_v15  ;;  %v277_v43 = vsel %vm251_vm0, %v1620_v38, 0.0  ;;  %v279_v46 = vsel %vm251_vm0, %v1625_v41, 0.0  ;;  %v1635_v47 = vld [vmem:[%s1546_s23 + $0x80] sm:$0xff]  ;;  %v281_v49 = vsel %vm251_vm0, %v1630_v44, 0.0  ;;  %v1640_v50 = vld [vmem:[%s1546_s23 + $0x88] sm:$0xff]  ;;  %v1645_v53 = vld [vmem:[%s1546_s23 + $0x90] sm:$0xff] }
  0x6e   : > { %v283_v52 = vsel %vm251_vm0, %v1635_v47, 0.0  ;;  %v285_v55 = vsel %vm251_vm0, %v1640_v50, 0.0  ;;  %v1650_v56 = vld [vmem:[%s1546_s23 + $0x98] sm:$0xff]  ;;  %v287_v58 = vsel %vm251_vm0, %v1645_v53, 0.0  ;;  %v1655_v59 = vld [vmem:[%s1546_s23 + $0xa0] sm:$0xff]  ;;  %v1660_v62 = vld [vmem:[%s1546_s23 + $0xa8] sm:$0xff] }
  0x6f   : > { %v260_v21 = vadd.f32 %v259_v16, %v258_v18  ;;  %v289_v61 = vsel %vm251_vm0, %v1650_v56, 0.0  ;;  %v291_v0 = vsel %vm251_vm0, %v1655_v59, 0.0  ;;  %v1665_v1 = vld [vmem:[%s1546_s23 + $0xb0] sm:$0xff]  ;;  %v293_v7 = vsel %vm251_vm0, %v1660_v62, 0.0  ;;  %v1670_v8 = vld [vmem:[%s1546_s23 + $0xb8] sm:$0xff]  ;;  %v1675_v12 = vld [vmem:[%s1546_s23 + $0xc0] sm:$0xff] }
  0x70   : > { %1130 = vmatpush3.bf16.msra.mxu0 %v1239_v2  ;;  %1171 = vmatpush3.bf16.msra.mxu1 %v1239_v2  ;;  %v295_v11 = vsel %vm251_vm0, %v1665_v1, 0.0  ;;  %v297_v15 = vsel %vm251_vm0, %v1670_v8, 0.0  ;;  %v1680_v16 = vld [vmem:[%s1546_s23 + $0xc8] sm:$0xff] }
  0x71   : > { %1131 = vmatprep.subr.bf16.mxu0 %v1240_v13  ;;  %1168 = vmatprep.subr.bf16.mxu1 %v1240_v13  ;;  %v262_v24 = vadd.f32 %v261_v19, %v260_v21  ;;  %v299_v19 = vsel %vm251_vm0, %v1675_v12, 0.0  ;;  %v1685_v21 = vld [vmem:[%s1546_s23 + $0xd0] sm:$0xff] }
  0x73   : > { %v264_v27 = vadd.f32 %v263_v22, %v262_v24  ;;  %v301_v24 = vsel %vm251_vm0, %v1680_v16, 0.0 }
  0x74   : > { %1132 = vmatpush3.bf16.msra.mxu0 %v1240_v13  ;;  %1172 = vmatpush3.bf16.msra.mxu1 %v1240_v13 }
  0x75   : > { %v266_v30 = vadd.f32 %v265_v25, %v264_v27  ;;  %v1690_v25 = vld [vmem:[%s1546_s23 + $0xd8] sm:$0xff] }
  0x77   : > { %v268_v33 = vadd.f32 %v267_v28, %v266_v30  ;;  %v303_v28 = vsel %vm251_vm0, %v1685_v21, 0.0  ;;  %v1695_v30 = vld [vmem:[%s1546_s23 + $0xe0] sm:$0xff] }
  0x79   : > { %v270_v36 = vadd.f32 %v269_v31, %v268_v33  ;;  %v305_v33 = vsel %vm251_vm0, %v1690_v25, 0.0 }
  0x7b   : > { %v272_v39 = vadd.f32 %v271_v34, %v270_v36  ;;  %v1700_v34 = vld [vmem:[%s1546_s23 + $0xe8] sm:$0xff] }
  0x7d   : > { %v274_v42 = vadd.f32 %v273_v37, %v272_v39  ;;  %v307_v37 = vsel %vm251_vm0, %v1695_v30, 0.0  ;;  %v1705_v39 = vld [vmem:[%s1546_s23 + $0xf0] sm:$0xff] }
  0x7f   : > { %v276_v45 = vadd.f32 %v275_v40, %v274_v42  ;;  %v309_v42 = vsel %vm251_vm0, %v1700_v34, 0.0 }
  0x81   : > { %v278_v48 = vadd.f32 %v277_v43, %v276_v45  ;;  %v1710_v43 = vld [vmem:[%s1546_s23 + $0xf8] sm:$0xff] }
  0x83   : > { %v280_v51 = vadd.f32 %v279_v46, %v278_v48  ;;  %v311_v46 = vsel %vm251_vm0, %v1705_v39, 0.0 }
  0x85   : > { %v282_v54 = vadd.f32 %v281_v49, %v280_v51  ;;  %v313_v49 = vsel %vm251_vm0, %v1710_v43, 0.0 }
  0x87   : > { %v284_v57 = vadd.f32 %v283_v52, %v282_v54 }
  0x89   : > { %v286_v60 = vadd.f32 %v285_v55, %v284_v57 }
  0x8b   : > { %v288_v63 = vadd.f32 %v287_v58, %v286_v60 }
  0x8d   : > { %v290_v2 = vadd.f32 %v289_v61, %v288_v63 }
  0x8f   : > { %v292_v9 = vadd.f32 %v291_v0, %v290_v2 }
  0x91   : > { %v294_v13 = vadd.f32 %v293_v7, %v292_v9 }
  0x93   : > { %v296_v18 = vadd.f32 %v295_v11, %v294_v13 }
  0x95   : > { %v298_v22 = vadd.f32 %v297_v15, %v296_v18 }
  0x97   : > { %v300_v27 = vadd.f32 %v299_v19, %v298_v22 }
  0x99   : > { %v302_v31 = vadd.f32 %v301_v24, %v300_v27 }
  0x9b   : > { %v304_v36 = vadd.f32 %v303_v28, %v302_v31 }
  0x9d   : > { %v306_v40 = vadd.f32 %v305_v33, %v304_v36 }
  0x9f   : > { %v308_v45 = vadd.f32 %v307_v37, %v306_v40 }
  0xa1   : > { %v310_v48 = vadd.f32 %v309_v42, %v308_v45 }
  0xa3   : > { %v312_v51 = vadd.f32 %v311_v46, %v310_v48 }
  0xa5   : > { %v314_v52 = vadd.f32 %v313_v49, %v312_v51 }
  0xa7   : > { %v315_v54 = vrot.slane %v314_v52, 4 }
  0xa9   : > { %v316_v55 = vadd.f32 %v315_v54, %v314_v52 }
  0xab   : > { %v317_v57 = vrot.slane %v316_v55, 2 }
  0xad   : > { %v318_v58 = vadd.f32 %v317_v57, %v316_v55 }
  0xaf   : > { %v319_v60 = vrot.slane %v318_v58, 1 }
  0xb1   : > { %v320_v61 = vadd.f32 %v319_v60, %v318_v58 }
  0xb3   : > { %v1716_v63 = vmul.f32 0.00390625, %v320_v61 }
  0xb5   : > { %v1720_v0 = vsub.f32 %v1557_v3, %v1716_v63  ;;  %v1724_v2 = vsub.f32 %v1560_v4, %v1716_v63  ;;  %v1728_v7 = vsub.f32 %v1563_v5, %v1716_v63  ;;  %v1732_v9 = vsub.f32 %v1566_v6, %v1716_v63 }
  0xb6   : > { %v1736_v11 = vsub.f32 %v1575_v10, %v1716_v63  ;;  %v1746_v5 = vsub.f32 %v1580_v14, %v1716_v63  ;;  %v1752_v10 = vsub.f32 %v1585_v17, %v1716_v63  ;;  %v1761_v14 = vsub.f32 %v1590_v20, %v1716_v63 }
  0xb7   : > { %v355_v3 = vmul.f32 %v1720_v0, %v1720_v0  ;;  %v356_v13 = vmul.f32 %v1724_v2, %v1724_v2  ;;  %v357_v4 = vmul.f32 %v1728_v7, %v1728_v7  ;;  %v358_v6 = vmul.f32 %v1732_v9, %v1732_v9 }
  0xb8   : > { %v359_v15 = vmul.f32 %v1736_v11, %v1736_v11  ;;  %v360_v27 = vmul.f32 %v1746_v5, %v1746_v5  ;;  %v1768_v31 = vsub.f32 %v1595_v23, %v1716_v63  ;;  %v361_v33 = vmul.f32 %v1752_v10, %v1752_v10 }
  0xb9   : > { %v387_v18 = vsel %vm251_vm0, %v355_v3, 0.0  ;;  %v388_v19 = vsel %vm251_vm0, %v356_v13, 0.0  ;;  %v390_v22 = vsel %vm251_vm0, %v357_v4, 0.0  ;;  %v392_v17 = vsel %vm251_vm0, %v358_v6, 0.0 }
  0xba   : > { %v389_v24 = vadd.f32 %v388_v19, %v387_v18  ;;  %v394_v36 = vsel %vm251_vm0, %v359_v15, 0.0  ;;  %v1775_v20 = vsub.f32 %v1600_v26, %v1716_v63  ;;  %v362_v40 = vmul.f32 %v1761_v14, %v1761_v14 }
  0xbb   : > { %v396_v42 = vsel %vm251_vm0, %v360_v27, 0.0  ;;  %v1782_v23 = vsub.f32 %v1605_v29, %v1716_v63  ;;  %v363_v46 = vmul.f32 %v1768_v31, %v1768_v31  ;;  %v398_v48 = vsel %vm251_vm0, %v361_v33, 0.0 }
  0xbc   : > { %v391_v28 = vadd.f32 %v390_v22, %v389_v24  ;;  %v1789_v26 = vsub.f32 %v1610_v32, %v1716_v63  ;;  %v364_v51 = vmul.f32 %v1775_v20, %v1775_v20  ;;  %v400_v52 = vsel %vm251_vm0, %v362_v40, 0.0 }
  0xbd   : > { %v1796_v29 = vsub.f32 %v1615_v35, %v1716_v63  ;;  %v365_v55 = vmul.f32 %v1782_v23, %v1782_v23  ;;  %v402_v57 = vsel %vm251_vm0, %v363_v46, 0.0  ;;  %v1803_v32 = vsub.f32 %v1620_v38, %v1716_v63 }
  0xbe   : > { %v393_v37 = vadd.f32 %v392_v17, %v391_v28  ;;  %v366_v60 = vmul.f32 %v1789_v26, %v1789_v26  ;;  %v404_v61 = vsel %vm251_vm0, %v364_v51, 0.0  ;;  %v1810_v35 = vsub.f32 %v1625_v41, %v1716_v63 }
  0xbf   : > { %v367_v13 = vmul.f32 %v1796_v29, %v1796_v29  ;;  %v406_v4 = vsel %vm251_vm0, %v365_v55, 0.0  ;;  %v1817_v38 = vsub.f32 %v1630_v44, %v1716_v63  ;;  %v368_v15 = vmul.f32 %v1803_v32, %v1803_v32 }
  0xc0   : > { %v395_v45 = vadd.f32 %v394_v36, %v393_v37  ;;  %v408_v18 = vsel %vm251_vm0, %v366_v60, 0.0  ;;  %v1824_v41 = vsub.f32 %v1635_v47, %v1716_v63  ;;  %v369_v22 = vmul.f32 %v1810_v35, %v1810_v35 }
  0xc1   : > { %v410_v24 = vsel %vm251_vm0, %v367_v13, 0.0  ;;  %v1831_v44 = vsub.f32 %v1640_v50, %v1716_v63  ;;  %v370_v17 = vmul.f32 %v1817_v38, %v1817_v38  ;;  %v412_v28 = vsel %vm251_vm0, %v368_v15, 0.0 }
  0xc2   : > { %v397_v49 = vadd.f32 %v396_v42, %v395_v45  ;;  %v1838_v47 = vsub.f32 %v1645_v53, %v1716_v63  ;;  %v371_v36 = vmul.f32 %v1824_v41, %v1824_v41  ;;  %v414_v37 = vsel %vm251_vm0, %v369_v22, 0.0 }
  0xc3   : > { %v1845_v50 = vsub.f32 %v1650_v56, %v1716_v63  ;;  %v372_v42 = vmul.f32 %v1831_v44, %v1831_v44  ;;  %v416_v45 = vsel %vm251_vm0, %v370_v17, 0.0  ;;  %v1852_v53 = vsub.f32 %v1655_v59, %v1716_v63 }
  0xc4   : > { %v399_v54 = vadd.f32 %v398_v48, %v397_v49  ;;  %v373_v48 = vmul.f32 %v1838_v47, %v1838_v47  ;;  %v418_v49 = vsel %vm251_vm0, %v371_v36, 0.0  ;;  %v1859_v56 = vsub.f32 %v1660_v62, %v1716_v63 }
  0xc5   : > { %v1866_v59 = vsub.f32 %v1665_v1, %v1716_v63  ;;  %v1873_v62 = vsub.f32 %v1670_v8, %v1716_v63  ;;  %v1880_v1 = vsub.f32 %v1675_v12, %v1716_v63  ;;  %v1887_v8 = vsub.f32 %v1680_v16, %v1716_v63 }
  0xc6   : > { %v401_v58 = vadd.f32 %v400_v52, %v399_v54  ;;  %v374_v52 = vmul.f32 %v1845_v50, %v1845_v50  ;;  %v420_v54 = vsel %vm251_vm0, %v372_v42, 0.0  ;;  %v1894_v12 = vsub.f32 %v1685_v21, %v1716_v63 }
  0xc7   : > { %v1901_v16 = vsub.f32 %v1690_v25, %v1716_v63  ;;  %v1908_v21 = vsub.f32 %v1695_v30, %v1716_v63  ;;  %v1915_v25 = vsub.f32 %v1700_v34, %v1716_v63  ;;  %v1922_v30 = vsub.f32 %v1705_v39, %v1716_v63 }
  0xc8   : > { %v403_v3 = vadd.f32 %v402_v57, %v401_v58  ;;  %v375_v57 = vmul.f32 %v1852_v53, %v1852_v53  ;;  %v422_v58 = vsel %vm251_vm0, %v373_v48, 0.0  ;;  %v1929_v34 = vsub.f32 %v1710_v43, %v1716_v63 }
  0xc9   : > { %v385_v39 = vmul.f32 %v1922_v30, %v1922_v30 }
  0xca   : > { %v405_v6 = vadd.f32 %v404_v61, %v403_v3  ;;  %v376_v61 = vmul.f32 %v1859_v56, %v1859_v56  ;;  %v424_v3 = vsel %vm251_vm0, %v374_v52, 0.0 }
  0xcb   : > { %v446_v43 = vsel %vm251_vm0, %v385_v39, 0.0 }
  0xcc   : > { %v407_v19 = vadd.f32 %v406_v4, %v405_v6  ;;  %v377_v4 = vmul.f32 %v1866_v59, %v1866_v59  ;;  %v426_v6 = vsel %vm251_vm0, %v375_v57, 0.0 }
  0xce   : > { %v409_v27 = vadd.f32 %v408_v18, %v407_v19  ;;  %v378_v18 = vmul.f32 %v1873_v62, %v1873_v62  ;;  %v428_v19 = vsel %vm251_vm0, %v376_v61, 0.0  ;;  %v386_v61 = vmul.f32 %v1929_v34, %v1929_v34 }
  0xd0   : > { %v411_v33 = vadd.f32 %v410_v24, %v409_v27  ;;  %v379_v24 = vmul.f32 %v1880_v1, %v1880_v1  ;;  %v430_v27 = vsel %vm251_vm0, %v377_v4, 0.0  ;;  %v448_v4 = vsel %vm251_vm0, %v386_v61, 0.0 }
  0xd2   : > { %v413_v40 = vadd.f32 %v412_v28, %v411_v33  ;;  %v380_v28 = vmul.f32 %v1887_v8, %v1887_v8  ;;  %v432_v33 = vsel %vm251_vm0, %v378_v18, 0.0 }
  0xd4   : > { %v415_v46 = vadd.f32 %v414_v37, %v413_v40  ;;  %v381_v37 = vmul.f32 %v1894_v12, %v1894_v12  ;;  %v434_v40 = vsel %vm251_vm0, %v379_v24, 0.0 }
  0xd6   : > { %v417_v51 = vadd.f32 %v416_v45, %v415_v46  ;;  %v382_v45 = vmul.f32 %v1901_v16, %v1901_v16  ;;  %v436_v46 = vsel %vm251_vm0, %v380_v28, 0.0 }
  0xd8   : > { %v419_v55 = vadd.f32 %v418_v49, %v417_v51  ;;  %v383_v49 = vmul.f32 %v1908_v21, %v1908_v21  ;;  %v438_v51 = vsel %vm251_vm0, %v381_v37, 0.0 }
  0xda   : > { %v421_v60 = vadd.f32 %v420_v54, %v419_v55  ;;  %v384_v54 = vmul.f32 %v1915_v25, %v1915_v25  ;;  %v440_v55 = vsel %vm251_vm0, %v382_v45, 0.0 }
  0xdc   : > { %v423_v13 = vadd.f32 %v422_v58, %v421_v60  ;;  %v442_v58 = vsel %vm251_vm0, %v383_v49, 0.0 }
  0xde   : > { %v425_v15 = vadd.f32 %v424_v3, %v423_v13  ;;  %v444_v3 = vsel %vm251_vm0, %v384_v54, 0.0 }
  0xe0   : > { %v427_v22 = vadd.f32 %v426_v6, %v425_v15 }
  0xe2   : > { %v429_v17 = vadd.f32 %v428_v19, %v427_v22 }
  0xe4   : > { %v431_v36 = vadd.f32 %v430_v27, %v429_v17 }
  0xe6   : > { %v433_v42 = vadd.f32 %v432_v33, %v431_v36 }
  0xe8   : > { %v435_v48 = vadd.f32 %v434_v40, %v433_v42 }
  0xea   : > { %v437_v52 = vadd.f32 %v436_v46, %v435_v48 }
  0xec   : > { %v439_v57 = vadd.f32 %v438_v51, %v437_v52 }
  0xee   : > { %v441_v60 = vadd.f32 %v440_v55, %v439_v57 }
  0xf0   : > { %v443_v13 = vadd.f32 %v442_v58, %v441_v60 }
  0xf2   : > { %v445_v63 = vadd.f32 %v444_v3, %v443_v13 }
  0xf4   : > { %v447_v6 = vadd.f32 %v446_v43, %v445_v63 }
  0xf6   : > { %v449_v15 = vadd.f32 %v448_v4, %v447_v6 }
  0xf8   : > { %v450_v18 = vrot.slane %v449_v15, 4 }
  0xfa   : > { %v451_v19 = vadd.f32 %v450_v18, %v449_v15 }
  0xfc   : > { %v452_v22 = vrot.slane %v451_v19, 2 }
  0xfe   : > { %v453_v24 = vadd.f32 %v452_v22, %v451_v19 }
 0x100   : > { %v454_v27 = vrot.slane %v453_v24, 1 }
 0x102   : > { %v455_v17 = vadd.f32 %v454_v27, %v453_v24 }
 0x104   : > { %v456_v28 = vmul.f32 0.003921569, %v455_v17 }
 0x106   : > { %v457_v33 = vadd.f32 1e-05, %v456_v28 }
 0x108   : > { %1241 = vrsqrt.f32 %v457_v33 }
 0x112   : > { %v1242_v36 = vpop.eup %1241 }
 0x113   : > { %v459_v37 = vmul.f32 %v1242_v36, %v1720_v0  ;;  %v460_v40 = vmul.f32 %v1242_v36, %v1724_v2  ;;  %v475_v42 = vmul.f32 %v1242_v36, %v1824_v41  ;;  %v476_v45 = vmul.f32 %v1242_v36, %v1831_v44 }
 0x114   : > { %v461_v46 = vmul.f32 %v1242_v36, %v1728_v7  ;;  %v462_v48 = vmul.f32 %v1242_v36, %v1732_v9  ;;  %v477_v49 = vmul.f32 %v1242_v36, %v1838_v47  ;;  %v478_v51 = vmul.f32 %v1242_v36, %v1845_v50 }
 0x115   : > { %v491_v52 = vpack.c.bf16 %v460_v40, %v459_v37  ;;  %v499_v54 = vpack.c.bf16 %v476_v45, %v475_v42  ;;  %v463_v55 = vmul.f32 %v1242_v36, %v1736_v11  ;;  %v464_v0 = vmul.f32 %v1242_v36, %v1746_v5 }
 0x116   : > { %v492_v57 = vpack.c.bf16 %v462_v48, %v461_v46  ;;  %v500_v2 = vpack.c.bf16 %v478_v51, %v477_v49  ;;  %v479_v41 = vmul.f32 %v1242_v36, %v1852_v53  ;;  %v480_v44 = vmul.f32 %v1242_v36, %v1859_v56 }
 0x117   : > { %1133 = vmatprep.mubr.msk.bf16.mxu0 %vm251_vm0, %v491_v52  ;;  %1149 = vmatprep.mubr.msk.bf16.mxu1 %vm251_vm0, %v499_v54  ;;  %v493_v7 = vpack.c.bf16 %v464_v0, %v463_v55  ;;  %v465_v9 = vmul.f32 %v1242_v36, %v1752_v10  ;;  %v466_v47 = vmul.f32 %v1242_v36, %v1761_v14 }
 0x118   : > { %1134 = vmatmul.mubr.msk.bf16.vlgmr.msra.gmra.mrb[0].mxu0 %vm251_vm0, %v492_v57  ;;  %1150 = vmatmul.mubr.msk.bf16.vlgmr.msra.gmra.mrb[0].mxu1 %vm251_vm0, %v500_v2  ;;  %v501_v11 = vpack.c.bf16 %v480_v44, %v479_v41  ;;  %v481_v5 = vmul.f32 %v1242_v36, %v1866_v59  ;;  %v482_v50 = vmul.f32 %v1242_v36, %v1873_v62 }
 0x119   : > { %1137 = vmatprep.mubr.msk.bf16.mxu0 %vm251_vm0, %v493_v7  ;;  %v467_v53 = vmul.f32 %v1242_v36, %v1768_v31  ;;  %v468_v56 = vmul.f32 %v1242_v36, %v1775_v20  ;;  %v483_v39 = vmul.f32 %v1242_v36, %v1880_v1  ;;  %v484_v10 = vmul.f32 %v1242_v36, %v1887_v8 }
 0x11a   : > { %1153 = vmatprep.mubr.msk.bf16.mxu1 %vm251_vm0, %v501_v11  ;;  %v494_v14 = vpack.c.bf16 %v466_v47, %v465_v9  ;;  %v502_v58 = vpack.c.bf16 %v482_v50, %v481_v5  ;;  %v469_v59 = vmul.f32 %v1242_v36, %v1782_v23  ;;  %v470_v62 = vmul.f32 %v1242_v36, %v1789_v26 }
 0x11b   : > { %v495_v60 = vpack.c.bf16 %v468_v56, %v467_v53  ;;  %v503_v61 = vpack.c.bf16 %v484_v10, %v483_v39  ;;  %v485_v31 = vmul.f32 %v1242_v36, %v1894_v12  ;;  %v486_v20 = vmul.f32 %v1242_v36, %v1901_v16 }
 0x11c   : > { %v471_v1 = vmul.f32 %v1242_v36, %v1796_v29  ;;  %v472_v8 = vmul.f32 %v1242_v36, %v1803_v32  ;;  %v487_v23 = vmul.f32 %v1242_v36, %v1908_v21  ;;  %v488_v26 = vmul.f32 %v1242_v36, %v1915_v25 }
 0x11d   : > { %v496_v3 = vpack.c.bf16 %v470_v62, %v469_v59  ;;  %v504_v13 = vpack.c.bf16 %v486_v20, %v485_v31  ;;  %v473_v16 = vmul.f32 %v1242_v36, %v1810_v35  ;;  %v474_v29 = vmul.f32 %v1242_v36, %v1817_v38  ;;  %v1992_v35 = vld [vmem:[#allocation6] ss:$0 sm:$0xff] }
 0x11e   : > { %v497_v43 = vpack.c.bf16 %v472_v8, %v471_v1  ;;  %v505_v12 = vpack.c.bf16 %v488_v26, %v487_v23  ;;  %v489_v32 = vmul.f32 %v1242_v36, %v1922_v30  ;;  %v490_v21 = vmul.f32 %v1242_v36, %v1929_v34 }
 0x11f   : > { %v498_v25 = vpack.c.bf16 %v474_v29, %v473_v16 }
 0x120   : > { %1138 = vmatmul.mubr.msk.bf16.gmra.mrb[4].mxu0 %vm251_vm0, %v494_v14  ;;  %1154 = vmatmul.mubr.msk.bf16.gmra.mrb[4].mxu1 %vm251_vm0, %v502_v58  ;;  %v506_v63 = vpack.c.bf16 %v490_v21, %v489_v32 }
 0x121   : > { %1141 = vmatprep.mubr.msk.bf16.mxu0 %vm251_vm0, %v495_v60  ;;  %1157 = vmatprep.mubr.msk.bf16.mxu1 %vm251_vm0, %v503_v61 }
 0x128   : > { %1142 = vmatmul.mubr.msk.bf16.gmra.mrb[8].mxu0 %vm251_vm0, %v496_v3  ;;  %1158 = vmatmul.mubr.msk.bf16.gmra.mrb[8].mxu1 %vm251_vm0, %v504_v13 }
 0x129   : > { %1145 = vmatprep.mubr.msk.bf16.mxu0 %vm251_vm0, %v497_v43  ;;  %1161 = vmatprep.mubr.msk.bf16.mxu1 %vm251_vm0, %v505_v12 }
 0x130   : > { %1146 = vmatmul.mubr.msk.bf16.gmra.mrb[12].mxu0 %vm251_vm0, %v498_v25  ;;  %1162 = vmatmul.mubr.msk.bf16.gmra.mrb[12].mxu1 %vm251_vm0, %v506_v63 }
 0x1eb   : > { %v1135_v38 = vpop.f32.mrb[0].mxu0  ;;  %v1151_v4 = vpop.f32.mrb[0].mxu1 }
 0x1ec   : > { %v637_v30 = vadd.f32 %v1135_v38, %v1992_v35  ;;  %v701_v34 = vadd.f32 %v1151_v4, %v1992_v35  ;;  %v628_v6 = vpop.f32.mrb[1].mxu0  ;;  %v692_v15 = vpop.f32.mrb[1].mxu1 }
 0x1ed   : > { %v629_v18 = vadd.f32 %v1992_v35, %v628_v6  ;;  %v693_v19 = vadd.f32 %v1992_v35, %v692_v15  ;;  %v1136_v22 = vpop.f32.mrb[2].mxu0  ;;  %v1152_v24 = vpop.f32.mrb[2].mxu1 }
 0x1ee   : > { %v1075_v27 = vpack.c.bf16 %v637_v30, %v637_v30  ;;  %v1091_v17 = vpack.c.bf16 %v701_v34, %v701_v34  ;;  %v640_v28 = vadd.f32 %v1136_v22, %v1992_v35  ;;  %v704_v33 = vadd.f32 %v1152_v24, %v1992_v35  ;;  %v631_v36 = vpop.f32.mrb[3].mxu0  ;;  %v695_v37 = vpop.f32.mrb[3].mxu1 }
 0x1ef   : > { %v1073_v40 = vpack.c.bf16 %v629_v18, %v629_v18  ;;  %v1089_v42 = vpack.c.bf16 %v693_v19, %v693_v19  ;;  %v632_v45 = vadd.f32 %v1992_v35, %v631_v36  ;;  %v696_v46 = vadd.f32 %v1992_v35, %v695_v37 }
 0x1f0   : > { %886 = vst.msk [vmem:[%s1999_s10 + $0x8] sm:$0xf] %vm883_vm1, %v1075_v27  ;;  %902 = vst.msk [vmem:[%s1999_s10 + $0x48] sm:$0xf] %vm883_vm1, %v1091_v17  ;;  %v1076_v48 = vpack.c.bf16 %v640_v28, %v640_v28  ;;  %v1092_v49 = vpack.c.bf16 %v704_v33, %v704_v33 }
 0x1f1   : > { %884 = vst.msk [vmem:[%s1999_s10] sm:$0xf] %vm883_vm1, %v1073_v40  ;;  %900 = vst.msk [vmem:[%s1999_s10 + $0x40] sm:$0xf] %vm883_vm1, %v1089_v42  ;;  %v1074_v51 = vpack.c.bf16 %v632_v45, %v632_v45  ;;  %v1090_v52 = vpack.c.bf16 %v696_v46, %v696_v46 }
 0x1f2   : > { %887 = vst.msk [vmem:[%s1999_s10 + $0xc] sm:$0xf] %vm883_vm1, %v1076_v48  ;;  %903 = vst.msk [vmem:[%s1999_s10 + $0x4c] sm:$0xf] %vm883_vm1, %v1092_v49 }
 0x1f3   : > { %885 = vst.msk [vmem:[%s1999_s10 + $0x4] sm:$0xf] %vm883_vm1, %v1074_v51  ;;  %901 = vst.msk [vmem:[%s1999_s10 + $0x44] sm:$0xf] %vm883_vm1, %v1090_v52  ;;  %v1139_v54 = vpop.f32.mrb[4].mxu0  ;;  %v1155_v55 = vpop.f32.mrb[4].mxu1 }
 0x1f4   : > { %v653_v0 = vadd.f32 %v1139_v54, %v1992_v35  ;;  %v717_v57 = vadd.f32 %v1155_v55, %v1992_v35  ;;  %v644_v2 = vpop.f32.mrb[5].mxu0  ;;  %v708_v41 = vpop.f32.mrb[5].mxu1 }
 0x1f5   : > { %v645_v44 = vadd.f32 %v1992_v35, %v644_v2  ;;  %v709_v7 = vadd.f32 %v1992_v35, %v708_v41  ;;  %v1140_v9 = vpop.f32.mrb[6].mxu0  ;;  %v1156_v47 = vpop.f32.mrb[6].mxu1 }
 0x1f6   : > { %v1079_v11 = vpack.c.bf16 %v653_v0, %v653_v0  ;;  %v1095_v5 = vpack.c.bf16 %v717_v57, %v717_v57  ;;  %v656_v50 = vadd.f32 %v1140_v9, %v1992_v35  ;;  %v720_v53 = vadd.f32 %v1156_v47, %v1992_v35  ;;  %v647_v56 = vpop.f32.mrb[7].mxu0  ;;  %v711_v39 = vpop.f32.mrb[7].mxu1 }
 0x1f7   : > { %v1077_v10 = vpack.c.bf16 %v645_v44, %v645_v44  ;;  %v1093_v14 = vpack.c.bf16 %v709_v7, %v709_v7  ;;  %v648_v58 = vadd.f32 %v1992_v35, %v647_v56  ;;  %v712_v60 = vadd.f32 %v1992_v35, %v711_v39 }
 0x1f8   : > { %890 = vst.msk [vmem:[%s1999_s10 + $0x18] sm:$0xf] %vm883_vm1, %v1079_v11  ;;  %906 = vst.msk [vmem:[%s1999_s10 + $0x58] sm:$0xf] %vm883_vm1, %v1095_v5  ;;  %v1080_v61 = vpack.c.bf16 %v656_v50, %v656_v50  ;;  %v1096_v59 = vpack.c.bf16 %v720_v53, %v720_v53 }
 0x1f9   : > { %888 = vst.msk [vmem:[%s1999_s10 + $0x10] sm:$0xf] %vm883_vm1, %v1077_v10  ;;  %904 = vst.msk [vmem:[%s1999_s10 + $0x50] sm:$0xf] %vm883_vm1, %v1093_v14  ;;  %v1078_v62 = vpack.c.bf16 %v648_v58, %v648_v58  ;;  %v1094_v31 = vpack.c.bf16 %v712_v60, %v712_v60 }
 0x1fa   : > { %891 = vst.msk [vmem:[%s1999_s10 + $0x1c] sm:$0xf] %vm883_vm1, %v1080_v61  ;;  %907 = vst.msk [vmem:[%s1999_s10 + $0x5c] sm:$0xf] %vm883_vm1, %v1096_v59 }
 0x1fb   : > { %889 = vst.msk [vmem:[%s1999_s10 + $0x14] sm:$0xf] %vm883_vm1, %v1078_v62  ;;  %905 = vst.msk [vmem:[%s1999_s10 + $0x54] sm:$0xf] %vm883_vm1, %v1094_v31  ;;  %v1143_v20 = vpop.f32.mrb[8].mxu0  ;;  %v1159_v1 = vpop.f32.mrb[8].mxu1 }
 0x1fc   : > { %v669_v8 = vadd.f32 %v1143_v20, %v1992_v35  ;;  %v733_v23 = vadd.f32 %v1159_v1, %v1992_v35  ;;  %v660_v26 = vpop.f32.mrb[9].mxu0  ;;  %v724_v3 = vpop.f32.mrb[9].mxu1 }
 0x1fd   : > { %v661_v13 = vadd.f32 %v1992_v35, %v660_v26  ;;  %v725_v43 = vadd.f32 %v1992_v35, %v724_v3  ;;  %v1144_v12 = vpop.f32.mrb[10].mxu0  ;;  %v1160_v16 = vpop.f32.mrb[10].mxu1 }
 0x1fe   : > { %v1083_v29 = vpack.c.bf16 %v669_v8, %v669_v8  ;;  %v1099_v32 = vpack.c.bf16 %v733_v23, %v733_v23  ;;  %v672_v21 = vadd.f32 %v1144_v12, %v1992_v35  ;;  %v736_v25 = vadd.f32 %v1160_v16, %v1992_v35  ;;  %v663_v63 = vpop.f32.mrb[11].mxu0  ;;  %v727_v38 = vpop.f32.mrb[11].mxu1 }
 0x1ff   : > { %v1081_v4 = vpack.c.bf16 %v661_v13, %v661_v13  ;;  %v1097_v30 = vpack.c.bf16 %v725_v43, %v725_v43  ;;  %v664_v34 = vadd.f32 %v1992_v35, %v663_v63  ;;  %v728_v6 = vadd.f32 %v1992_v35, %v727_v38 }
 0x200   : > { %894 = vst.msk [vmem:[%s1999_s10 + $0x28] sm:$0xf] %vm883_vm1, %v1083_v29  ;;  %910 = vst.msk [vmem:[%s1999_s10 + $0x68] sm:$0xf] %vm883_vm1, %v1099_v32  ;;  %v1084_v15 = vpack.c.bf16 %v672_v21, %v672_v21  ;;  %v1100_v18 = vpack.c.bf16 %v736_v25, %v736_v25 }
 0x201   : > { %892 = vst.msk [vmem:[%s1999_s10 + $0x20] sm:$0xf] %vm883_vm1, %v1081_v4  ;;  %908 = vst.msk [vmem:[%s1999_s10 + $0x60] sm:$0xf] %vm883_vm1, %v1097_v30  ;;  %v1082_v19 = vpack.c.bf16 %v664_v34, %v664_v34  ;;  %v1098_v22 = vpack.c.bf16 %v728_v6, %v728_v6 }
 0x202   : > { %895 = vst.msk [vmem:[%s1999_s10 + $0x2c] sm:$0xf] %vm883_vm1, %v1084_v15  ;;  %911 = vst.msk [vmem:[%s1999_s10 + $0x6c] sm:$0xf] %vm883_vm1, %v1100_v18 }
 0x203   : > { %893 = vst.msk [vmem:[%s1999_s10 + $0x24] sm:$0xf] %vm883_vm1, %v1082_v19  ;;  %909 = vst.msk [vmem:[%s1999_s10 + $0x64] sm:$0xf] %vm883_vm1, %v1098_v22  ;;  %v1147_v24 = vpop.f32.mrb[12].mxu0  ;;  %v1163_v27 = vpop.f32.mrb[12].mxu1 }
 0x204   : > { %v685_v17 = vadd.f32 %v1147_v24, %v1992_v35  ;;  %v749_v28 = vadd.f32 %v1163_v27, %v1992_v35  ;;  %v676_v33 = vpop.f32.mrb[13].mxu0  ;;  %v740_v36 = vpop.f32.mrb[13].mxu1 }
 0x205   : > { %v677_v37 = vadd.f32 %v1992_v35, %v676_v33  ;;  %v741_v40 = vadd.f32 %v1992_v35, %v740_v36  ;;  %v1148_v42 = vpop.f32.mrb[14].mxu0  ;;  %v1164_v45 = vpop.f32.mrb[14].mxu1 }
 0x206   : > { %v1087_v46 = vpack.c.bf16 %v685_v17, %v685_v17  ;;  %v1103_v48 = vpack.c.bf16 %v749_v28, %v749_v28  ;;  %v688_v49 = vadd.f32 %v1148_v42, %v1992_v35  ;;  %v752_v51 = vadd.f32 %v1164_v45, %v1992_v35  ;;  %v679_v52 = vpop.f32.mrb[15].mxu0  ;;  %v743_v54 = vpop.f32.mrb[15].mxu1 }
 0x207   : > { %v1085_v55 = vpack.c.bf16 %v677_v37, %v677_v37  ;;  %v1101_v0 = vpack.c.bf16 %v741_v40, %v741_v40  ;;  %v680_v57 = vadd.f32 %v1992_v35, %v679_v52  ;;  %v744_v2 = vadd.f32 %v1992_v35, %v743_v54 }
 0x208   : > { %898 = vst.msk [vmem:[%s1999_s10 + $0x38] sm:$0xf] %vm883_vm1, %v1087_v46  ;;  %914 = vst.msk [vmem:[%s1999_s10 + $0x78] sm:$0xf] %vm883_vm1, %v1103_v48  ;;  %v1088_v41 = vpack.c.bf16 %v688_v49, %v688_v49  ;;  %v1104_v44 = vpack.c.bf16 %v752_v51, %v752_v51 }
 0x209   : > { %896 = vst.msk [vmem:[%s1999_s10 + $0x30] sm:$0xf] %vm883_vm1, %v1085_v55  ;;  %912 = vst.msk [vmem:[%s1999_s10 + $0x70] sm:$0xf] %vm883_vm1, %v1101_v0  ;;  %v1086_v7 = vpack.c.bf16 %v680_v57, %v680_v57  ;;  %v1102_v9 = vpack.c.bf16 %v744_v2, %v744_v2 }
 0x20a   : > { %899 = vst.msk [vmem:[%s1999_s10 + $0x3c] sm:$0xf] %vm883_vm1, %v1088_v41  ;;  %915 = vst.msk [vmem:[%s1999_s10 + $0x7c] sm:$0xf] %vm883_vm1, %v1104_v44 }
 0x20b   : > { %897 = vst.msk [vmem:[%s1999_s10 + $0x34] sm:$0xf] %vm883_vm1, %v1086_v7  ;;  %913 = vst.msk [vmem:[%s1999_s10 + $0x74] sm:$0xf] %vm883_vm1, %v1102_v9 }
 0x20c PF: > { %p14_p9 = scmp.ge.s32.totalorder %s1490_s28, 4   ;;  %s2123_s12 = smov %s1359_s13 }
 0x20d   : > { %s2124_s13 = smov %s1363_s14  ;;  %s2125_s14 = smov %s1501_s4 }
 0x20e   : > { %s2126_s15 = smov %s1490_s28  ;;  %16 = sbr.rel (!%p14_p9) target bundleno = 4 (0x4), region = 80 }
 0x215   :  { %937 = vsyncpa [#allocation3], 1 }
 0x216   :  { %939 = vsyncpa [#allocation3 + $0x1], 1 }
 0x217   :  { %940 = vsyncpa [#allocation5], 1 }

// kernel: sanet_forward.8
= control target key start
LH: loop header
LB: loop body
LE: loop exit
PB: predicated region body
PF: predicated region fallthrough
CT: control target
= control target key end

     0   :  { %s2268_s12 = smov 0   ;;  %s2270_s13 = smov 0   ;;  %s3020_s0 = inlined_call_operand.vmem [shape: bf16[2,256,64], index: 0, kind: input, shape index: {}]   ;;  %s3021_s1 = inlined_call_operand.vmem [shape: bf16[2,256,64], index: 1, kind: input, shape index: {}]   ;;  %s3022_s2 = inlined_call_operand.vmem [shape: bf16[2,256,64], index: 2, kind: input, shape index: {}]   ;;  %s3023_s3 = inlined_call_operand.vmem [shape: f32[2,256,64], index: 3, kind: output, shape index: {}]  }
   0x1   :  { %s2272_s14 = smov 0  }
   0x2 LB: > { %s25_s15 = sadd.s32 1, %s2242_s13  ;;  %p1713_p0 = scmp.ge.s32.totalorder %s2246_s14, 1  ;;  %s2246_s14 = sphi %s2272_s14, %s13_s14   ;;  %s2242_s13 = sphi %s2270_s13, %s3117_s13   ;;  %s2238_s12 = sphi %s2268_s12, %s3116_s12  }
   0x3   : > { %p27_p1 = scmp.ge.s32.totalorder %s25_s15, 2  ;;  %p178_p2 = scmp.lt.s32.totalorder %s2246_s14, 3 }
   0x5   : > { %s3119_s15 = smov (%p27_p1, %s25_s15), 0  ;;  %p179_p3 = pnand %p1713_p0, %p178_p2 }
   0x7   : > { %182 = sbr.rel (%p179_p3) target bundleno = 1028 (0x404), region = 32 }
   0xe   : > { %p221_p4 = scmp.lt.s32.totalorder %s2238_s12, 1  ;;  %vm507_vm0 = vcmask 523264  }
  0x10   : > { %s3121_s12 = smov (!%p221_p4, %s2238_s12), 1 }
  0x11   : > { %s2289_s16 = sshll.u32 %s3121_s12, 7  ;;  %s1791_s26 = sshll.u32 %s3121_s12, 8 }
  0x12   : > { %s2295_s19 = scalar_lea.vmem %s3021_s1, %s2289_s16  ;;  %s2312_s22 = scalar_lea.vmem %s3020_s0, %s2289_s16 }
  0x13   : > { %v1984_v0 = vld [vmem:[%s2295_s19 + $0x40] sm:$0xff]   ;;  %v1986_v2 = vld [vmem:[%s2295_s19 + $0x48] sm:$0xff]   ;;  %v1988_v6 = vld [vmem:[%s2295_s19 + $0x50] sm:$0xff]   ;;  %s2579_s25 = scalar_lea.vmem %s3022_s2, %s2289_s16  ;;  %s2945_s29 = scalar_lea.vmem %s3023_s3, %s1791_s26 }
  0x14   : > { %v1985_v1 = vld [vmem:[%s2295_s19] sm:$0xff]   ;;  %1952 = vmatprep.subr.msk.bf16.mxu0 %vm507_vm0, %v1984_v0  ;;  %v1987_v4 = vld [vmem:[%s2295_s19 + $0x8] sm:$0xff]   ;;  %v1989_v7 = vld [vmem:[%s2295_s19 + $0x10] sm:$0xff]  }
  0x15   : > { %v557_v3 = vsel %vm507_vm0, %v1985_v1, 0  ;;  %v560_v5 = vsel %vm507_vm0, %v1987_v4, 0  ;;  %v2000_v8 = vld [vmem:[%s2312_s22] sm:$0xff]   ;;  %v563_v9 = vsel %vm507_vm0, %v1989_v7, 0  ;;  %v1990_v10 = vld [vmem:[%s2295_s19 + $0x58] sm:$0xff]   ;;  %v1994_v16 = vld [vmem:[%s2295_s19 + $0x68] sm:$0xff]  }
  0x16   : > { %1793 = vmatpush3.bf16.xpose.msra.mxu0 %v557_v3  ;;  %1808 = vmatprep.mubr.msk.bf16.mxu0 %vm507_vm0, %v2000_v8  ;;  %v1991_v11 = vld [vmem:[%s2295_s19 + $0x18] sm:$0xff]   ;;  %v1992_v13 = vld [vmem:[%s2295_s19 + $0x60] sm:$0xff]   ;;  %v1995_v17 = vld [vmem:[%s2295_s19 + $0x28] sm:$0xff]  }
  0x17   : > { %1953 = vmatprep.subr.msk.bf16.mxu0 %vm507_vm0, %v1986_v2  ;;  %v566_v12 = vsel %vm507_vm0, %v1991_v11, 0  ;;  %v1993_v14 = vld [vmem:[%s2295_s19 + $0x20] sm:$0xff]   ;;  %v572_v18 = vsel %vm507_vm0, %v1995_v17, 0  ;;  %v1996_v19 = vld [vmem:[%s2295_s19 + $0x70] sm:$0xff]   ;;  %v1998_v22 = vld [vmem:[%s2295_s19 + $0x78] sm:$0xff]  }
  0x18   : > { %v569_v15 = vsel %vm507_vm0, %v1993_v14, 0  ;;  %v1997_v20 = vld [vmem:[%s2295_s19 + $0x30] sm:$0xff]   ;;  %v1999_v23 = vld [vmem:[%s2295_s19 + $0x38] sm:$0xff]   ;;  %v2001_v25 = vld [vmem:[%s2312_s22 + $0x8] sm:$0xff]  }
  0x19   : > { %v575_v21 = vsel %vm507_vm0, %v1997_v20, 0  ;;  %v578_v24 = vsel %vm507_vm0, %v1999_v23, 0  ;;  %v2002_v26 = vld [vmem:[%s2312_s22 + $0x10] sm:$0xff]   ;;  %v2003_v27 = vld [vmem:[%s2312_s22 + $0x18] sm:$0xff]   ;;  %v2004_v28 = vld [vmem:[%s2312_s22 + $0x20] sm:$0xff]  }
  0x1a   : > { %v2005_v29 = vld [vmem:[%s2312_s22 + $0x28] sm:$0xff]   ;;  %v2006_v30 = vld [vmem:[%s2312_s22 + $0x30] sm:$0xff]   ;;  %v2007_v31 = vld [vmem:[%s2312_s22 + $0x38] sm:$0xff]  }
  0x1b   : > { %v2008_v32 = vld [vmem:[%s2312_s22 + $0x40] sm:$0xff]   ;;  %v2009_v33 = vld [vmem:[%s2312_s22 + $0x48] sm:$0xff]   ;;  %v2010_v34 = vld [vmem:[%s2312_s22 + $0x50] sm:$0xff]  }
  0x1c   : > { %v2011_v35 = vld [vmem:[%s2312_s22 + $0x58] sm:$0xff]   ;;  %v2012_v36 = vld [vmem:[%s2312_s22 + $0x60] sm:$0xff]   ;;  %v2013_v37 = vld [vmem:[%s2312_s22 + $0x68] sm:$0xff]  }
  0x1d   : > { %v2014_v38 = vld [vmem:[%s2312_s22 + $0x70] sm:$0xff]   ;;  %v2015_v39 = vld [vmem:[%s2312_s22 + $0x78] sm:$0xff]  }
  0x1e   : > { %1795 = vmatpush3.bf16.xpose.msra.mxu0 %v560_v5 }
  0x1f   : > { %1954 = vmatprep.subr.msk.bf16.mxu0 %vm507_vm0, %v1988_v6 }
  0x26   : > { %1797 = vmatpush3.bf16.xpose.msra.mxu0 %v563_v9 }
  0x27   : > { %1955 = vmatprep.subr.msk.bf16.mxu0 %vm507_vm0, %v1990_v10 }
  0x2e   : > { %1799 = vmatpush3.bf16.xpose.msra.mxu0 %v566_v12 }
  0x2f   : > { %1956 = vmatprep.subr.msk.bf16.mxu0 %vm507_vm0, %v1992_v13 }
  0x36   : > { %1801 = vmatpush3.bf16.xpose.msra.mxu0 %v569_v15 }
  0x37   : > { %1957 = vmatprep.subr.msk.bf16.mxu0 %vm507_vm0, %v1994_v16 }
  0x3e   : > { %1803 = vmatpush3.bf16.xpose.msra.mxu0 %v572_v18 }
  0x3f   : > { %1958 = vmatprep.subr.msk.bf16.mxu0 %vm507_vm0, %v1996_v19 }
  0x46   : > { %1805 = vmatpush3.bf16.xpose.msra.mxu0 %v575_v21 }
  0x47   : > { %1959 = vmatprep.subr.msk.bf16.mxu0 %vm507_vm0, %v1998_v22 }
  0x4e   : > { %1807 = vmatpush3.bf16.xpose.msra.mxu0 %v578_v24 }
  0x55   : > { %1809 = vmatmul.mubr.msk.bf16.vlgmr.msra.gmra.mrb[0].mxu0 %vm507_vm0, %v2000_v8 }
  0x56   : > { %1810 = vmatprep.mubr.msk.bf16.mxu0 %vm507_vm0, %v2001_v25 }
  0x5d   : > { %1811 = vmatmul.mubr.msk.bf16.gmra.mrb[4].mxu0 %vm507_vm0, %v2001_v25 }
  0x5e   : > { %1812 = vmatprep.mubr.msk.bf16.mxu0 %vm507_vm0, %v2002_v26 }
  0x65   : > { %1813 = vmatmul.mubr.msk.bf16.gmra.mrb[8].mxu0 %vm507_vm0, %v2002_v26 }
  0x66   : > { %1814 = vmatprep.mubr.msk.bf16.mxu0 %vm507_vm0, %v2003_v27 }
  0x6d   : > { %1815 = vmatmul.mubr.msk.bf16.gmra.mrb[12].mxu0 %vm507_vm0, %v2003_v27 }
  0x6e   : > { %1816 = vmatprep.mubr.msk.bf16.mxu0 %vm507_vm0, %v2004_v28 }
  0x75   : > { %1817 = vmatmul.mubr.msk.bf16.gmra.mrb[16].mxu0 %vm507_vm0, %v2004_v28 }
  0x76   : > { %1818 = vmatprep.mubr.msk.bf16.mxu0 %vm507_vm0, %v2005_v29 }
  0x7d   : > { %1819 = vmatmul.mubr.msk.bf16.gmra.mrb[20].mxu0 %vm507_vm0, %v2005_v29 }
  0x7e   : > { %1820 = vmatprep.mubr.msk.bf16.mxu0 %vm507_vm0, %v2006_v30 }
  0x85   : > { %1821 = vmatmul.mubr.msk.bf16.gmra.mrb[24].mxu0 %vm507_vm0, %v2006_v30 }
  0x86   : > { %1822 = vmatprep.mubr.msk.bf16.mxu0 %vm507_vm0, %v2007_v31 }
  0x8d   : > { %1823 = vmatmul.mubr.msk.bf16.gmra.mrb[28].mxu0 %vm507_vm0, %v2007_v31 }
  0x8e   : > { %1824 = vmatprep.mubr.msk.bf16.mxu0 %vm507_vm0, %v2008_v32 }
  0x95   : > { %1825 = vmatmul.mubr.msk.bf16.gmra.mrb[32].mxu0 %vm507_vm0, %v2008_v32 }
  0x96   : > { %1826 = vmatprep.mubr.msk.bf16.mxu0 %vm507_vm0, %v2009_v33 }
  0x9d   : > { %1827 = vmatmul.mubr.msk.bf16.gmra.mrb[36].mxu0 %vm507_vm0, %v2009_v33 }
  0x9e   : > { %1828 = vmatprep.mubr.msk.bf16.mxu0 %vm507_vm0, %v2010_v34 }
  0xa5   : > { %1829 = vmatmul.mubr.msk.bf16.gmra.mrb[40].mxu0 %vm507_vm0, %v2010_v34 }
  0xa6   : > { %1830 = vmatprep.mubr.msk.bf16.mxu0 %vm507_vm0, %v2011_v35 }
  0xad   : > { %1831 = vmatmul.mubr.msk.bf16.gmra.mrb[44].mxu0 %vm507_vm0, %v2011_v35 }
  0xae   : > { %1832 = vmatprep.mubr.msk.bf16.mxu0 %vm507_vm0, %v2012_v36 }
  0xb5   : > { %1833 = vmatmul.mubr.msk.bf16.gmra.mrb[48].mxu0 %vm507_vm0, %v2012_v36 }
  0xb6   : > { %1834 = vmatprep.mubr.msk.bf16.mxu0 %vm507_vm0, %v2013_v37 }
  0xbd   : > { %1835 = vmatmul.mubr.msk.bf16.gmra.mrb[52].mxu0 %vm507_vm0, %v2013_v37 }
  0xbe   : > { %1836 = vmatprep.mubr.msk.bf16.mxu0 %vm507_vm0, %v2014_v38 }
  0xc5   : > { %1837 = vmatmul.mubr.msk.bf16.gmra.mrb[56].mxu0 %vm507_vm0, %v2014_v38 }
  0xc6   : > { %1838 = vmatprep.mubr.msk.bf16.mxu0 %vm507_vm0, %v2015_v39 }
  0xcd   : > { %1839 = vmatmul.mubr.msk.bf16.gmra.mrb[60].mxu0 %vm507_vm0, %v2015_v39 }
 0x128   : > { %v2383_v40 = vpop.f32.mrb[0].mxu0 }
 0x129   : > { %v2385_v41 = vpop.f32.mrb[1].mxu0 }
 0x12a   : > { %v2387_v42 = vpop.f32.mrb[2].mxu0  ;;  %v797_v43 = vmax.f32 %v2383_v40, %v2385_v41 }
 0x12b   : > { %v2391_v44 = vpop.f32.mrb[3].mxu0 }
 0x12c   : > { %798 = vmax.xlane.f32.xlu0 %v797_v43  ;;  %v800_v45 = vmax.f32 %v2387_v42, %v2391_v44 }
 0x130   : > { %801 = vmax.xlane.f32.xlu0 %v800_v45  ;;  %v2395_v46 = vpop.f32.mrb[4].mxu0 }
 0x131   : > { %v2397_v47 = vpop.f32.mrb[5].mxu0 }
 0x132   : > { %v2399_v48 = vpop.f32.mrb[6].mxu0  ;;  %v803_v49 = vmax.f32 %v2395_v46, %v2397_v47 }
 0x133   : > { %v2403_v50 = vpop.f32.mrb[7].mxu0 }
 0x134   : > { %804 = vmax.xlane.f32.xlu1 %v803_v49  ;;  %v806_v51 = vmax.f32 %v2399_v48, %v2403_v50 }
 0x138   : > { %807 = vmax.xlane.f32.xlu1 %v806_v51  ;;  %v2407_v52 = vpop.f32.mrb[8].mxu0 }
 0x139   : > { %v2409_v53 = vpop.f32.mrb[9].mxu0 }
 0x13a   : > { %v2411_v54 = vpop.f32.mrb[10].mxu0  ;;  %v809_v55 = vmax.f32 %v2407_v52, %v2409_v53 }
 0x13b   : > { %v2415_v56 = vpop.f32.mrb[11].mxu0 }
 0x13c   : > { %810 = vmax.xlane.f32.xlu0 %v809_v55  ;;  %v812_v57 = vmax.f32 %v2411_v54, %v2415_v56 }
 0x13e   : > { %813 = vmax.xlane.f32.xlu1 %v812_v57 }
 0x140   : > { %v2419_v58 = vpop.f32.mrb[12].mxu0 }
 0x141   : > { %v2421_v59 = vpop.f32.mrb[13].mxu0 }
 0x142   : > { %v2423_v60 = vpop.f32.mrb[14].mxu0  ;;  %v815_v61 = vmax.f32 %v2419_v58, %v2421_v59 }
 0x143   : > { %v2427_v62 = vpop.f32.mrb[15].mxu0 }
 0x144   : > { %816 = vmax.xlane.f32.xlu0 %v815_v61  ;;  %v818_v63 = vmax.f32 %v2423_v60, %v2427_v62 }
 0x146   : > { %819 = vmax.xlane.f32.xlu1 %v818_v63 }
 0x148   : > { %v2431_v0 = vpop.f32.mrb[16].mxu0 }
 0x149   : > { %v2433_v1 = vpop.f32.mrb[17].mxu0 }
 0x14a   : > { %v2435_v2 = vpop.f32.mrb[18].mxu0  ;;  %v821_v3 = vmax.f32 %v2431_v0, %v2433_v1 }
 0x14b   : > { %v2439_v4 = vpop.f32.mrb[19].mxu0 }
 0x14c   : > { %822 = vmax.xlane.f32.xlu0 %v821_v3  ;;  %v824_v5 = vmax.f32 %v2435_v2, %v2439_v4 }
 0x14e   : > { %825 = vmax.xlane.f32.xlu1 %v824_v5 }
 0x150   : > { %v2443_v6 = vpop.f32.mrb[20].mxu0 }
 0x151   : > { %v2445_v7 = vpop.f32.mrb[21].mxu0 }
 0x152   : > { %v2447_v8 = vpop.f32.mrb[22].mxu0  ;;  %v827_v9 = vmax.f32 %v2443_v6, %v2445_v7 }
 0x153   : > { %v2451_v10 = vpop.f32.mrb[23].mxu0 }
 0x154   : > { %828 = vmax.xlane.f32.xlu0 %v827_v9  ;;  %v830_v11 = vmax.f32 %v2447_v8, %v2451_v10 }
 0x156   : > { %831 = vmax.xlane.f32.xlu1 %v830_v11  ;;  %v2016_v11 = vld [vmem:[%s2579_s25 + $0x40] sm:$0xff]  }
 0x157   : > { %1840 = vmatprep.subr.bf16.mxu1 %v2016_v11 }
 0x158   : > { %v2455_v12 = vpop.f32.mrb[24].mxu0 }
 0x159   : > { %v2457_v13 = vpop.f32.mrb[25].mxu0 }
 0x15a   : > { %v2459_v14 = vpop.f32.mrb[26].mxu0  ;;  %v833_v15 = vmax.f32 %v2455_v12, %v2457_v13 }
 0x15b   : > { %v2463_v16 = vpop.f32.mrb[27].mxu0 }
 0x15c   : > { %834 = vmax.xlane.f32.xlu0 %v833_v15  ;;  %v836_v17 = vmax.f32 %v2459_v14, %v2463_v16 }
 0x15e   : > { %837 = vmax.xlane.f32.xlu1 %v836_v17 }
 0x160   : > { %v2467_v18 = vpop.f32.mrb[28].mxu0 }
 0x161   : > { %v2469_v19 = vpop.f32.mrb[29].mxu0 }
 0x162   : > { %v2471_v20 = vpop.f32.mrb[30].mxu0  ;;  %v839_v21 = vmax.f32 %v2467_v18, %v2469_v19 }
 0x163   : > { %v2475_v22 = vpop.f32.mrb[31].mxu0 }
 0x164   : > { %840 = vmax.xlane.f32.xlu0 %v839_v21  ;;  %v842_v23 = vmax.f32 %v2471_v20, %v2475_v22 }
 0x166   : > { %843 = vmax.xlane.f32.xlu1 %v842_v23 }
 0x168   : > { %v2479_v24 = vpop.f32.mrb[32].mxu0 }
 0x169   : > { %v2481_v25 = vpop.f32.mrb[33].mxu0 }
 0x16a   : > { %v2483_v26 = vpop.f32.mrb[34].mxu0  ;;  %v845_v27 = vmax.f32 %v2479_v24, %v2481_v25 }
 0x16b   : > { %3052 = vst [vmem:[#allocation2_spill] sm:$0xff] %v2483_v26  ;;  %v2487_v28 = vpop.f32.mrb[35].mxu0 }
 0x16c   : > { %3053 = vst [vmem:[#allocation3_spill] sm:$0xff] %v2487_v28  ;;  %846 = vmax.xlane.f32.xlu0 %v845_v27  ;;  %v848_v29 = vmax.f32 %v2483_v26, %v2487_v28 }
 0x16e   : > { %849 = vmax.xlane.f32.xlu1 %v848_v29 }
 0x170   : > { %v2491_v30 = vpop.f32.mrb[36].mxu0 }
 0x171   : > { %3054 = vst [vmem:[#allocation4_spill] sm:$0xff] %v2491_v30  ;;  %v2493_v31 = vpop.f32.mrb[37].mxu0 }
 0x172   : > { %3055 = vst [vmem:[#allocation5_spill] sm:$0xff] %v2493_v31  ;;  %v2495_v32 = vpop.f32.mrb[38].mxu0  ;;  %v851_v33 = vmax.f32 %v2491_v30, %v2493_v31 }
 0x173   : > { %3056 = vst [vmem:[#allocation6_spill] sm:$0xff] %v2495_v32  ;;  %v2499_v34 = vpop.f32.mrb[39].mxu0 }
 0x174   : > { %3057 = vst [vmem:[#allocation7_spill] sm:$0xff] %v2499_v34  ;;  %852 = vmax.xlane.f32.xlu0 %v851_v33  ;;  %v854_v35 = vmax.f32 %v2495_v32, %v2499_v34 }
 0x176   : > { %855 = vmax.xlane.f32.xlu1 %v854_v35  ;;  %v2018_v35 = vld [vmem:[%s2579_s25 + $0x48] sm:$0xff]  }
 0x178   : > { %v2503_v36 = vpop.f32.mrb[40].mxu0 }
 0x179   : > { %3058 = vst [vmem:[#allocation8_spill] sm:$0xff] %v2503_v36  ;;  %v2505_v37 = vpop.f32.mrb[41].mxu0 }
 0x17a   : > { %3059 = vst [vmem:[#allocation9_spill] sm:$0xff] %v2505_v37  ;;  %v2507_v38 = vpop.f32.mrb[42].mxu0  ;;  %v857_v39 = vmax.f32 %v2503_v36, %v2505_v37 }
 0x17b   : > { %3060 = vst [vmem:[#allocation10_spill] sm:$0xff] %v2507_v38  ;;  %v2511_v43 = vpop.f32.mrb[43].mxu0 }
 0x17c   : > { %3061 = vst [vmem:[#allocation11_spill] sm:$0xff] %v2511_v43  ;;  %858 = vmax.xlane.f32.xlu0 %v857_v39  ;;  %v860_v45 = vmax.f32 %v2507_v38, %v2511_v43  ;;  %v2019_v43 = vld [vmem:[%s2579_s25 + $0x8] sm:$0xff]   ;;  %v2020_v38 = vld [vmem:[%s2579_s25 + $0x50] sm:$0xff]  }
 0x17e   : > { %861 = vmax.xlane.f32.xlu1 %v860_v45 }
 0x180   : > { %v2515_v49 = vpop.f32.mrb[44].mxu0 }
 0x181   : > { %3062 = vst [vmem:[#allocation12_spill] sm:$0xff] %v2515_v49  ;;  %v2517_v51 = vpop.f32.mrb[45].mxu0 }
 0x182   : > { %3063 = vst [vmem:[#allocation13_spill] sm:$0xff] %v2517_v51  ;;  %v2519_v55 = vpop.f32.mrb[46].mxu0  ;;  %v863_v57 = vmax.f32 %v2515_v49, %v2517_v51  ;;  %v2021_v49 = vld [vmem:[%s2579_s25 + $0x10] sm:$0xff]  }
 0x183   : > { %3064 = vst [vmem:[#allocation14_spill] sm:$0xff] %v2519_v55  ;;  %v2523_v61 = vpop.f32.mrb[47].mxu0 }
 0x184   : > { %3065 = vst [vmem:[#allocation15_spill] sm:$0xff] %v2523_v61  ;;  %864 = vmax.xlane.f32.xlu0 %v863_v57  ;;  %v866_v63 = vmax.f32 %v2519_v55, %v2523_v61 }
 0x186   : > { %867 = vmax.xlane.f32.xlu1 %v866_v63  ;;  %v2017_v63 = vld [vmem:[%s2579_s25] sm:$0xff]  }
 0x187   : > { %1841 = vmatpush3.bf16.msra.mxu1 %v2017_v63 }
 0x188   : > { %v2527_v3 = vpop.f32.mrb[48].mxu0  ;;  %1842 = vmatprep.subr.bf16.mxu1 %v2018_v35 }
 0x189   : > { %v2529_v5 = vpop.f32.mrb[49].mxu0 }
 0x18a   : > { %v2531_v9 = vpop.f32.mrb[50].mxu0 }
 0x18b   : > { %v2535_v15 = vpop.f32.mrb[51].mxu0  ;;  %1843 = vmatpush3.bf16.msra.mxu1 %v2019_v43 }
 0x18c   : > { %1844 = vmatprep.subr.bf16.mxu1 %v2020_v38 }
 0x18f   : > { %1845 = vmatpush3.bf16.msra.mxu1 %v2021_v49 }
 0x190   : > { %v2539_v21 = vpop.f32.mrb[52].mxu0 }
 0x191   : > { %v2541_v23 = vpop.f32.mrb[53].mxu0 }
 0x192   : > { %v2543_v27 = vpop.f32.mrb[54].mxu0 }
 0x193   : > { %v2547_v33 = vpop.f32.mrb[55].mxu0 }
 0x198   : > { %v2551_v39 = vpop.f32.mrb[56].mxu0 }
 0x199   : > { %v2553_v45 = vpop.f32.mrb[57].mxu0 }
 0x19a   : > { %v2555_v57 = vpop.f32.mrb[58].mxu0 }
 0x19b   : > { %v2559_v17 = vpop.f32.mrb[59].mxu0 }
 0x1a0   : > { %v2563_v29 = vpop.f32.mrb[60].mxu0 }
 0x1a1   : > { %v2565_v61 = vpop.f32.mrb[61].mxu0 }
 0x1a2   : > { %v2567_v55 = vpop.f32.mrb[62].mxu0 }
 0x1a3   : > { %v2571_v51 = vpop.f32.mrb[63].mxu0 }
 0x1b9   : > { %v799_v37 = vpop.xlane.xlu0 %798 }
 0x1ba   : > { %v893_v36 = vsub.f32 %v2383_v40, %v799_v37  ;;  %v894_v34 = vsub.f32 %v2385_v41, %v799_v37 }
 0x1bc   : > { %v957_v32 = vmul.f32 1.442695, %v893_v36  ;;  %v959_v31 = vmul.f32 1.442695, %v894_v34 }
 0x1bd   : > { %v802_v30 = vpop.xlane.xlu0 %801 }
 0x1be   : > { %2032 = vpow2.f32 %v957_v32  ;;  %v895_v11 = vsub.f32 %v2387_v42, %v802_v30  ;;  %v896_v63 = vsub.f32 %v2391_v44, %v802_v30 }
 0x1bf   : > { %2034 = vpow2.f32 %v959_v31 }
 0x1c0   : > { %v961_v35 = vmul.f32 1.442695, %v895_v11  ;;  %v963_v28 = vmul.f32 1.442695, %v896_v63 }
 0x1c1   : > { %v805_v26 = vpop.xlane.xlu1 %804 }
 0x1c2   : > { %2036 = vpow2.f32 %v961_v35  ;;  %v897_v38 = vsub.f32 %v2395_v46, %v805_v26  ;;  %v898_v43 = vsub.f32 %v2397_v47, %v805_v26 }
 0x1c3   : > { %2038 = vpow2.f32 %v963_v28 }
 0x1c4   : > { %v965_v40 = vmul.f32 1.442695, %v897_v38  ;;  %v967_v41 = vmul.f32 1.442695, %v898_v43 }
 0x1c5   : > { %v808_v36 = vpop.xlane.xlu1 %807 }
 0x1c6   : > { %2040 = vpow2.f32 %v965_v40  ;;  %v899_v32 = vsub.f32 %v2399_v48, %v808_v36  ;;  %v900_v42 = vsub.f32 %v2403_v50, %v808_v36  ;;  %v3066_v40 = vmax.f32 %v2527_v3, %v2529_v5 }
 0x1c7   : > { %2042 = vpow2.f32 %v967_v41 }
 0x1c8   : > { %v2595_v44 = vpop.eup %2032  ;;  %v969_v30 = vmul.f32 1.442695, %v899_v32  ;;  %v971_v31 = vmul.f32 1.442695, %v900_v42 }
 0x1c9   : > { %v2597_v34 = vpop.eup %2034  ;;  %v811_v37 = vpop.xlane.xlu0 %810 }
 0x1ca   : > { %2044 = vpow2.f32 %v969_v30  ;;  %v901_v46 = vsub.f32 %v2407_v52, %v811_v37  ;;  %v902_v47 = vsub.f32 %v2409_v53, %v811_v37  ;;  %v1085_v26 = vadd.f32 %v2597_v34, %v2595_v44 }
 0x1cb   : > { %2046 = vpow2.f32 %v971_v31  ;;  %v814_v48 = vpop.xlane.xlu1 %813 }
 0x1cc   : > { %v2603_v28 = vpop.eup %2036  ;;  %v973_v50 = vmul.f32 1.442695, %v901_v46  ;;  %v975_v49 = vmul.f32 1.442695, %v902_v47  ;;  %v903_v11 = vsub.f32 %v2411_v54, %v814_v48  ;;  %v904_v63 = vsub.f32 %v2415_v56, %v814_v48  ;;  %1086 = vadd.xlane.f32.xlu0 %v1085_v26 }
 0x1cd   : > { %v2607_v35 = vpop.eup %2038  ;;  %v3067_v26 = vmax.f32 %v2531_v9, %v2535_v15 }
 0x1ce   : > { %2048 = vpow2.f32 %v973_v50  ;;  %v977_v52 = vmul.f32 1.442695, %v903_v11  ;;  %v979_v38 = vmul.f32 1.442695, %v904_v63  ;;  %v1088_v53 = vadd.f32 %v2607_v35, %v2603_v28  ;;  %v2022_v63 = vld [vmem:[%s2579_s25 + $0x58] sm:$0xff]  }
 0x1cf   : > { %2050 = vpow2.f32 %v975_v49  ;;  %1846 = vmatprep.subr.bf16.mxu1 %v2022_v63 }
 0x1d0   : > { %v2611_v43 = vpop.eup %2040  ;;  %2052 = vpow2.f32 %v977_v52  ;;  %1089 = vadd.xlane.f32.xlu1 %v1088_v53  ;;  %870 = vmax.xlane.f32.xlu0 %v3066_v40 }
 0x1d1   : > { %v2616_v54 = vpop.eup %2042  ;;  %2054 = vpow2.f32 %v979_v38  ;;  %v817_v56 = vpop.xlane.xlu0 %816 }
 0x1d2   : > { %v905_v41 = vsub.f32 %v2419_v58, %v817_v56  ;;  %v906_v36 = vsub.f32 %v2421_v59, %v817_v56  ;;  %v1091_v32 = vadd.f32 %v2616_v54, %v2611_v43  ;;  %v2023_v56 = vld [vmem:[%s2579_s25 + $0x18] sm:$0xff]  }
 0x1d3   : > { %v820_v42 = vpop.xlane.xlu1 %819  ;;  %1847 = vmatpush3.bf16.msra.mxu1 %v2023_v56 }
 0x1d4   : > { %v2622_v30 = vpop.eup %2044  ;;  %v981_v31 = vmul.f32 1.442695, %v905_v41  ;;  %v983_v37 = vmul.f32 1.442695, %v906_v36  ;;  %v907_v46 = vsub.f32 %v2423_v60, %v820_v42  ;;  %v908_v47 = vsub.f32 %v2427_v62, %v820_v42  ;;  %1092 = vadd.xlane.f32.xlu0 %v1091_v32  ;;  %873 = vmax.xlane.f32.xlu1 %v3067_v26 }
 0x1d5   : > { %v2629_v58 = vpop.eup %2046  ;;  %v3068_v60 = vmax.f32 %v2539_v21, %v2541_v23 }
 0x1d6   : > { %2056 = vpow2.f32 %v981_v31  ;;  %v985_v59 = vmul.f32 1.442695, %v907_v46  ;;  %v987_v48 = vmul.f32 1.442695, %v908_v47  ;;  %v1094_v50 = vadd.f32 %v2629_v58, %v2622_v30 }
 0x1d7   : > { %2058 = vpow2.f32 %v983_v37 }
 0x1d8   : > { %v2633_v49 = vpop.eup %2048  ;;  %2060 = vpow2.f32 %v985_v59  ;;  %1095 = vadd.xlane.f32.xlu1 %v1094_v50  ;;  %876 = vmax.xlane.f32.xlu0 %v3068_v60  ;;  %v2025_v59 = vld [vmem:[%s2579_s25 + $0x20] sm:$0xff]  }
 0x1d9   : > { %v2638_v62 = vpop.eup %2050  ;;  %2062 = vpow2.f32 %v987_v48  ;;  %v823_v11 = vpop.xlane.xlu0 %822 }
 0x1da   : > { %v2641_v52 = vpop.eup %2052  ;;  %v909_v38 = vsub.f32 %v2431_v0, %v823_v11  ;;  %v910_v53 = vsub.f32 %v2433_v1, %v823_v11  ;;  %v1097_v40 = vadd.f32 %v2638_v62, %v2633_v49  ;;  %v3069_v0 = vmax.f32 %v2543_v27, %v2547_v33  ;;  %v2024_v1 = vld [vmem:[%s2579_s25 + $0x60] sm:$0xff]  }
 0x1db   : > { %v2648_v41 = vpop.eup %2054  ;;  %v826_v36 = vpop.xlane.xlu1 %825  ;;  %1848 = vmatprep.subr.bf16.mxu1 %v2024_v1 }
 0x1dc   : > { %v989_v32 = vmul.f32 1.442695, %v909_v38  ;;  %v991_v42 = vmul.f32 1.442695, %v910_v53  ;;  %v911_v31 = vsub.f32 %v2435_v2, %v826_v36  ;;  %v912_v37 = vsub.f32 %v2439_v4, %v826_v36  ;;  %1098 = vadd.xlane.f32.xlu0 %v1097_v40  ;;  %879 = vmax.xlane.f32.xlu1 %v3069_v0  ;;  %v2026_v53 = vld [vmem:[%s2579_s25 + $0x68] sm:$0xff]  }
 0x1dd   : > { %v1100_v26 = vadd.f32 %v2648_v41, %v2641_v52  ;;  %v3070_v4 = vmax.f32 %v2551_v39, %v2553_v45  ;;  %1849 = vmatpush3.bf16.msra.mxu1 %v2025_v59  ;;  %v2027_v36 = vld [vmem:[%s2579_s25 + $0x28] sm:$0xff]  }
 0x1de   : > { %2064 = vpow2.f32 %v989_v32  ;;  %v993_v46 = vmul.f32 1.442695, %v911_v31  ;;  %v995_v47 = vmul.f32 1.442695, %v912_v37  ;;  %1850 = vmatprep.subr.bf16.mxu1 %v2026_v53 }
 0x1df   : > { %2066 = vpow2.f32 %v991_v42 }
 0x1e0   : > { %v2659_v2 = vpop.eup %2056  ;;  %2068 = vpow2.f32 %v993_v46  ;;  %1101 = vadd.xlane.f32.xlu1 %v1100_v26  ;;  %882 = vmax.xlane.f32.xlu0 %v3070_v4  ;;  %v2028_v46 = vld [vmem:[%s2579_s25 + $0x70] sm:$0xff]  }
 0x1e1   : > { %v2664_v48 = vpop.eup %2058  ;;  %2070 = vpow2.f32 %v995_v47  ;;  %v829_v50 = vpop.xlane.xlu0 %828  ;;  %1851 = vmatpush3.bf16.msra.mxu1 %v2027_v36  ;;  %v2029_v47 = vld [vmem:[%s2579_s25 + $0x30] sm:$0xff]   ;;  %v2031_v36 = vld [vmem:[%s2579_s25 + $0x38] sm:$0xff]  }
 0x1e2   : > { %v2666_v60 = vpop.eup %2060  ;;  %v913_v11 = vsub.f32 %v2443_v6, %v829_v50  ;;  %v914_v63 = vsub.f32 %v2445_v7, %v829_v50  ;;  %v1103_v38 = vadd.f32 %v2664_v48, %v2659_v2  ;;  %v3071_v6 = vmax.f32 %v2555_v57, %v2559_v17  ;;  %1852 = vmatprep.subr.bf16.mxu1 %v2028_v46 }
 0x1e3   : > { %v2673_v40 = vpop.eup %2062  ;;  %v832_v56 = vpop.xlane.xlu1 %831 }
 0x1e4   : > { %v997_v32 = vmul.f32 1.442695, %v913_v11  ;;  %v999_v42 = vmul.f32 1.442695, %v914_v63  ;;  %v915_v31 = vsub.f32 %v2447_v8, %v832_v56  ;;  %v916_v37 = vsub.f32 %v2451_v10, %v832_v56  ;;  %1104 = vadd.xlane.f32.xlu0 %v1103_v38  ;;  %885 = vmax.xlane.f32.xlu1 %v3071_v6  ;;  %v2030_v38 = vld [vmem:[%s2579_s25 + $0x78] sm:$0xff]  }
 0x1e5   : > { %v1106_v1 = vadd.f32 %v2673_v40, %v2666_v60  ;;  %v3072_v10 = vmax.f32 %v2563_v29, %v2565_v61  ;;  %1853 = vmatpush3.bf16.msra.mxu1 %v2029_v47 }
 0x1e6   : > { %2072 = vpow2.f32 %v997_v32  ;;  %v1001_v7 = vmul.f32 1.442695, %v915_v31  ;;  %v1003_v0 = vmul.f32 1.442695, %v916_v37  ;;  %1854 = vmatprep.subr.bf16.mxu1 %v2030_v38 }
 0x1e7   : > { %2074 = vpow2.f32 %v999_v42 }
 0x1e8   : > { %v2685_v8 = vpop.eup %2064  ;;  %2076 = vpow2.f32 %v1001_v7  ;;  %1107 = vadd.xlane.f32.xlu1 %v1106_v1  ;;  %888 = vmax.xlane.f32.xlu0 %v3072_v10 }
 0x1e9   : > { %v2690_v26 = vpop.eup %2066  ;;  %2078 = vpow2.f32 %v1003_v0  ;;  %v835_v59 = vpop.xlane.xlu0 %834  ;;  %1855 = vmatpush3.bf16.msra.mxu1 %v2031_v36 }
 0x1ea   : > { %v2692_v4 = vpop.eup %2068  ;;  %v917_v50 = vsub.f32 %v2455_v12, %v835_v59  ;;  %v918_v11 = vsub.f32 %v2457_v13, %v835_v59  ;;  %v1109_v63 = vadd.f32 %v2690_v26, %v2685_v8  ;;  %v3073_v12 = vmax.f32 %v2567_v55, %v2571_v51 }
 0x1eb   : > { %v2699_v53 = vpop.eup %2070  ;;  %v838_v56 = vpop.xlane.xlu1 %837 }
 0x1ec   : > { %v1005_v32 = vmul.f32 1.442695, %v917_v50  ;;  %v1007_v42 = vmul.f32 1.442695, %v918_v11  ;;  %v919_v31 = vsub.f32 %v2459_v14, %v838_v56  ;;  %v920_v37 = vsub.f32 %v2463_v16, %v838_v56  ;;  %1110 = vadd.xlane.f32.xlu0 %v1109_v63  ;;  %891 = vmax.xlane.f32.xlu1 %v3073_v12 }
 0x1ed   : > { %v1112_v7 = vadd.f32 %v2699_v53, %v2692_v4 }
 0x1ee   : > { %2080 = vpow2.f32 %v1005_v32  ;;  %v1009_v13 = vmul.f32 1.442695, %v919_v31  ;;  %v1011_v6 = vmul.f32 1.442695, %v920_v37 }
 0x1ef   : > { %2082 = vpow2.f32 %v1007_v42 }
 0x1f0   : > { %v2709_v0 = vpop.eup %2072  ;;  %2084 = vpow2.f32 %v1009_v13  ;;  %1113 = vadd.xlane.f32.xlu1 %v1112_v7 }
 0x1f1   : > { %v2711_v14 = vpop.eup %2074  ;;  %2086 = vpow2.f32 %v1011_v6  ;;  %v841_v16 = vpop.xlane.xlu0 %840 }
 0x1f2   : > { %v2713_v1 = vpop.eup %2076  ;;  %v921_v46 = vsub.f32 %v2467_v18, %v841_v16  ;;  %v922_v47 = vsub.f32 %v2469_v19, %v841_v16  ;;  %v1115_v10 = vadd.f32 %v2711_v14, %v2709_v0 }
 0x1f3   : > { %v2719_v59 = vpop.eup %2078  ;;  %v844_v50 = vpop.xlane.xlu1 %843 }
 0x1f4   : > { %v1013_v11 = vmul.f32 1.442695, %v921_v46  ;;  %v1015_v63 = vmul.f32 1.442695, %v922_v47  ;;  %v923_v38 = vsub.f32 %v2471_v20, %v844_v50  ;;  %v924_v56 = vsub.f32 %v2475_v22, %v844_v50  ;;  %1116 = vadd.xlane.f32.xlu0 %v1115_v10  ;;  %v3074_v46 = vld [vmem:[#allocation2_spill] sm:$0xff]  ;;  %v3075_v10 = vld [vmem:[#allocation3_spill] sm:$0xff] }
 0x1f5   : > { %v1118_v36 = vadd.f32 %v2719_v59, %v2713_v1 }
 0x1f6   : > { %2088 = vpow2.f32 %v1013_v11  ;;  %v1017_v18 = vmul.f32 1.442695, %v923_v38  ;;  %v1019_v32 = vmul.f32 1.442695, %v924_v56 }
 0x1f7   : > { %2090 = vpow2.f32 %v1015_v63  ;;  %1119 = vadd.xlane.f32.xlu1 %v1118_v36 }
 0x1f8   : > { %v2725_v19 = vpop.eup %2080  ;;  %2092 = vpow2.f32 %v1017_v18  ;;  %v3078_v18 = vld [vmem:[#allocation4_spill] sm:$0xff] }
 0x1f9   : > { %v2727_v42 = vpop.eup %2082  ;;  %2094 = vpow2.f32 %v1019_v32  ;;  %v847_v31 = vpop.xlane.xlu0 %846 }
 0x1fa   : > { %v2729_v37 = vpop.eup %2084  ;;  %v925_v20 = vsub.f32 %v2479_v24, %v847_v31  ;;  %v926_v22 = vsub.f32 %v2481_v25, %v847_v31  ;;  %v1121_v12 = vadd.f32 %v2727_v42, %v2725_v19  ;;  %v3079_v31 = vld [vmem:[#allocation5_spill] sm:$0xff] }
 0x1fb   : > { %v2735_v13 = vpop.eup %2086  ;;  %v850_v6 = vpop.xlane.xlu1 %849 }
 0x1fc   : > { %v1021_v7 = vmul.f32 1.442695, %v925_v20  ;;  %v1023_v16 = vmul.f32 1.442695, %v926_v22  ;;  %v927_v47 = vsub.f32 %v3074_v46, %v850_v6  ;;  %v928_v50 = vsub.f32 %v3075_v10, %v850_v6  ;;  %1122 = vadd.xlane.f32.xlu0 %v1121_v12  ;;  %v3081_v46 = vld [vmem:[#allocation6_spill] sm:$0xff]  ;;  %v3082_v10 = vld [vmem:[#allocation7_spill] sm:$0xff] }
 0x1fd   : > { %v1124_v11 = vadd.f32 %v2735_v13, %v2729_v37 }
 0x1fe   : > { %2096 = vpow2.f32 %v1021_v7  ;;  %v1025_v24 = vmul.f32 1.442695, %v927_v47  ;;  %v1027_v63 = vmul.f32 1.442695, %v928_v50 }
 0x1ff   : > { %2098 = vpow2.f32 %v1023_v16  ;;  %1125 = vadd.xlane.f32.xlu1 %v1124_v11 }
 0x200   : > { %v2741_v25 = vpop.eup %2088  ;;  %2100 = vpow2.f32 %v1025_v24 }
 0x201   : > { %3076 = vst [vmem:[#allocation2_spill] sm:$0xff] %v2741_v25  ;;  %v2743_v38 = vpop.eup %2090  ;;  %2102 = vpow2.f32 %v1027_v63  ;;  %v853_v56 = vpop.xlane.xlu0 %852 }
 0x202   : > { %v2745_v36 = vpop.eup %2092  ;;  %v929_v32 = vsub.f32 %v3078_v18, %v853_v56  ;;  %v930_v20 = vsub.f32 %v3079_v31, %v853_v56  ;;  %v1127_v22 = vadd.f32 %v2743_v38, %v2741_v25  ;;  %v3090_v25 = vld [vmem:[#allocation11_spill] sm:$0xff] }
 0x203   : > { %3077 = vst [vmem:[#allocation3_spill] sm:$0xff] %v2745_v36  ;;  %v2751_v12 = vpop.eup %2094  ;;  %v856_v6 = vpop.xlane.xlu1 %855 }
 0x204   : > { %3080 = vst [vmem:[#allocation4_spill] sm:$0xff] %v2751_v12  ;;  %v1029_v7 = vmul.f32 1.442695, %v929_v32  ;;  %v1031_v16 = vmul.f32 1.442695, %v930_v20  ;;  %v931_v47 = vsub.f32 %v3081_v46, %v856_v6  ;;  %v932_v50 = vsub.f32 %v3082_v10, %v856_v6  ;;  %1128 = vadd.xlane.f32.xlu0 %v1127_v22  ;;  %v3086_v20 = vld [vmem:[#allocation8_spill] sm:$0xff] }
 0x205   : > { %v1130_v11 = vadd.f32 %v2751_v12, %v2745_v36  ;;  %v3087_v22 = vld [vmem:[#allocation9_spill] sm:$0xff] }
 0x206   : > { %2104 = vpow2.f32 %v1029_v7  ;;  %v1033_v24 = vmul.f32 1.442695, %v931_v47  ;;  %v1035_v63 = vmul.f32 1.442695, %v932_v50 }
 0x207   : > { %2106 = vpow2.f32 %v1031_v16  ;;  %1131 = vadd.xlane.f32.xlu1 %v1130_v11  ;;  %v3089_v11 = vld [vmem:[#allocation10_spill] sm:$0xff] }
 0x208   : > { %v2757_v56 = vpop.eup %2096  ;;  %2108 = vpow2.f32 %v1033_v24 }
 0x209   : > { %3083 = vst [vmem:[#allocation5_spill] sm:$0xff] %v2757_v56  ;;  %v2759_v18 = vpop.eup %2098  ;;  %2110 = vpow2.f32 %v1035_v63  ;;  %v859_v32 = vpop.xlane.xlu0 %858 }
 0x20a   : > { %3084 = vst [vmem:[#allocation6_spill] sm:$0xff] %v2759_v18  ;;  %v2761_v31 = vpop.eup %2100  ;;  %v933_v6 = vsub.f32 %v3086_v20, %v859_v32  ;;  %v934_v46 = vsub.f32 %v3087_v22, %v859_v32  ;;  %v1133_v7 = vadd.f32 %v2759_v18, %v2757_v56  ;;  %v3093_v56 = vld [vmem:[#allocation14_spill] sm:$0xff] }
 0x20b   : > { %3085 = vst [vmem:[#allocation7_spill] sm:$0xff] %v2761_v31  ;;  %v2767_v47 = vpop.eup %2102  ;;  %v862_v16 = vpop.xlane.xlu1 %861 }
 0x20c   : > { %3088 = vst [vmem:[#allocation8_spill] sm:$0xff] %v2767_v47  ;;  %v1037_v10 = vmul.f32 1.442695, %v933_v6  ;;  %v1039_v50 = vmul.f32 1.442695, %v934_v46  ;;  %v935_v24 = vsub.f32 %v3089_v11, %v862_v16  ;;  %v936_v36 = vsub.f32 %v3090_v25, %v862_v16  ;;  %1134 = vadd.xlane.f32.xlu0 %v1133_v7  ;;  %v3091_v11 = vld [vmem:[#allocation12_spill] sm:$0xff] }
 0x20d   : > { %v1136_v63 = vadd.f32 %v2767_v47, %v2761_v31  ;;  %v3092_v7 = vld [vmem:[#allocation13_spill] sm:$0xff]  ;;  %v3094_v31 = vld [vmem:[#allocation15_spill] sm:$0xff] }
 0x20e   : > { %2112 = vpow2.f32 %v1037_v10  ;;  %v1041_v20 = vmul.f32 1.442695, %v935_v24  ;;  %v1043_v12 = vmul.f32 1.442695, %v936_v36 }
 0x20f   : > { %2114 = vpow2.f32 %v1039_v50  ;;  %1137 = vadd.xlane.f32.xlu1 %v1136_v63 }
 0x210   : > { %v2773_v32 = vpop.eup %2104  ;;  %2116 = vpow2.f32 %v1041_v20 }
 0x211   : > { %v2775_v22 = vpop.eup %2106  ;;  %2118 = vpow2.f32 %v1043_v12  ;;  %v865_v6 = vpop.xlane.xlu0 %864 }
 0x212   : > { %v2777_v46 = vpop.eup %2108  ;;  %v937_v25 = vsub.f32 %v3091_v11, %v865_v6  ;;  %v938_v16 = vsub.f32 %v3092_v7, %v865_v6  ;;  %v1139_v10 = vadd.f32 %v2775_v22, %v2773_v32 }
 0x213   : > { %v2783_v24 = vpop.eup %2110  ;;  %v868_v36 = vpop.xlane.xlu1 %867 }
 0x214   : > { %v1045_v50 = vmul.f32 1.442695, %v937_v25  ;;  %v1047_v63 = vmul.f32 1.442695, %v938_v16  ;;  %v939_v20 = vsub.f32 %v3093_v56, %v868_v36  ;;  %v940_v47 = vsub.f32 %v3094_v31, %v868_v36  ;;  %1140 = vadd.xlane.f32.xlu0 %v1139_v10 }
 0x215   : > { %v1142_v12 = vadd.f32 %v2783_v24, %v2777_v46 }
 0x216   : > { %2120 = vpow2.f32 %v1045_v50  ;;  %v1049_v11 = vmul.f32 1.442695, %v939_v20  ;;  %v1051_v18 = vmul.f32 1.442695, %v940_v47 }
 0x217   : > { %2122 = vpow2.f32 %v1047_v63  ;;  %1143 = vadd.xlane.f32.xlu1 %v1142_v12 }
 0x218   : > { %v2789_v6 = vpop.eup %2112  ;;  %2124 = vpow2.f32 %v1049_v11 }
 0x219   : > { %3095 = vst [vmem:[#allocation9_spill] sm:$0xff] %v2789_v6  ;;  %v2791_v7 = vpop.eup %2114  ;;  %2126 = vpow2.f32 %v1051_v18 }
 0x21a   : > { %v2793_v25 = vpop.eup %2116  ;;  %v1145_v56 = vadd.f32 %v2791_v7, %v2789_v6 }
 0x21b   : > { %3096 = vst [vmem:[#allocation10_spill] sm:$0xff] %v2793_v25  ;;  %v2797_v31 = vpop.eup %2118 }
 0x21c   : > { %3097 = vst [vmem:[#allocation11_spill] sm:$0xff] %v2797_v31  ;;  %1146 = vadd.xlane.f32.xlu0 %v1145_v56  ;;  %v1148_v16 = vadd.f32 %v2797_v31, %v2793_v25 }
 0x21e   : > { %1149 = vadd.xlane.f32.xlu1 %v1148_v16 }
 0x220   : > { %v2801_v47 = vpop.eup %2120 }
 0x221   : > { %3098 = vst [vmem:[#allocation12_spill] sm:$0xff] %v2801_v47  ;;  %v2803_v10 = vpop.eup %2122 }
 0x222   : > { %3099 = vst [vmem:[#allocation13_spill] sm:$0xff] %v2803_v10  ;;  %v2805_v36 = vpop.eup %2124  ;;  %v1151_v18 = vadd.f32 %v2803_v10, %v2801_v47 }
 0x223   : > { %3100 = vst [vmem:[#allocation14_spill] sm:$0xff] %v2805_v36  ;;  %v2809_v50 = vpop.eup %2126 }
 0x224   : > { %3101 = vst [vmem:[#allocation15_spill] sm:$0xff] %v2809_v50  ;;  %1152 = vadd.xlane.f32.xlu0 %v1151_v18  ;;  %v1154_v63 = vadd.f32 %v2809_v50, %v2805_v36 }
 0x226   : > { %1155 = vadd.xlane.f32.xlu1 %v1154_v63 }
 0x259   : > { %v1087_v20 = vpop.xlane.xlu0 %1086 }
 0x25a   : > { %2128 = vrcp.f32 %v1087_v20 }
 0x25d   : > { %v1090_v12 = vpop.xlane.xlu1 %1089  ;;  %v871_v11 = vpop.xlane.xlu0 %870 }
 0x25e   : > { %2130 = vrcp.f32 %v1090_v12  ;;  %v941_v56 = vsub.f32 %v2527_v3, %v871_v11  ;;  %v942_v16 = vsub.f32 %v2529_v5, %v871_v11 }
 0x260   : > { %v1053_v6 = vmul.f32 1.442695, %v941_v56  ;;  %v1055_v25 = vmul.f32 1.442695, %v942_v16 }
 0x261   : > { %v1093_v31 = vpop.xlane.xlu0 %1092  ;;  %v874_v47 = vpop.xlane.xlu1 %873 }
 0x262   : > { %2132 = vpow2.f32 %v1053_v6  ;;  %v943_v18 = vsub.f32 %v2531_v9, %v874_v47  ;;  %v944_v10 = vsub.f32 %v2535_v15, %v874_v47 }
 0x263   : > { %2134 = vpow2.f32 %v1055_v25 }
 0x264   : > { %2136 = vrcp.f32 %v1093_v31  ;;  %v1057_v63 = vmul.f32 1.442695, %v943_v18  ;;  %v1059_v20 = vmul.f32 1.442695, %v944_v10  ;;  %v2129_v12 = vpop.eup %2128 }
 0x265   : > { %v1096_v36 = vpop.xlane.xlu1 %1095  ;;  %v877_v50 = vpop.xlane.xlu0 %876  ;;  %v1214_v15 = vmul.f32 %v2129_v12, %v2597_v34  ;;  %v1213_v31 = vmul.f32 %v2129_v12, %v2595_v44 }
 0x266   : > { %2138 = vpow2.f32 %v1057_v63  ;;  %v945_v3 = vsub.f32 %v2539_v21, %v877_v50  ;;  %v946_v5 = vsub.f32 %v2541_v23, %v877_v50 }
 0x267   : > { %2140 = vpow2.f32 %v1059_v20 }
 0x268   : > { %v2131_v11 = vpop.eup %2130  ;;  %2142 = vrcp.f32 %v1096_v36  ;;  %v1061_v6 = vmul.f32 1.442695, %v945_v3  ;;  %v1063_v56 = vmul.f32 1.442695, %v946_v5 }
 0x269   : > { %v1099_v9 = vpop.xlane.xlu0 %1098  ;;  %v880_v16 = vpop.xlane.xlu1 %879  ;;  %v1216_v25 = vmul.f32 %v2131_v11, %v2607_v35  ;;  %v1215_v47 = vmul.f32 %v2131_v11, %v2603_v28 }
 0x26a   : > { %2144 = vpow2.f32 %v1061_v6  ;;  %v947_v21 = vsub.f32 %v2543_v27, %v880_v16  ;;  %v948_v23 = vsub.f32 %v2547_v33, %v880_v16 }
 0x26b   : > { %2146 = vpow2.f32 %v1063_v56  ;;  %v1278_v10 = vpack.c.bf16 %v1216_v25, %v1214_v15  ;;  %v1277_v36 = vpack.c.bf16 %v1215_v47, %v1213_v31 }
 0x26c   : > { %v2825_v50 = vpop.eup %2132  ;;  %2148 = vrcp.f32 %v1099_v9  ;;  %v1065_v18 = vmul.f32 1.442695, %v947_v21  ;;  %v1067_v63 = vmul.f32 1.442695, %v948_v23 }
 0x26d   : > { %v2827_v34 = vpop.eup %2134  ;;  %1437 = vmatprep.mubr.bf16.mxu1 %v1278_v10  ;;  %v1102_v35 = vpop.xlane.xlu1 %1101 }
 0x26e   : > { %v883_v44 = vpop.xlane.xlu0 %882  ;;  %v2137_v20 = vpop.eup %2136  ;;  %2150 = vpow2.f32 %v1065_v18  ;;  %1438 = vmatmul.mubr.bf16.vlgmr.msra.gmra.mrb[0].mxu1 %v1277_v36  ;;  %v1157_v33 = vadd.f32 %v2827_v34, %v2825_v50 }
 0x26f   : > { %v949_v28 = vsub.f32 %v2551_v39, %v883_v44  ;;  %v950_v27 = vsub.f32 %v2553_v45, %v883_v44  ;;  %2152 = vpow2.f32 %v1067_v63  ;;  %v1218_v9 = vmul.f32 %v2137_v20, %v2616_v54 }
 0x270   : > { %v2833_v12 = vpop.eup %2138  ;;  %2154 = vrcp.f32 %v1102_v35  ;;  %1158 = vadd.xlane.f32.xlu0 %v1157_v33  ;;  %v1217_v31 = vmul.f32 %v2137_v20, %v2611_v43 }
 0x271   : > { %v1069_v3 = vmul.f32 1.442695, %v949_v28  ;;  %v1071_v5 = vmul.f32 1.442695, %v950_v27  ;;  %v2835_v11 = vpop.eup %2140  ;;  %v886_v56 = vpop.xlane.xlu1 %885 }
 0x272   : > { %v1105_v6 = vpop.xlane.xlu0 %1104  ;;  %v2143_v39 = vpop.eup %2142  ;;  %v951_v45 = vsub.f32 %v2555_v57, %v886_v56  ;;  %v952_v16 = vsub.f32 %v2559_v17, %v886_v56  ;;  %v1160_v15 = vadd.f32 %v2835_v11, %v2833_v12 }
 0x273   : > { %2156 = vpow2.f32 %v1069_v3  ;;  %v1220_v25 = vmul.f32 %v2143_v39, %v2629_v58  ;;  %v1219_v47 = vmul.f32 %v2143_v39, %v2622_v30 }
 0x274   : > { %2158 = vpow2.f32 %v1071_v5  ;;  %v2845_v21 = vpop.eup %2144  ;;  %v1073_v23 = vmul.f32 1.442695, %v951_v45  ;;  %v1075_v54 = vmul.f32 1.442695, %v952_v16  ;;  %1161 = vadd.xlane.f32.xlu1 %v1160_v15 }
 0x275   : > { %v2847_v10 = vpop.eup %2146  ;;  %2160 = vrcp.f32 %v1105_v6  ;;  %v1280_v57 = vpack.c.bf16 %v1220_v25, %v1218_v9  ;;  %v1108_v17 = vpop.xlane.xlu1 %1107  ;;  %v1279_v18 = vpack.c.bf16 %v1219_v47, %v1217_v31 }
 0x276   : > { %v889_v36 = vpop.xlane.xlu0 %888  ;;  %v2149_v63 = vpop.eup %2148  ;;  %2162 = vpow2.f32 %v1073_v23  ;;  %v1163_v30 = vadd.f32 %v2847_v10, %v2845_v21 }
 0x277   : > { %v953_v58 = vsub.f32 %v2563_v29, %v889_v36  ;;  %v954_v43 = vsub.f32 %v2565_v61, %v889_v36  ;;  %2164 = vpow2.f32 %v1075_v54  ;;  %1445 = vmatprep.mubr.bf16.mxu1 %v1280_v57  ;;  %v1222_v33 = vmul.f32 %v2149_v63, %v2638_v62 }
 0x278   : > { %v2853_v35 = vpop.eup %2150  ;;  %2166 = vrcp.f32 %v1108_v17  ;;  %1446 = vmatmul.mubr.bf16.gmra.mrb[4].mxu1 %v1279_v18  ;;  %1164 = vadd.xlane.f32.xlu0 %v1163_v30  ;;  %v1221_v9 = vmul.f32 %v2149_v63, %v2633_v49 }
 0x279   : > { %v1077_v44 = vmul.f32 1.442695, %v953_v58  ;;  %v1079_v20 = vmul.f32 1.442695, %v954_v43  ;;  %v2855_v28 = vpop.eup %2152  ;;  %v892_v27 = vpop.xlane.xlu1 %891 }
 0x27a   : > { %v2155_v29 = vpop.eup %2154  ;;  %v1111_v61 = vpop.xlane.xlu0 %1110  ;;  %v955_v3 = vsub.f32 %v2567_v55, %v892_v27  ;;  %v956_v5 = vsub.f32 %v2571_v51, %v892_v27  ;;  %v1166_v6 = vadd.f32 %v2855_v28, %v2853_v35 }
 0x27b   : > { %2168 = vpow2.f32 %v1077_v44  ;;  %v1224_v56 = vmul.f32 %v2155_v29, %v2648_v41  ;;  %v1223_v39 = vmul.f32 %v2155_v29, %v2641_v52 }
 0x27c   : > { %2170 = vpow2.f32 %v1079_v20  ;;  %v1081_v62 = vmul.f32 1.442695, %v955_v3  ;;  %v1083_v16 = vmul.f32 1.442695, %v956_v5  ;;  %1167 = vadd.xlane.f32.xlu1 %v1166_v6 }
 0x27d   : > { %v2865_v45 = vpop.eup %2156  ;;  %2172 = vrcp.f32 %v1111_v61  ;;  %v1282_v55 = vpack.c.bf16 %v1224_v56, %v1222_v33  ;;  %v1114_v51 = vpop.xlane.xlu1 %1113  ;;  %v1281_v25 = vpack.c.bf16 %v1223_v39, %v1221_v9 }
 0x27e   : > { %v2867_v15 = vpop.eup %2158  ;;  %2174 = vpow2.f32 %v1081_v62 }
 0x27f   : > { %v1169_v31 = vadd.f32 %v2867_v15, %v2865_v45  ;;  %v2161_v41 = vpop.eup %2160  ;;  %2176 = vpow2.f32 %v1083_v16  ;;  %1453 = vmatprep.mubr.bf16.mxu1 %v1282_v55 }
 0x280   : > { %v2871_v49 = vpop.eup %2162  ;;  %2178 = vrcp.f32 %v1114_v51  ;;  %1454 = vmatmul.mubr.bf16.gmra.mrb[8].mxu1 %v1281_v25  ;;  %v1226_v57 = vmul.f32 %v2161_v41, %v2664_v48  ;;  %v1225_v36 = vmul.f32 %v2161_v41, %v2659_v2 }
 0x281   : > { %1170 = vadd.xlane.f32.xlu0 %v1169_v31  ;;  %v2873_v52 = vpop.eup %2164  ;;  %v1117_v47 = vpop.xlane.xlu0 %1116 }
 0x282   : > { %v2167_v23 = vpop.eup %2166  ;;  %v1172_v54 = vadd.f32 %v2873_v52, %v2871_v49  ;;  %2180 = vrcp.f32 %v1117_v47 }
 0x283   : > { %v1228_v17 = vmul.f32 %v2167_v23, %v2673_v40  ;;  %v1227_v18 = vmul.f32 %v2167_v23, %v2666_v60 }
 0x284   : > { %1173 = vadd.xlane.f32.xlu1 %v1172_v54  ;;  %v1120_v58 = vpop.xlane.xlu1 %1119 }
 0x285   : > { %v2881_v63 = vpop.eup %2168  ;;  %2182 = vrcp.f32 %v1120_v58  ;;  %v1284_v30 = vpack.c.bf16 %v1228_v17, %v1226_v57  ;;  %v1283_v44 = vpack.c.bf16 %v1227_v18, %v1225_v36  ;;  %v3102_v58 = vld [vmem:[#allocation4_spill] sm:$0xff] }
 0x286   : > { %v2883_v43 = vpop.eup %2170 }
 0x287   : > { %v1175_v20 = vadd.f32 %v2883_v43, %v2881_v63  ;;  %v2173_v48 = vpop.eup %2172  ;;  %1461 = vmatprep.mubr.bf16.mxu1 %v1284_v30 }
 0x288   : > { %v2887_v27 = vpop.eup %2174  ;;  %1462 = vmatmul.mubr.bf16.gmra.mrb[12].mxu1 %v1283_v44  ;;  %v1230_v29 = vmul.f32 %v2173_v48, %v2690_v26  ;;  %v1229_v3 = vmul.f32 %v2173_v48, %v2685_v8  ;;  %v3103_v44 = vld [vmem:[#allocation3_spill] sm:$0xff]  ;;  %v3104_v48 = vld [vmem:[#allocation2_spill] sm:$0xff] }
 0x289   : > { %1176 = vadd.xlane.f32.xlu0 %v1175_v20  ;;  %v2889_v2 = vpop.eup %2176  ;;  %v1123_v60 = vpop.xlane.xlu0 %1122 }
 0x28a   : > { %v2179_v40 = vpop.eup %2178  ;;  %v1178_v33 = vadd.f32 %v2889_v2, %v2887_v27  ;;  %2184 = vrcp.f32 %v1123_v60 }
 0x28b   : > { %v1232_v61 = vmul.f32 %v2179_v40, %v2699_v53  ;;  %v1231_v5 = vmul.f32 %v2179_v40, %v2692_v4 }
 0x28c   : > { %1179 = vadd.xlane.f32.xlu1 %v1178_v33  ;;  %v1126_v6 = vpop.xlane.xlu1 %1125  ;;  %v2181_v56 = vpop.eup %2180 }
 0x28d   : > { %2186 = vrcp.f32 %v1126_v6  ;;  %v1286_v9 = vpack.c.bf16 %v1232_v61, %v1230_v29  ;;  %v1285_v39 = vpack.c.bf16 %v1231_v5, %v1229_v3  ;;  %v1234_v16 = vmul.f32 %v2181_v56, %v2711_v14  ;;  %v3105_v29 = vld [vmem:[#allocation6_spill] sm:$0xff]  ;;  %v3106_v3 = vld [vmem:[#allocation8_spill] sm:$0xff] }
 0x28e   : > { %v1233_v4 = vmul.f32 %v2181_v56, %v2709_v0  ;;  %v3107_v56 = vld [vmem:[#allocation7_spill] sm:$0xff] }
 0x28f   : > { %v2183_v62 = vpop.eup %2182  ;;  %1469 = vmatprep.mubr.bf16.mxu1 %v1286_v9 }
 0x290   : > { %1470 = vmatmul.mubr.bf16.gmra.mrb[16].mxu1 %v1285_v39  ;;  %v1236_v26 = vmul.f32 %v2183_v62, %v2719_v59  ;;  %v1235_v53 = vmul.f32 %v2183_v62, %v2713_v1  ;;  %v3108_v62 = vld [vmem:[#allocation5_spill] sm:$0xff] }
 0x291   : > { %v1129_v55 = vpop.xlane.xlu0 %1128 }
 0x292   : > { %v1288_v51 = vpack.c.bf16 %v1236_v26, %v1234_v16  ;;  %2188 = vrcp.f32 %v1129_v55  ;;  %v1287_v31 = vpack.c.bf16 %v1235_v53, %v1233_v4 }
 0x294   : > { %1477 = vmatprep.mubr.bf16.mxu1 %v1288_v51  ;;  %v1132_v8 = vpop.xlane.xlu1 %1131  ;;  %v2185_v25 = vpop.eup %2184 }
 0x295   : > { %2190 = vrcp.f32 %v1132_v8  ;;  %v1238_v47 = vmul.f32 %v2185_v25, %v2727_v42  ;;  %v1237_v57 = vmul.f32 %v2185_v25, %v2725_v19 }
 0x297   : > { %v2187_v41 = vpop.eup %2186 }
 0x298   : > { %1478 = vmatmul.mubr.bf16.gmra.mrb[20].mxu1 %v1287_v31  ;;  %v1240_v14 = vmul.f32 %v2187_v41, %v2735_v13  ;;  %v1239_v54 = vmul.f32 %v2187_v41, %v2729_v37 }
 0x299   : > { %v1135_v23 = vpop.xlane.xlu0 %1134 }
 0x29a   : > { %v1290_v59 = vpack.c.bf16 %v1240_v14, %v1238_v47  ;;  %2192 = vrcp.f32 %v1135_v23  ;;  %v1289_v0 = vpack.c.bf16 %v1239_v54, %v1237_v57 }
 0x29c   : > { %1485 = vmatprep.mubr.bf16.mxu1 %v1290_v59  ;;  %v1138_v1 = vpop.xlane.xlu1 %1137  ;;  %v2189_v17 = vpop.eup %2188 }
 0x29d   : > { %2194 = vrcp.f32 %v1138_v1  ;;  %v1242_v18 = vmul.f32 %v2189_v17, %v2743_v38  ;;  %v1241_v60 = vmul.f32 %v2189_v17, %v3104_v48  ;;  %v3109_v1 = vld [vmem:[#allocation11_spill] sm:$0xff] }
 0x29f   : > { %v2191_v36 = vpop.eup %2190 }
 0x2a0   : > { %1486 = vmatmul.mubr.bf16.gmra.mrb[24].mxu1 %v1289_v0  ;;  %v1244_v42 = vmul.f32 %v2191_v36, %v3102_v58  ;;  %v1243_v20 = vmul.f32 %v2191_v36, %v3103_v44  ;;  %v3111_v36 = vld [vmem:[#allocation9_spill] sm:$0xff] }
 0x2a1   : > { %v1141_v30 = vpop.xlane.xlu0 %1140 }
 0x2a2   : > { %v1292_v13 = vpack.c.bf16 %v1244_v42, %v1242_v18  ;;  %2196 = vrcp.f32 %v1141_v30  ;;  %v1291_v19 = vpack.c.bf16 %v1243_v20, %v1241_v60  ;;  %v3112_v42 = vld [vmem:[#allocation13_spill] sm:$0xff]  ;;  %v3114_v20 = vld [vmem:[#allocation14_spill] sm:$0xff] }
 0x2a4   : > { %1493 = vmatprep.mubr.bf16.mxu1 %v1292_v13  ;;  %v1144_v37 = vpop.xlane.xlu1 %1143  ;;  %v2193_v40 = vpop.eup %2192  ;;  %v3113_v13 = vld [vmem:[#allocation15_spill] sm:$0xff] }
 0x2a5   : > { %2198 = vrcp.f32 %v1144_v37  ;;  %v1246_v61 = vmul.f32 %v2193_v40, %v3105_v29  ;;  %v1245_v16 = vmul.f32 %v2193_v40, %v3108_v62  ;;  %v3115_v37 = vld [vmem:[#allocation12_spill] sm:$0xff] }
 0x2a7   : > { %v2195_v33 = vpop.eup %2194 }
 0x2a8   : > { %1494 = vmatmul.mubr.bf16.gmra.mrb[28].mxu1 %v1291_v19  ;;  %v1248_v38 = vmul.f32 %v2195_v33, %v3106_v3  ;;  %v1247_v9 = vmul.f32 %v2195_v33, %v3107_v56 }
 0x2a9   : > { %v1147_v5 = vpop.xlane.xlu0 %1146 }
 0x2aa   : > { %2200 = vrcp.f32 %v1147_v5  ;;  %v1294_v6 = vpack.c.bf16 %v1248_v38, %v1246_v61  ;;  %v1293_v55 = vpack.c.bf16 %v1247_v9, %v1245_v16 }
 0x2ab   : > { %v1150_v39 = vpop.xlane.xlu1 %1149 }
 0x2ac   : > { %1501 = vmatprep.mubr.bf16.mxu1 %v1294_v6  ;;  %2202 = vrcp.f32 %v1150_v39  ;;  %v2197_v26 = vpop.eup %2196 }
 0x2ad   : > { %v1250_v53 = vmul.f32 %v2197_v26, %v2775_v22  ;;  %v1249_v14 = vmul.f32 %v2197_v26, %v2773_v32 }
 0x2af   : > { %v2199_v51 = vpop.eup %2198 }
 0x2b0   : > { %1502 = vmatmul.mubr.bf16.gmra.mrb[32].mxu1 %v1293_v55  ;;  %v1252_v8 = vmul.f32 %v2199_v51, %v2783_v24  ;;  %v1251_v31 = vmul.f32 %v2199_v51, %v2777_v46  ;;  %v3110_v24 = vld [vmem:[#allocation10_spill] sm:$0xff] }
 0x2b1   : > { %v1153_v4 = vpop.xlane.xlu0 %1152 }
 0x2b2   : > { %2204 = vrcp.f32 %v1153_v4  ;;  %v1296_v25 = vpack.c.bf16 %v1252_v8, %v1250_v53  ;;  %v1295_v59 = vpack.c.bf16 %v1251_v31, %v1249_v14 }
 0x2b3   : > { %v1156_v41 = vpop.xlane.xlu1 %1155 }
 0x2b4   : > { %v2201_v47 = vpop.eup %2200  ;;  %1509 = vmatprep.mubr.bf16.mxu1 %v1296_v25  ;;  %2206 = vrcp.f32 %v1156_v41 }
 0x2b5   : > { %v1254_v54 = vmul.f32 %v2201_v47, %v2791_v7  ;;  %v1253_v46 = vmul.f32 %v2201_v47, %v3111_v36 }
 0x2b6   : > { %v2203_v23 = vpop.eup %2202 }
 0x2b7   : > { %v1256_v57 = vmul.f32 %v2203_v23, %v3109_v1  ;;  %v1255_v17 = vmul.f32 %v2203_v23, %v3110_v24 }
 0x2b8   : > { %1510 = vmatmul.mubr.bf16.gmra.mrb[36].mxu1 %v1295_v59 }
 0x2b9   : > { %v1298_v22 = vpack.c.bf16 %v1256_v57, %v1254_v54  ;;  %v1297_v58 = vpack.c.bf16 %v1255_v17, %v1253_v46 }
 0x2bb   : > { %1517 = vmatprep.mubr.bf16.mxu1 %v1298_v22 }
 0x2bc   : > { %v2205_v0 = vpop.eup %2204 }
 0x2bd   : > { %v1258_v30 = vmul.f32 %v2205_v0, %v3112_v42  ;;  %v1257_v48 = vmul.f32 %v2205_v0, %v3115_v37 }
 0x2be   : > { %v2207_v18 = vpop.eup %2206 }
 0x2bf   : > { %v1260_v32 = vmul.f32 %v2207_v18, %v3113_v13  ;;  %v1259_v7 = vmul.f32 %v2207_v18, %v3114_v20 }
 0x2c0   : > { %1518 = vmatmul.mubr.bf16.gmra.mrb[40].mxu1 %v1297_v58 }
 0x2c1   : > { %v1300_v44 = vpack.c.bf16 %v1260_v32, %v1258_v30  ;;  %v1299_v60 = vpack.c.bf16 %v1259_v7, %v1257_v48 }
 0x2c3   : > { %1525 = vmatprep.mubr.bf16.mxu1 %v1300_v44 }
 0x2c8   : > { %1526 = vmatmul.mubr.bf16.gmra.mrb[44].mxu1 %v1299_v60 }
 0x2fd   : > { %v1159_v40 = vpop.xlane.xlu0 %1158 }
 0x2fe   : > { %2208 = vrcp.f32 %v1159_v40 }
 0x301   : > { %v1162_v19 = vpop.xlane.xlu1 %1161 }
 0x302   : > { %2210 = vrcp.f32 %v1162_v19 }
 0x305   : > { %v1165_v33 = vpop.xlane.xlu0 %1164 }
 0x306   : > { %2212 = vrcp.f32 %v1165_v33 }
 0x308   : > { %v2209_v61 = vpop.eup %2208 }
 0x309   : > { %v1168_v29 = vpop.xlane.xlu1 %1167  ;;  %v1262_v5 = vmul.f32 %v2209_v61, %v2827_v34  ;;  %v1261_v56 = vmul.f32 %v2209_v61, %v2825_v50 }
 0x30a   : > { %2214 = vrcp.f32 %v1168_v29 }
 0x30c   : > { %v2211_v3 = vpop.eup %2210 }
 0x30d   : > { %v1264_v6 = vmul.f32 %v2211_v3, %v2835_v11  ;;  %v1263_v9 = vmul.f32 %v2211_v3, %v2833_v12 }
 0x30e   : > { %v1171_v38 = vpop.xlane.xlu0 %1170 }
 0x30f   : > { %v1302_v39 = vpack.c.bf16 %v1264_v6, %v1262_v5  ;;  %v1301_v62 = vpack.c.bf16 %v1263_v9, %v1261_v56  ;;  %2216 = vrcp.f32 %v1171_v38 }
 0x310   : > { %v2213_v26 = vpop.eup %2212 }
 0x311   : > { %1533 = vmatprep.mubr.bf16.mxu1 %v1302_v39  ;;  %v1174_v16 = vpop.xlane.xlu1 %1173  ;;  %v1266_v53 = vmul.f32 %v2213_v26, %v2847_v10  ;;  %v1265_v11 = vmul.f32 %v2213_v26, %v2845_v21 }
 0x312   : > { %2218 = vrcp.f32 %v1174_v16  ;;  %1534 = vmatmul.mubr.bf16.gmra.mrb[48].mxu1 %v1301_v62 }
 0x314   : > { %v2215_v55 = vpop.eup %2214 }
 0x315   : > { %v1268_v34 = vmul.f32 %v2215_v55, %v2855_v28  ;;  %v1267_v50 = vmul.f32 %v2215_v55, %v2853_v35 }
 0x316   : > { %v1177_v51 = vpop.xlane.xlu0 %1176 }
 0x317   : > { %v1304_v8 = vpack.c.bf16 %v1268_v34, %v1266_v53  ;;  %v1303_v12 = vpack.c.bf16 %v1267_v50, %v1265_v11  ;;  %2220 = vrcp.f32 %v1177_v51 }
 0x319   : > { %1541 = vmatprep.mubr.bf16.mxu1 %v1304_v8  ;;  %v1180_v4 = vpop.xlane.xlu1 %1179  ;;  %v2217_v25 = vpop.eup %2216 }
 0x31a   : > { %2222 = vrcp.f32 %v1180_v4  ;;  %1542 = vmatmul.mubr.bf16.gmra.mrb[52].mxu1 %v1303_v12  ;;  %v1270_v41 = vmul.f32 %v2217_v25, %v2867_v15  ;;  %v1269_v10 = vmul.f32 %v2217_v25, %v2865_v45 }
 0x31c   : > { %v2219_v31 = vpop.eup %2218 }
 0x31d   : > { %v1272_v47 = vmul.f32 %v2219_v31, %v2873_v52  ;;  %v1271_v21 = vmul.f32 %v2219_v31, %v2871_v49 }
 0x31f   : > { %v1306_v28 = vpack.c.bf16 %v1272_v47, %v1270_v41  ;;  %v1305_v35 = vpack.c.bf16 %v1271_v21, %v1269_v10 }
 0x321   : > { %1549 = vmatprep.mubr.bf16.mxu1 %v1306_v28  ;;  %v2221_v14 = vpop.eup %2220 }
 0x322   : > { %1550 = vmatmul.mubr.bf16.gmra.mrb[56].mxu1 %v1305_v35  ;;  %v1274_v59 = vmul.f32 %v2221_v14, %v2883_v43  ;;  %v1273_v1 = vmul.f32 %v2221_v14, %v2881_v63 }
 0x324   : > { %v2223_v23 = vpop.eup %2222 }
 0x325   : > { %v1276_v54 = vmul.f32 %v2223_v23, %v2889_v2  ;;  %v1275_v15 = vmul.f32 %v2223_v23, %v2887_v27 }
 0x327   : > { %v1308_v52 = vpack.c.bf16 %v1276_v54, %v1274_v59  ;;  %v1307_v57 = vpack.c.bf16 %v1275_v15, %v1273_v1 }
 0x329   : > { %1557 = vmatprep.mubr.bf16.mxu1 %v1308_v52 }
 0x32a   : > { %1558 = vmatmul.mubr.bf16.gmra.mrb[60].mxu1 %v1307_v57 }
 0x341   : > { %v1856_v45 = vpop.f32.mrb[0].mxu1 }
 0x342   : > { %v1857_v49 = vpop.f32.mrb[1].mxu1 }
 0x343   : > { %v1858_v43 = vadd.f32 %v1857_v49, %v1856_v45  ;;  %v1859_v63 = vpop.f32.mrb[2].mxu1 }
 0x344   : > { %v1860_v2 = vpop.f32.mrb[3].mxu1 }
 0x345   : > { %1566 = vst.msk [vmem:[%s2945_s29] sm:$0xff] %vm507_vm0, %v1858_v43  ;;  %v1861_v27 = vadd.f32 %v1860_v2, %v1859_v63 }
 0x347   : > { %1567 = vst.msk [vmem:[%s2945_s29 + $0x8] sm:$0xff] %vm507_vm0, %v1861_v27 }
 0x34b   : > { %v1862_v22 = vpop.f32.mrb[4].mxu1 }
 0x34c   : > { %v1863_v24 = vpop.f32.mrb[5].mxu1 }
 0x34d   : > { %v1864_v17 = vadd.f32 %v1863_v24, %v1862_v22  ;;  %v1865_v0 = vpop.f32.mrb[6].mxu1 }
 0x34e   : > { %v1866_v36 = vpop.f32.mrb[7].mxu1 }
 0x34f   : > { %1568 = vst.msk [vmem:[%s2945_s29 + $0x10] sm:$0xff] %vm507_vm0, %v1864_v17  ;;  %v1867_v46 = vadd.f32 %v1866_v36, %v1865_v0 }
 0x351   : > { %1569 = vst.msk [vmem:[%s2945_s29 + $0x18] sm:$0xff] %vm507_vm0, %v1867_v46 }
 0x353   : > { %v1868_v18 = vpop.f32.mrb[8].mxu1 }
 0x354   : > { %v1869_v58 = vpop.f32.mrb[9].mxu1 }
 0x355   : > { %v1870_v42 = vadd.f32 %v1869_v58, %v1868_v18  ;;  %v1871_v30 = vpop.f32.mrb[10].mxu1 }
 0x356   : > { %v1872_v13 = vpop.f32.mrb[11].mxu1 }
 0x357   : > { %1570 = vst.msk [vmem:[%s2945_s29 + $0x20] sm:$0xff] %vm507_vm0, %v1870_v42  ;;  %v1873_v32 = vadd.f32 %v1872_v13, %v1871_v30 }
 0x359   : > { %1571 = vst.msk [vmem:[%s2945_s29 + $0x28] sm:$0xff] %vm507_vm0, %v1873_v32 }
 0x35b   : > { %v1874_v44 = vpop.f32.mrb[12].mxu1 }
 0x35c   : > { %v1875_v20 = vpop.f32.mrb[13].mxu1 }
 0x35d   : > { %v1876_v7 = vadd.f32 %v1875_v20, %v1874_v44  ;;  %v1877_v37 = vpop.f32.mrb[14].mxu1 }
 0x35e   : > { %v1878_v48 = vpop.f32.mrb[15].mxu1 }
 0x35f   : > { %1572 = vst.msk [vmem:[%s2945_s29 + $0x30] sm:$0xff] %vm507_vm0, %v1876_v7  ;;  %v1879_v60 = vadd.f32 %v1878_v48, %v1877_v37 }
 0x361   : > { %1573 = vst.msk [vmem:[%s2945_s29 + $0x38] sm:$0xff] %vm507_vm0, %v1879_v60 }
 0x363   : > { %v1880_v40 = vpop.f32.mrb[16].mxu1 }
 0x364   : > { %v1881_v19 = vpop.f32.mrb[17].mxu1 }
 0x365   : > { %v1882_v33 = vadd.f32 %v1881_v19, %v1880_v40  ;;  %v1883_v29 = vpop.f32.mrb[18].mxu1 }
 0x366   : > { %v1884_v61 = vpop.f32.mrb[19].mxu1 }
 0x367   : > { %1574 = vst.msk [vmem:[%s2945_s29 + $0x40] sm:$0xff] %vm507_vm0, %v1882_v33  ;;  %v1885_v3 = vadd.f32 %v1884_v61, %v1883_v29 }
 0x369   : > { %1575 = vst.msk [vmem:[%s2945_s29 + $0x48] sm:$0xff] %vm507_vm0, %v1885_v3 }
 0x36b   : > { %v1886_v38 = vpop.f32.mrb[20].mxu1 }
 0x36c   : > { %v1887_v5 = vpop.f32.mrb[21].mxu1 }
 0x36d   : > { %v1888_v6 = vadd.f32 %v1887_v5, %v1886_v38  ;;  %v1889_v56 = vpop.f32.mrb[22].mxu1 }
 0x36e   : > { %v1890_v9 = vpop.f32.mrb[23].mxu1 }
 0x36f   : > { %1576 = vst.msk [vmem:[%s2945_s29 + $0x50] sm:$0xff] %vm507_vm0, %v1888_v6  ;;  %v1891_v39 = vadd.f32 %v1890_v9, %v1889_v56 }
 0x371   : > { %1577 = vst.msk [vmem:[%s2945_s29 + $0x58] sm:$0xff] %vm507_vm0, %v1891_v39 }
 0x373   : > { %v1892_v62 = vpop.f32.mrb[24].mxu1 }
 0x374   : > { %v1893_v16 = vpop.f32.mrb[25].mxu1 }
 0x375   : > { %v1894_v26 = vadd.f32 %v1893_v16, %v1892_v62  ;;  %v1895_v55 = vpop.f32.mrb[26].mxu1 }
 0x376   : > { %v1896_v51 = vpop.f32.mrb[27].mxu1 }
 0x377   : > { %1578 = vst.msk [vmem:[%s2945_s29 + $0x60] sm:$0xff] %vm507_vm0, %v1894_v26  ;;  %v1897_v53 = vadd.f32 %v1896_v51, %v1895_v55 }
 0x379   : > { %1579 = vst.msk [vmem:[%s2945_s29 + $0x68] sm:$0xff] %vm507_vm0, %v1897_v53 }
 0x37b   : > { %v1898_v34 = vpop.f32.mrb[28].mxu1 }
 0x37c   : > { %v1899_v11 = vpop.f32.mrb[29].mxu1 }
 0x37d   : > { %v1900_v50 = vadd.f32 %v1899_v11, %v1898_v34  ;;  %v1901_v8 = vpop.f32.mrb[30].mxu1 }
 0x37e   : > { %v1902_v12 = vpop.f32.mrb[31].mxu1 }
 0x37f   : > { %1580 = vst.msk [vmem:[%s2945_s29 + $0x70] sm:$0xff] %vm507_vm0, %v1900_v50  ;;  %v1903_v4 = vadd.f32 %v1902_v12, %v1901_v8 }
 0x381   : > { %1581 = vst.msk [vmem:[%s2945_s29 + $0x78] sm:$0xff] %vm507_vm0, %v1903_v4 }
 0x383   : > { %v1904_v25 = vpop.f32.mrb[32].mxu1 }
 0x384   : > { %v1905_v31 = vpop.f32.mrb[33].mxu1 }
 0x385   : > { %v1906_v41 = vadd.f32 %v1905_v31, %v1904_v25  ;;  %v1907_v47 = vpop.f32.mrb[34].mxu1 }
 0x386   : > { %v1908_v10 = vpop.f32.mrb[35].mxu1 }
 0x387   : > { %1582 = vst.msk [vmem:[%s2945_s29 + $0x80] sm:$0xff] %vm507_vm0, %v1906_v41  ;;  %v1909_v21 = vadd.f32 %v1908_v10, %v1907_v47 }
 0x389   : > { %1583 = vst.msk [vmem:[%s2945_s29 + $0x88] sm:$0xff] %vm507_vm0, %v1909_v21 }
 0x38b   : > { %v1910_v28 = vpop.f32.mrb[36].mxu1 }
 0x38c   : > { %v1911_v35 = vpop.f32.mrb[37].mxu1 }
 0x38d   : > { %v1912_v14 = vadd.f32 %v1911_v35, %v1910_v28  ;;  %v1913_v23 = vpop.f32.mrb[38].mxu1 }
 0x38e   : > { %v1914_v59 = vpop.f32.mrb[39].mxu1 }
 0x38f   : > { %1584 = vst.msk [vmem:[%s2945_s29 + $0x90] sm:$0xff] %vm507_vm0, %v1912_v14  ;;  %v1915_v54 = vadd.f32 %v1914_v59, %v1913_v23 }
 0x391   : > { %1585 = vst.msk [vmem:[%s2945_s29 + $0x98] sm:$0xff] %vm507_vm0, %v1915_v54 }
 0x393   : > { %v1916_v1 = vpop.f32.mrb[40].mxu1 }
 0x394   : > { %v1917_v15 = vpop.f32.mrb[41].mxu1 }
 0x395   : > { %v1918_v52 = vadd.f32 %v1917_v15, %v1916_v1  ;;  %v1919_v57 = vpop.f32.mrb[42].mxu1 }
 0x396   : > { %v1920_v45 = vpop.f32.mrb[43].mxu1 }
 0x397   : > { %1586 = vst.msk [vmem:[%s2945_s29 + $0xa0] sm:$0xff] %vm507_vm0, %v1918_v52  ;;  %v1921_v49 = vadd.f32 %v1920_v45, %v1919_v57 }
 0x399   : > { %1587 = vst.msk [vmem:[%s2945_s29 + $0xa8] sm:$0xff] %vm507_vm0, %v1921_v49 }
 0x39b   : > { %v1922_v43 = vpop.f32.mrb[44].mxu1 }
 0x39c   : > { %v1923_v63 = vpop.f32.mrb[45].mxu1 }
 0x39d   : > { %v1924_v2 = vadd.f32 %v1923_v63, %v1922_v43  ;;  %v1925_v27 = vpop.f32.mrb[46].mxu1 }
 0x39e   : > { %v1926_v22 = vpop.f32.mrb[47].mxu1 }
 0x39f   : > { %1588 = vst.msk [vmem:[%s2945_s29 + $0xb0] sm:$0xff] %vm507_vm0, %v1924_v2  ;;  %v1927_v24 = vadd.f32 %v1926_v22, %v1925_v27 }
 0x3a1   : > { %1589 = vst.msk [vmem:[%s2945_s29 + $0xb8] sm:$0xff] %vm507_vm0, %v1927_v24 }
 0x3e5   : > { %v1928_v17 = vpop.f32.mrb[48].mxu1 }
 0x3e6   : > { %v1929_v0 = vpop.f32.mrb[49].mxu1 }
 0x3e7   : > { %v1930_v36 = vadd.f32 %v1929_v0, %v1928_v17  ;;  %v1931_v46 = vpop.f32.mrb[50].mxu1 }
 0x3e8   : > { %v1932_v18 = vpop.f32.mrb[51].mxu1 }
 0x3e9   : > { %1590 = vst.msk [vmem:[%s2945_s29 + $0xc0] sm:$0xff] %vm507_vm0, %v1930_v36  ;;  %v1933_v58 = vadd.f32 %v1932_v18, %v1931_v46 }
 0x3eb   : > { %1591 = vst.msk [vmem:[%s2945_s29 + $0xc8] sm:$0xff] %vm507_vm0, %v1933_v58 }
 0x3ed   : > { %v1934_v42 = vpop.f32.mrb[52].mxu1 }
 0x3ee   : > { %v1935_v30 = vpop.f32.mrb[53].mxu1 }
 0x3ef   : > { %v1936_v13 = vadd.f32 %v1935_v30, %v1934_v42  ;;  %v1937_v32 = vpop.f32.mrb[54].mxu1 }
 0x3f0   : > { %v1938_v44 = vpop.f32.mrb[55].mxu1 }
 0x3f1   : > { %1592 = vst.msk [vmem:[%s2945_s29 + $0xd0] sm:$0xff] %vm507_vm0, %v1936_v13  ;;  %v1939_v20 = vadd.f32 %v1938_v44, %v1937_v32 }
 0x3f3   : > { %1593 = vst.msk [vmem:[%s2945_s29 + $0xd8] sm:$0xff] %vm507_vm0, %v1939_v20 }
 0x3f5   : > { %v1940_v7 = vpop.f32.mrb[56].mxu1 }
 0x3f6   : > { %v1941_v37 = vpop.f32.mrb[57].mxu1 }
 0x3f7   : > { %v1942_v48 = vadd.f32 %v1941_v37, %v1940_v7  ;;  %v1943_v60 = vpop.f32.mrb[58].mxu1 }
 0x3f8   : > { %v1944_v40 = vpop.f32.mrb[59].mxu1 }
 0x3f9   : > { %1594 = vst.msk [vmem:[%s2945_s29 + $0xe0] sm:$0xff] %vm507_vm0, %v1942_v48  ;;  %v1945_v19 = vadd.f32 %v1944_v40, %v1943_v60 }
 0x3fb   : > { %1595 = vst.msk [vmem:[%s2945_s29 + $0xe8] sm:$0xff] %vm507_vm0, %v1945_v19 }
 0x3fd   : > { %v1946_v33 = vpop.f32.mrb[60].mxu1 }
 0x3fe   : > { %v1947_v29 = vpop.f32.mrb[61].mxu1 }
 0x3ff   : > { %v1948_v61 = vadd.f32 %v1947_v29, %v1946_v33  ;;  %v1949_v3 = vpop.f32.mrb[62].mxu1 }
 0x400   : > { %v1950_v38 = vpop.f32.mrb[63].mxu1 }
 0x401   : > { %1596 = vst.msk [vmem:[%s2945_s29 + $0xf0] sm:$0xff] %vm507_vm0, %v1948_v61  ;;  %v1951_v5 = vadd.f32 %v1950_v38, %v1949_v3 }
 0x403   : > { %1597 = vst.msk [vmem:[%s2945_s29 + $0xf8] sm:$0xff] %vm507_vm0, %v1951_v5 }
 0x404 PF: > { %s13_s14 = sadd.s32 1, %s2246_s14   ;;  %s3116_s12 = smov %s2242_s13 }
 0x405   : > { %p10_p5 = scmp.ge.s32.totalorder %s13_s14, 4   ;;  %s3117_s13 = smov %s3119_s15 }
 0x407   :  { %12 = sbr.rel (!%p10_p5) target bundleno = 2 (0x2), region = 68 }

// kernel: sanet_forward.9
= control target key start
LH: loop header
LB: loop body
LE: loop exit
PB: predicated region body
PF: predicated region fallthrough
CT: control target
= control target key end

     0   :  { %9 = vsyncpa [#allocation3], 0  ;;  %s1260_s0 = inlined_call_operand.vmem [shape: f32[512,64], index: 0, kind: input, shape index: {}]   ;;  %s1261_s1 = inlined_call_operand.vmem [shape: bf16[64,64], index: 1, kind: input, shape index: {}]   ;;  %s1262_s2 = inlined_call_operand.vmem [shape: f32[1,64], index: 2, kind: input, shape index: {}]   ;;  %s1263_s3 = inlined_call_operand.vmem [shape: f32[512,64], index: 3, kind: input, shape index: {}]   ;;  %s1264_s4 = inlined_call_operand.hbm [shape: f32[512,64], index: 4, kind: output, shape index: {}]  }
   0x1   :  { %11 = vsyncpa [#allocation3 + $0x1], 0  ;;  %s944_s15 = smov 0   ;;  %s946_s16 = smov 0  }
   0x2   :  { %s948_s17 = smov 0   ;;  %s950_s18 = smov 0  }
   0x3 LB: > { %s965_s19 = sadd.s32 4294967295, %s914_s18   ;;  %s703_s20 = sadd.s32 4294967294, %s914_s18   ;;  %s914_s18 = sphi %s950_s18, %s1270_s18   ;;  %s910_s17 = sphi %s948_s17, %s1269_s17   ;;  %s906_s16 = sphi %s946_s16, %s1268_s16   ;;  %s902_s15 = sphi %s944_s15, %s1267_s15  }
   0x4   : > { %s969_s21 = sadd.s32 1, %s914_s18   ;;  %s118_s22 = sadd.s32 1, %s910_s17 }
   0x5   : > { %s115_s23 = ssub.s32 %s914_s18, %s969_s21  ;;  %p128_p0 = scmp.ne.s32.totalorder %s910_s17, %s906_s16 }
   0x6   : > { %p116_p1 = scmp.eq.s32.totalorder %s115_s23, 0  ;;  %p129_p2 = scmp.eq.s32.totalorder %s965_s19, 1 }
   0x7   : > { %p134_p3 = scmp.ne.s32.totalorder %s906_s16, %s902_s15  ;;  %p135_p4 = scmp.eq.s32.totalorder %s703_s20, 1 }
   0x8   : > { %s980_s24 = scalar_select %p116_p1, %s910_s17, %s118_s22  }
   0x9   : > { %p982_p5 = por %p129_p2, %p128_p0  ;;  %p986_p6 = por %p135_p4, %p134_p3 }
   0xa   : > { %p706_p7 = scmp.ge.s32.totalorder %s914_s18, 1  ;;  %p177_p8 = scmp.lt.s32.totalorder %s914_s18, 3 }
   0xc   : > { %p178_p9 = pnand %p706_p7, %p177_p8 }
   0xd   : > { %v848_v0 = vld [vmem:[%s1261_s1] sm:$0xff] (!%p178_p9)   ;;  %s708_s29 = sshll.u32 (!%p178_p9), %s965_s19, 5  ;;  %v849_v1 = vld [vmem:[%s1261_s1 + $0x8] sm:$0xff] (!%p178_p9)   ;;  %v850_v2 = vld [vmem:[%s1261_s1 + $0x10] sm:$0xff] (!%p178_p9)   ;;  %vm309_vm0 = vcmask (!%p178_p9), 523264   ;;  %s205_s14 = sand.u32 (!%p178_p9), 1, %s906_s16  }
   0xe   : > { %181 = sbr.rel (%p178_p9) target bundleno = 289 (0x121), region = 36  ;;  %p209_p10 = scmp.lt.s32.totalorder (!%p178_p9), %s708_s29, 63  ;;  %759 = vmatprep.subr.bf16.mxu0 (!%p178_p9), %v848_v0  ;;  %799 = vmatprep.subr.bf16.mxu1 (!%p178_p9), %v848_v0  ;;  %v851_v6 = vld [vmem:[%s1261_s1 + $0x18] sm:$0xff] (!%p178_p9)   ;;  %v1074_v52 = vld [vmem:[%s1262_s2] ss:$0 sm:$0xff] (!%p178_p9) }
   0xf   : > { %760 = vmatpush3.bf16.msra.mxu0 (!%p178_p9), %v848_v0  ;;  %803 = vmatpush3.bf16.msra.mxu1 (!%p178_p9), %v848_v0  ;;  %s707_s30 = sshll.u32 (!%p178_p9), %s205_s14, 8  ;;  %s738_s5 = sshll.u32 (!%p178_p9), %s965_s19, 12 }
  0x10   : > { %761 = vmatprep.subr.bf16.mxu0 (!%p178_p9), %v849_v1  ;;  %800 = vmatprep.subr.bf16.mxu1 (!%p178_p9), %v849_v1  ;;  %s1219_s9 = scalar_lea.sflag (!%p178_p9), [#allocation3], %s205_s14 }
  0x13   : > { %762 = vmatpush3.bf16.msra.mxu0 (!%p178_p9), %v849_v1  ;;  %804 = vmatpush3.bf16.msra.mxu1 (!%p178_p9), %v849_v1 }
  0x14   : > { %763 = vmatprep.subr.bf16.mxu0 (!%p178_p9), %v850_v2  ;;  %801 = vmatprep.subr.bf16.mxu1 (!%p178_p9), %v850_v2 }
  0x15   : > { %s1272_s29 = smov (!%p209_p10, %s708_s29), 63 }
  0x16   : > { %s709_s8 = sshll.u32 %s1272_s29, 3  ;;  %s1094_s29 = scalar_lea.vmem [#allocation2], %s707_s30 }
  0x17   : > { %s1010_s11 = scalar_lea.vmem %s1260_s0, %s709_s8  ;;  %764 = vmatpush3.bf16.msra.mxu0 %v850_v2  ;;  %805 = vmatpush3.bf16.msra.mxu1 %v850_v2  ;;  %s1069_s23 = scalar_lea.vmem %s1263_s3, %s709_s8 }
  0x18   : > { %v222_v3 = vld [vmem:[%s1010_s11] sm:$0xff]  ;;  %v223_v4 = vld [vmem:[%s1010_s11 + $0x8] sm:$0xff]  ;;  %v224_v10 = vld [vmem:[%s1010_s11 + $0x10] sm:$0xff]  ;;  %765 = vmatprep.subr.bf16.mxu0 %v851_v6  ;;  %802 = vmatprep.subr.bf16.mxu1 %v851_v6  ;;  %s629_s6 = sshll.u32 %s1094_s29, 4  ;;  %s1201_s8 = scalar_lea.hbm %s1264_s4, %s738_s5  ;;  %s1203_s6 = int_to_ptr.vmem [resolvable:$true] %s629_s6 }
  0x19   : > { %v238_v5 = vld [vmem:[%s1010_s11 + $0x80] sm:$0xff]  ;;  %v254_v7 = vpack.c.bf16 %v223_v4, %v222_v3  ;;  %v239_v8 = vld [vmem:[%s1010_s11 + $0x88] sm:$0xff]  ;;  %v225_v11 = vld [vmem:[%s1010_s11 + $0x18] sm:$0xff]  ;;  %s852_s10 = scalar_lea.vmem %s1203_s6, 4096 }
  0x1a   : > { %v262_v9 = vpack.c.bf16 %v239_v8, %v238_v5  ;;  %v240_v12 = vld [vmem:[%s1010_s11 + $0x90] sm:$0xff]  ;;  %v241_v13 = vld [vmem:[%s1010_s11 + $0x98] sm:$0xff]  ;;  %v226_v14 = vld [vmem:[%s1010_s11 + $0x20] sm:$0xff]  ;;  %v255_v18 = vpack.c.bf16 %v225_v11, %v224_v10  ;;  %p853_p11 = scmp.ne.s32.totalorder %s1203_s6, %s852_s10 }
  0x1b   : > { %767 = vmatprep.mubr.msk.bf16.mxu0 %vm309_vm0, %v254_v7  ;;  %v227_v15 = vld [vmem:[%s1010_s11 + $0x28] sm:$0xff]  ;;  %v242_v16 = vld [vmem:[%s1010_s11 + $0xa0] sm:$0xff]  ;;  %v263_v19 = vpack.c.bf16 %v241_v13, %v240_v12  ;;  %766 = vmatpush3.bf16.msra.mxu0 %v851_v6  ;;  %v228_v22 = vld [vmem:[%s1010_s11 + $0x30] sm:$0xff] }
  0x1c   : > { %v243_v17 = vld [vmem:[%s1010_s11 + $0xa8] sm:$0xff]  ;;  %783 = vmatprep.mubr.msk.bf16.mxu1 %vm309_vm0, %v262_v9  ;;  %806 = vmatpush3.bf16.msra.mxu1 %v851_v6  ;;  %v256_v20 = vpack.c.bf16 %v227_v15, %v226_v14  ;;  %v229_v23 = vld [vmem:[%s1010_s11 + $0x38] sm:$0xff]  ;;  %v244_v24 = vld [vmem:[%s1010_s11 + $0xb0] sm:$0xff]  ;;  %p854_p12 = pnand %p853_p11, %p982_p5 }
  0x1d   : > { %v264_v21 = vpack.c.bf16 %v243_v17, %v242_v16  ;;  %v245_v25 = vld [vmem:[%s1010_s11 + $0xb8] sm:$0xff]  ;;  %v230_v26 = vld [vmem:[%s1010_s11 + $0x40] sm:$0xff]  ;;  %v231_v27 = vld [vmem:[%s1010_s11 + $0x48] sm:$0xff]  ;;  %v257_v30 = vpack.c.bf16 %v229_v23, %v228_v22 }
  0x1e   : > { %768 = vmatmul.mubr.msk.bf16.vlgmr.msra.gmra.mrb[0].mxu0 %vm309_vm0, %v255_v18  ;;  %v246_v28 = vld [vmem:[%s1010_s11 + $0xc0] sm:$0xff]  ;;  %v247_v29 = vld [vmem:[%s1010_s11 + $0xc8] sm:$0xff]  ;;  %v265_v31 = vpack.c.bf16 %v245_v25, %v244_v24  ;;  %v258_v32 = vpack.c.bf16 %v231_v27, %v230_v26  ;;  %v232_v34 = vld [vmem:[%s1010_s11 + $0x50] sm:$0xff]  ;;  %p855_p13 = pneg %p854_p12 }
  0x1f   : > { %784 = vmatmul.mubr.msk.bf16.vlgmr.msra.gmra.mrb[0].mxu1 %vm309_vm0, %v263_v19  ;;  %771 = vmatprep.mubr.msk.bf16.mxu0 %vm309_vm0, %v256_v20  ;;  %v266_v33 = vpack.c.bf16 %v247_v29, %v246_v28  ;;  %v233_v35 = vld [vmem:[%s1010_s11 + $0x58] sm:$0xff]  ;;  %v248_v36 = vld [vmem:[%s1010_s11 + $0xd0] sm:$0xff]  ;;  %v234_v38 = vld [vmem:[%s1010_s11 + $0x60] sm:$0xff] }
  0x20   : > { %787 = vmatprep.mubr.msk.bf16.mxu1 %vm309_vm0, %v264_v21  ;;  %v249_v37 = vld [vmem:[%s1010_s11 + $0xd8] sm:$0xff]  ;;  %v235_v39 = vld [vmem:[%s1010_s11 + $0x68] sm:$0xff]  ;;  %v250_v40 = vld [vmem:[%s1010_s11 + $0xe0] sm:$0xff]  ;;  %v259_v42 = vpack.c.bf16 %v233_v35, %v232_v34 }
  0x21   : > { %v251_v41 = vld [vmem:[%s1010_s11 + $0xe8] sm:$0xff]  ;;  %v267_v43 = vpack.c.bf16 %v249_v37, %v248_v36  ;;  %v260_v44 = vpack.c.bf16 %v235_v39, %v234_v38  ;;  %v236_v46 = vld [vmem:[%s1010_s11 + $0x70] sm:$0xff]  ;;  %v237_v47 = vld [vmem:[%s1010_s11 + $0x78] sm:$0xff] }
  0x22   : > { %v268_v45 = vpack.c.bf16 %v251_v41, %v250_v40  ;;  %v252_v48 = vld [vmem:[%s1010_s11 + $0xf0] sm:$0xff]  ;;  %v253_v49 = vld [vmem:[%s1010_s11 + $0xf8] sm:$0xff]  ;;  %v261_v50 = vpack.c.bf16 %v237_v47, %v236_v46  ;;  %v519_v60 = vld [vmem:[%s1069_s23] sm:$0xff]  ;;  %s916_s11 = smov [#allocation2]  }
  0x23   : > { %v269_v51 = vpack.c.bf16 %v253_v49, %v252_v48  ;;  %v521_v54 = vld [vmem:[%s1069_s23 + $0x10] sm:$0xff]  ;;  %v535_v62 = vld [vmem:[%s1069_s23 + $0x80] sm:$0xff]  ;;  %v522_v2 = vld [vmem:[%s1069_s23 + $0x18] sm:$0xff]  ;;  %s856_s12 = sshll.u32 %s916_s11, 4  ;;  %s857_s12 = int_to_ptr.vmem [resolvable:$false] %s856_s12 }
  0x24   : > { %v537_v56 = vld [vmem:[%s1069_s23 + $0x90] sm:$0xff]  ;;  %v538_v4 = vld [vmem:[%s1069_s23 + $0x98] sm:$0xff]  ;;  %v520_v10 = vld [vmem:[%s1069_s23 + $0x8] sm:$0xff]  ;;  %s858_s13 = scalar_lea.vmem %s857_s12, 8192  ;;  %p859_p0 = scmp.lt.s32.totalorder %s1203_s6, %s857_s12 }
  0x25   : > { %v536_v12 = vld [vmem:[%s1069_s23 + $0x88] sm:$0xff]  ;;  %v525_v22 = vld [vmem:[%s1069_s23 + $0x30] sm:$0xff]  ;;  %v523_v28 = vld [vmem:[%s1069_s23 + $0x20] sm:$0xff]  ;;  %p860_p1 = scmp.lt.s32.totalorder %s858_s13, %s852_s10 }
  0x26   : > { %772 = vmatmul.mubr.msk.bf16.gmra.mrb[4].mxu0 %vm309_vm0, %v257_v30  ;;  %v541_v24 = vld [vmem:[%s1069_s23 + $0xb0] sm:$0xff]  ;;  %v539_v30 = vld [vmem:[%s1069_s23 + $0xa0] sm:$0xff]  ;;  %v526_v34 = vld [vmem:[%s1069_s23 + $0x38] sm:$0xff] }
  0x27   : > { %788 = vmatmul.mubr.msk.bf16.gmra.mrb[4].mxu1 %vm309_vm0, %v265_v31  ;;  %775 = vmatprep.mubr.msk.bf16.mxu0 %vm309_vm0, %v258_v32  ;;  %v542_v36 = vld [vmem:[%s1069_s23 + $0xb8] sm:$0xff]  ;;  %p861_p2 = por %p860_p1, %p859_p0 }
  0x28   : > { %791 = vmatprep.mubr.msk.bf16.mxu1 %vm309_vm0, %v266_v33 }
  0x29   : > { %p862_p3 = pnand %p861_p2, %p855_p13 }
  0x2e   : > { %776 = vmatmul.mubr.msk.bf16.gmra.mrb[8].mxu0 %vm309_vm0, %v259_v42  ;;  %v524_v42 = vld [vmem:[%s1069_s23 + $0x28] sm:$0xff] }
  0x2f   : > { %792 = vmatmul.mubr.msk.bf16.gmra.mrb[8].mxu1 %vm309_vm0, %v267_v43  ;;  %779 = vmatprep.mubr.msk.bf16.mxu0 %vm309_vm0, %v260_v44  ;;  %v540_v44 = vld [vmem:[%s1069_s23 + $0xa8] sm:$0xff] }
  0x30   : > { %795 = vmatprep.mubr.msk.bf16.mxu1 %vm309_vm0, %v268_v45 }
  0x36   : > { %780 = vmatmul.mubr.msk.bf16.gmra.mrb[12].mxu0 %vm309_vm0, %v261_v50 }
  0x37   : > { %796 = vmatmul.mubr.msk.bf16.gmra.mrb[12].mxu1 %vm309_vm0, %v269_v51 }
  0xf1   : > { %v769_v53 = vpop.f32.mrb[0].mxu0 }
  0xf2   : > { %v785_v55 = vpop.f32.mrb[0].mxu1  ;;  %v401_v57 = vadd.f32 %v769_v53, %v1074_v52  ;;  %v392_v59 = vpop.f32.mrb[1].mxu0 }
  0xf3   : > { %v465_v58 = vadd.f32 %v785_v55, %v1074_v52  ;;  %v456_v61 = vpop.f32.mrb[1].mxu1  ;;  %v393_v63 = vadd.f32 %v1074_v52, %v392_v59  ;;  %v770_v1 = vpop.f32.mrb[2].mxu0  ;;  %v529_v55 = vld [vmem:[%s1069_s23 + $0x50] sm:$0xff] }
  0xf4   : > { %v457_v0 = vadd.f32 %v1074_v52, %v456_v61  ;;  %v786_v3 = vpop.f32.mrb[2].mxu1  ;;  %v553_v5 = vadd.f32 %v521_v54, %v401_v57  ;;  %v404_v7 = vadd.f32 %v770_v1, %v1074_v52  ;;  %v395_v9 = vpop.f32.mrb[3].mxu0  ;;  %v545_v57 = vld [vmem:[%s1069_s23 + $0xd0] sm:$0xff]  ;;  %v527_v61 = vld [vmem:[%s1069_s23 + $0x40] sm:$0xff] }
  0xf5   : > { %v569_v6 = vadd.f32 %v537_v56, %v465_v58  ;;  %v468_v8 = vadd.f32 %v786_v3, %v1074_v52  ;;  %v459_v11 = vpop.f32.mrb[3].mxu1  ;;  %v551_v13 = vadd.f32 %v519_v60, %v393_v63  ;;  %v396_v15 = vadd.f32 %v1074_v52, %v395_v9  ;;  %v543_v63 = vld [vmem:[%s1069_s23 + $0xc0] sm:$0xff]  ;;  %v530_v3 = vld [vmem:[%s1069_s23 + $0x58] sm:$0xff] }
  0xf6   : > { %v567_v14 = vadd.f32 %v535_v62, %v457_v0  ;;  %v460_v16 = vadd.f32 %v1074_v52, %v459_v11  ;;  %585 = vst.msk [vmem:[%s1094_s29 + $0x10] sm:$0xff] %vm309_vm0, %v553_v5  ;;  %v554_v17 = vadd.f32 %v522_v2, %v404_v7  ;;  %v546_v5 = vld [vmem:[%s1069_s23 + $0xd8] sm:$0xff]  ;;  %v528_v11 = vld [vmem:[%s1069_s23 + $0x48] sm:$0xff] }
  0xf7   : > { %601 = vst.msk [vmem:[%s1094_s29 + $0x90] sm:$0xff] %vm309_vm0, %v569_v6  ;;  %v570_v18 = vadd.f32 %v538_v4, %v468_v8  ;;  %583 = vst.msk [vmem:[%s1094_s29] sm:$0xff] %vm309_vm0, %v551_v13  ;;  %v552_v19 = vadd.f32 %v520_v10, %v396_v15  ;;  %v544_v13 = vld [vmem:[%s1069_s23 + $0xc8] sm:$0xff] }
  0xf8   : > { %599 = vst.msk [vmem:[%s1094_s29 + $0x80] sm:$0xff] %vm309_vm0, %v567_v14  ;;  %v568_v20 = vadd.f32 %v536_v12, %v460_v16  ;;  %586 = vst.msk [vmem:[%s1094_s29 + $0x18] sm:$0xff] %vm309_vm0, %v554_v17 }
  0xf9   : > { %602 = vst.msk [vmem:[%s1094_s29 + $0x98] sm:$0xff] %vm309_vm0, %v570_v18  ;;  %584 = vst.msk [vmem:[%s1094_s29 + $0x8] sm:$0xff] %vm309_vm0, %v552_v19  ;;  %v773_v21 = vpop.f32.mrb[4].mxu0 }
  0xfa   : > { %600 = vst.msk [vmem:[%s1094_s29 + $0x88] sm:$0xff] %vm309_vm0, %v568_v20  ;;  %v789_v23 = vpop.f32.mrb[4].mxu1  ;;  %v417_v25 = vadd.f32 %v773_v21, %v1074_v52  ;;  %v408_v27 = vpop.f32.mrb[5].mxu0 }
  0xfb   : > { %v481_v26 = vadd.f32 %v789_v23, %v1074_v52  ;;  %v472_v29 = vpop.f32.mrb[5].mxu1  ;;  %v409_v31 = vadd.f32 %v1074_v52, %v408_v27  ;;  %v774_v33 = vpop.f32.mrb[6].mxu0  ;;  %v533_v23 = vld [vmem:[%s1069_s23 + $0x70] sm:$0xff] }
  0xfc   : > { %v473_v32 = vadd.f32 %v1074_v52, %v472_v29  ;;  %v790_v35 = vpop.f32.mrb[6].mxu1  ;;  %v557_v37 = vadd.f32 %v525_v22, %v417_v25  ;;  %v420_v39 = vadd.f32 %v774_v33, %v1074_v52  ;;  %v411_v41 = vpop.f32.mrb[7].mxu0  ;;  %v549_v25 = vld [vmem:[%s1069_s23 + $0xf0] sm:$0xff]  ;;  %v531_v29 = vld [vmem:[%s1069_s23 + $0x60] sm:$0xff] }
  0xfd   : > { %v573_v38 = vadd.f32 %v541_v24, %v481_v26  ;;  %v484_v40 = vadd.f32 %v790_v35, %v1074_v52  ;;  %v475_v43 = vpop.f32.mrb[7].mxu1  ;;  %v555_v45 = vadd.f32 %v523_v28, %v409_v31  ;;  %v412_v47 = vadd.f32 %v1074_v52, %v411_v41  ;;  %v547_v31 = vld [vmem:[%s1069_s23 + $0xe0] sm:$0xff]  ;;  %v534_v35 = vld [vmem:[%s1069_s23 + $0x78] sm:$0xff] }
  0xfe   : > { %v571_v46 = vadd.f32 %v539_v30, %v473_v32  ;;  %v476_v48 = vadd.f32 %v1074_v52, %v475_v43  ;;  %589 = vst.msk [vmem:[%s1094_s29 + $0x30] sm:$0xff] %vm309_vm0, %v557_v37  ;;  %v558_v49 = vadd.f32 %v526_v34, %v420_v39  ;;  %v550_v37 = vld [vmem:[%s1069_s23 + $0xf8] sm:$0xff]  ;;  %v532_v43 = vld [vmem:[%s1069_s23 + $0x68] sm:$0xff] }
  0xff   : > { %605 = vst.msk [vmem:[%s1094_s29 + $0xb0] sm:$0xff] %vm309_vm0, %v573_v38  ;;  %v574_v50 = vadd.f32 %v542_v36, %v484_v40  ;;  %587 = vst.msk [vmem:[%s1094_s29 + $0x20] sm:$0xff] %vm309_vm0, %v555_v45  ;;  %v556_v51 = vadd.f32 %v524_v42, %v412_v47  ;;  %v548_v45 = vld [vmem:[%s1069_s23 + $0xe8] sm:$0xff] }
 0x100   : > { %603 = vst.msk [vmem:[%s1094_s29 + $0xa0] sm:$0xff] %vm309_vm0, %v571_v46  ;;  %v572_v53 = vadd.f32 %v540_v44, %v476_v48  ;;  %590 = vst.msk [vmem:[%s1094_s29 + $0x38] sm:$0xff] %vm309_vm0, %v558_v49 }
 0x101   : > { %606 = vst.msk [vmem:[%s1094_s29 + $0xb8] sm:$0xff] %vm309_vm0, %v574_v50  ;;  %588 = vst.msk [vmem:[%s1094_s29 + $0x28] sm:$0xff] %vm309_vm0, %v556_v51  ;;  %v777_v54 = vpop.f32.mrb[8].mxu0 }
 0x102   : > { %604 = vst.msk [vmem:[%s1094_s29 + $0xa8] sm:$0xff] %vm309_vm0, %v572_v53  ;;  %v793_v56 = vpop.f32.mrb[8].mxu1  ;;  %v433_v58 = vadd.f32 %v777_v54, %v1074_v52  ;;  %v424_v60 = vpop.f32.mrb[9].mxu0 }
 0x103   : > { %v497_v59 = vadd.f32 %v793_v56, %v1074_v52  ;;  %v488_v62 = vpop.f32.mrb[9].mxu1  ;;  %v425_v0 = vadd.f32 %v1074_v52, %v424_v60  ;;  %v778_v2 = vpop.f32.mrb[10].mxu0 }
 0x104   : > { %v489_v1 = vadd.f32 %v1074_v52, %v488_v62  ;;  %v794_v4 = vpop.f32.mrb[10].mxu1  ;;  %v561_v6 = vadd.f32 %v529_v55, %v433_v58  ;;  %v436_v8 = vadd.f32 %v778_v2, %v1074_v52  ;;  %v427_v10 = vpop.f32.mrb[11].mxu0 }
 0x105   : > { %v577_v7 = vadd.f32 %v545_v57, %v497_v59  ;;  %v500_v9 = vadd.f32 %v794_v4, %v1074_v52  ;;  %v491_v12 = vpop.f32.mrb[11].mxu1  ;;  %v559_v14 = vadd.f32 %v527_v61, %v425_v0  ;;  %v428_v16 = vadd.f32 %v1074_v52, %v427_v10 }
 0x106   : > { %v575_v15 = vadd.f32 %v543_v63, %v489_v1  ;;  %v492_v17 = vadd.f32 %v1074_v52, %v491_v12  ;;  %593 = vst.msk [vmem:[%s1094_s29 + $0x50] sm:$0xff] %vm309_vm0, %v561_v6  ;;  %v562_v18 = vadd.f32 %v530_v3, %v436_v8 }
 0x107   : > { %609 = vst.msk [vmem:[%s1094_s29 + $0xd0] sm:$0xff] %vm309_vm0, %v577_v7  ;;  %v578_v19 = vadd.f32 %v546_v5, %v500_v9  ;;  %591 = vst.msk [vmem:[%s1094_s29 + $0x40] sm:$0xff] %vm309_vm0, %v559_v14  ;;  %v560_v20 = vadd.f32 %v528_v11, %v428_v16 }
 0x108   : > { %607 = vst.msk [vmem:[%s1094_s29 + $0xc0] sm:$0xff] %vm309_vm0, %v575_v15  ;;  %v576_v21 = vadd.f32 %v544_v13, %v492_v17  ;;  %594 = vst.msk [vmem:[%s1094_s29 + $0x58] sm:$0xff] %vm309_vm0, %v562_v18 }
 0x109   : > { %610 = vst.msk [vmem:[%s1094_s29 + $0xd8] sm:$0xff] %vm309_vm0, %v578_v19  ;;  %592 = vst.msk [vmem:[%s1094_s29 + $0x48] sm:$0xff] %vm309_vm0, %v560_v20  ;;  %v781_v22 = vpop.f32.mrb[12].mxu0 }
 0x10a   : > { %608 = vst.msk [vmem:[%s1094_s29 + $0xc8] sm:$0xff] %vm309_vm0, %v576_v21  ;;  %v797_v24 = vpop.f32.mrb[12].mxu1  ;;  %v449_v26 = vadd.f32 %v781_v22, %v1074_v52  ;;  %v440_v28 = vpop.f32.mrb[13].mxu0 }
 0x10b   : > { %v513_v27 = vadd.f32 %v797_v24, %v1074_v52  ;;  %v504_v30 = vpop.f32.mrb[13].mxu1  ;;  %v441_v32 = vadd.f32 %v1074_v52, %v440_v28  ;;  %v782_v34 = vpop.f32.mrb[14].mxu0 }
 0x10c   : > { %v505_v33 = vadd.f32 %v1074_v52, %v504_v30  ;;  %v798_v36 = vpop.f32.mrb[14].mxu1  ;;  %v565_v38 = vadd.f32 %v533_v23, %v449_v26  ;;  %v452_v40 = vadd.f32 %v782_v34, %v1074_v52  ;;  %v443_v42 = vpop.f32.mrb[15].mxu0 }
 0x10d   : > { %v581_v39 = vadd.f32 %v549_v25, %v513_v27  ;;  %v516_v41 = vadd.f32 %v798_v36, %v1074_v52  ;;  %v507_v44 = vpop.f32.mrb[15].mxu1  ;;  %v563_v46 = vadd.f32 %v531_v29, %v441_v32  ;;  %v444_v48 = vadd.f32 %v1074_v52, %v443_v42 }
 0x10e   : > { %v579_v47 = vadd.f32 %v547_v31, %v505_v33  ;;  %v508_v49 = vadd.f32 %v1074_v52, %v507_v44  ;;  %597 = vst.msk [vmem:[%s1094_s29 + $0x70] sm:$0xff] %vm309_vm0, %v565_v38  ;;  %v566_v50 = vadd.f32 %v534_v35, %v452_v40 }
 0x10f   : > { %613 = vst.msk [vmem:[%s1094_s29 + $0xf0] sm:$0xff] %vm309_vm0, %v581_v39  ;;  %v582_v51 = vadd.f32 %v550_v37, %v516_v41  ;;  %595 = vst.msk [vmem:[%s1094_s29 + $0x60] sm:$0xff] %vm309_vm0, %v563_v46  ;;  %v564_v52 = vadd.f32 %v532_v43, %v444_v48 }
 0x110   : > { %611 = vst.msk [vmem:[%s1094_s29 + $0xe0] sm:$0xff] %vm309_vm0, %v579_v47  ;;  %v580_v53 = vadd.f32 %v548_v45, %v508_v49  ;;  %598 = vst.msk [vmem:[%s1094_s29 + $0x78] sm:$0xff] %vm309_vm0, %v566_v50 }
 0x111   : > { %614 = vst.msk [vmem:[%s1094_s29 + $0xf8] sm:$0xff] %vm309_vm0, %v582_v51  ;;  %596 = vst.msk [vmem:[%s1094_s29 + $0x68] sm:$0xff] %vm309_vm0, %v564_v52 }
 0x112   : > { %612 = vst.msk [vmem:[%s1094_s29 + $0xe8] sm:$0xff] %vm309_vm0, %v580_v53 }
 0x113   : > { %865 = shalt.err (!%p862_p3)
}
 0x114   : > { %s866_s14 = scalar_lea.hbm %s1201_s8, 4096  ;;  %s870_s23 = scalar_lea.hbm %s1264_s4, 8192 }
 0x115   : > { %p867_p4 = scmp.ne.s32.totalorder %s1201_s8, %s866_s14  ;;  %p871_p9 = scmp.lt.u32.totalorder %s1201_s8, %s1264_s4 }
 0x116   : > { %p872_p10 = scmp.lt.u32.totalorder %s870_s23, %s866_s14  ;;  %p874_p12 = scmp.lt.u32.totalorder %s866_s14, %s1201_s8 }
 0x117   : > { %p868_p7 = pnand %p867_p4, %p982_p5 }
 0x118   : > { %p873_p11 = por %p872_p10, %p871_p9 }
 0x119   : > { %p869_p8 = pneg %p868_p7 }
 0x11a   : > { %p875_p13 = por %p874_p12, %p873_p11 }
 0x11c   : > { %p876_p0 = pnand %p875_p13, %p869_p8 }
 0x11e   : > { %879 = shalt.err (!%p876_p0)
}
 0x11f   : > { %s917_s30 = smov 128   ;;  %s918_s29 = smov 8  }
 0x120   : > { %807 = dma.vmem_to_hbm [thread:$0]  (%p982_p5), %s1203_s6, 4096, %s1201_s8, %s1219_s9, %s917_s30, %s917_s30, %s918_s29  }
 0x121 PF: > { %p813_p1 = scmp.ge.s32.totalorder %s914_s18, 2  ;;  %s644_s5 = sand.u32 1, %s902_s15  }
 0x122   : > { %s645_s19 = scalar_lea.sflag [#allocation3], %s644_s5 }
 0x123   : > { %p810_p2 = pnand %p813_p1, %p986_p6 }
 0x125   : > { %897 = dma.done.wait (!%p810_p2), %s645_s19, 4096  }
 0x126   : > { %899 = vsyncadd (!%p810_p2), %s645_s19, 4294963200  ;;  %p14_p3 = scmp.ge.s32.totalorder %s969_s21, 4   ;;  %s1267_s15 = smov %s906_s16 }
 0x127   : > { %s1268_s16 = smov %s910_s17  ;;  %s1269_s17 = smov %s980_s24 }
 0x128   : > { %s1270_s18 = smov %s969_s21  ;;  %16 = sbr.rel (!%p14_p3) target bundleno = 3 (0x3), region = 74 }
 0x12f   :  { %650 = vsyncpa [#allocation3], 1 }
 0x130   :  { %652 = vsyncpa [#allocation3 + $0x1], 1 }

</bundles_post_ra>
